<compile_context>
chip_gen: v6e
topology: v6e:2x2x1
jax: 0.10.0
libtpu: 0.0.40
codegen_flags: <defaults>
</compile_context>

<pallas_src>
import functools

import jax
import jax.numpy as jnp
from jax import lax
from jax.experimental import pallas as pl
from jax.experimental.pallas import tpu as pltpu

NODE_CLASSES = 12        # OneHot(12)
RBF_DIM = 16             # RBF(16, ...)
HIDDEN = 128             # MLP hidden width
NODE_FEATURES = 32
EDGE_FEATURES = 32
LANE_TILE = 2048         # entities per grid step (lanes); multiple of 128, ~2 MiB/step VMEM


# ---------------------------------------------------------------------------
# Kernels (lane-dense: entities on lanes, features on sublanes)
# ---------------------------------------------------------------------------
def _node_kernel(nodes_ref, table_ref, out_ref):
    """OneHot(12) -> MLP folded into a (32, 12) table; one tiny f32 matmul per tile."""
    tn = nodes_ref.shape[1]
    cls = nodes_ref[...]                                             # (1, tn) int32
    sub = lax.broadcasted_iota(jnp.int32, (NODE_CLASSES, tn), 0)     # (12, tn)
    onehot = (cls == sub).astype(jnp.float32)                        # (12, tn); pad class -1 -> 0
    out = jnp.dot(table_ref[...], onehot,                            # (32,12)@(12,tn)
                  preferred_element_type=jnp.float32)
    out_ref[...] = out.astype(out_ref.dtype)


def _edge_kernel(dists_ref, centers_ref, w1t_ref, b1_ref, w2t_ref, b2_ref, out_ref):
    """RBF(16) -> Linear(16,128) -> ReLU -> Linear(128,32); all f32 (MXU-friendly, exact-ish)."""
    diff = dists_ref[...] - centers_ref[...]                         # (1,tn)-(16,1) -> (16,tn)
    rbf = jnp.exp(-(diff * diff))                                    # gamma pre-folded via sqrt scale
    h = jnp.dot(w1t_ref[...], rbf,                                   # (128,16)@(16,tn)
                preferred_element_type=jnp.float32) + b1_ref[...]
    h = jnp.maximum(h, 0.0)                                          # ReLU (f32)
    out = jnp.dot(w2t_ref[...], h,                                   # (32,128)@(128,tn)
                  preferred_element_type=jnp.float32) + b2_ref[...]
    out_ref[...] = out.astype(out_ref.dtype)


# ---------------------------------------------------------------------------
# Wrapper: one jit, two right-sized pallas_calls (node grid != edge grid)
# ---------------------------------------------------------------------------
@functools.partial(jax.jit, static_argnames=("tile", "feature_major", "out_dtype"))
def molecule_encoder(nodes, dists, node_params, edge_params, centers, gamma,
                     *, tile=LANE_TILE, feature_major=False, out_dtype=jnp.float32):
    """nodes: (N,) int atomic numbers; dists: (E,) float distances.

    Returns (node_features, edge_features).  Default layout matches the PyTorch module:
    (N, 32) / (E, 32).  Set feature_major=True to get (32, N) / (32, E) and skip the
    extra HBM transpose pass; set out_dtype=jnp.bfloat16 to halve output traffic.
    """
    n = int(nodes.shape[0])
    e = int(dists.shape[0])
    const2d = lambda i: (0, 0)                                       # weights stay VMEM-resident

    # ---------------- node path ----------------
    nw1, nb1, nw2, nb2 = node_params
    # OneHot(12) -> Linear -> ReLU -> Linear == 12-way lookup; fold to a (32, 12) table (exact).
    table = jnp.maximum(jnp.eye(NODE_CLASSES, dtype=jnp.float32) @ nw1 + nb1, 0.0) @ nw2 + nb2
    table_t = table.T.astype(jnp.float32)                            # (32, 12)

    if n == 0:
        node_out = jnp.zeros((NODE_FEATURES, 0), out_dtype)
    else:
        n_tiles = pl.cdiv(n, tile)
        n_pad = n_tiles * tile
        # Pad class = -1 -> all-zero one-hot; padded columns are sliced off afterwards.
        nodes_p = jnp.full((1, n_pad), -1, jnp.int32).at[0, :n].set(nodes.astype(jnp.int32))
        node_out = pl.pallas_call(
            _node_kernel,
            grid=(n_tiles,),
            out_shape=jax.ShapeDtypeStruct((NODE_FEATURES, n_pad), out_dtype),
            in_specs=[
                pl.BlockSpec((1, tile), lambda i: (0, i)),           # node classes
                pl.BlockSpec((NODE_FEATURES, NODE_CLASSES), const2d),# folded table
            ],
            out_specs=pl.BlockSpec((NODE_FEATURES, tile), lambda i: (0, i)),
            compiler_params=pltpu.CompilerParams(
                dimension_semantics=("parallel",)),                  # megacore / v7x dual-TC
        )(nodes_p, table_t)

    # ---------------- edge path ----------------
    ew1, eb1, ew2, eb2 = edge_params
    ew1t = ew1.T.astype(jnp.float32)                                 # (128, 16)
    eb1c = eb1.reshape(HIDDEN, 1).astype(jnp.float32)                # (128, 1)
    ew2t = ew2.T.astype(jnp.float32)                                 # (32, 128)
    eb2c = eb2.reshape(EDGE_FEATURES, 1).astype(jnp.float32)         # (32, 1)
    # Fold gamma: exp(-gamma*(d-c)^2) == exp(-(sqrt(gamma)*d - sqrt(gamma)*c)^2).
    sqrt_g = jnp.sqrt(jnp.asarray(gamma, jnp.float32))
    centers_c = centers.reshape(RBF_DIM, 1).astype(jnp.float32) * sqrt_g   # (16, 1)

    if e == 0:
        edge_out = jnp.zeros((EDGE_FEATURES, 0), out_dtype)
    else:
        e_tiles = pl.cdiv(e, tile)
        e_pad = e_tiles * tile
        dists_p = jnp.zeros((1, e_pad), jnp.float32).at[0, :e].set(
            dists.astype(jnp.float32) * sqrt_g)
        edge_out = pl.pallas_call(
            _edge_kernel,
            grid=(e_tiles,),
            out_shape=jax.ShapeDtypeStruct((EDGE_FEATURES, e_pad), out_dtype),
            in_specs=[
                pl.BlockSpec((1, tile), lambda i: (0, i)),           # scaled distances
                pl.BlockSpec((RBF_DIM, 1), const2d),                 # scaled RBF centers
                pl.BlockSpec((HIDDEN, RBF_DIM), const2d),            # W1^T
                pl.BlockSpec((HIDDEN, 1), const2d),                  # b1
                pl.BlockSpec((EDGE_FEATURES, HIDDEN), const2d),      # W2^T
                pl.BlockSpec((EDGE_FEATURES, 1), const2d),           # b2
            ],
            out_specs=pl.BlockSpec((EDGE_FEATURES, tile), lambda i: (0, i)),
            compiler_params=pltpu.CompilerParams(
                dimension_semantics=("parallel",)),
        )(dists_p, centers_c, ew1t, eb1c, ew2t, eb2c)

    node_out = node_out[:, :n]
    edge_out = edge_out[:, :e]
    if feature_major:
        return node_out, edge_out                                    # (32, N), (32, E): no transpose pass
    return node_out.T, edge_out.T                                    # module convention (N,32), (E,32)


# ---------------------------------------------------------------------------
# Deterministic parameter init (synthetic; matches nn.Linear shapes)
# ---------------------------------------------------------------------------
def _init_mlp(key, dims):
    """dims = (d_in, d_hidden, d_out)."""
    k1, k2 = jax.random.split(key)
    d0, d1, d2 = dims
    w1 = jax.random.normal(k1, (d0, d1), jnp.float32) * (1.0 / jnp.sqrt(d0))
    b1 = jnp.zeros((1, d1), jnp.float32)
    w2 = jax.random.normal(k2, (d1, d2), jnp.float32) * (1.0 / jnp.sqrt(d1))
    b2 = jnp.zeros((1, d2), jnp.float32)
    return (w1, b1, w2, b2)


def _rbf_centers(num, lo, hi):
    # TODO(synk): exact RBF definition of gnn's RBF class is not given; using a standard
    # Gaussian RBF with evenly-spaced centers and width = grid spacing.
    centers = jnp.linspace(lo, hi, num, dtype=jnp.float32)
    width = (hi - lo) / (num - 1)
    gamma = 1.0 / (2.0 * width * width)
    return centers, float(gamma)


# ---------------------------------------------------------------------------
# Pure-JAX reference (for correctness check)
# ---------------------------------------------------------------------------
def _ref_node(nodes, params):
    w1, b1, w2, b2 = params
    oh = jax.nn.one_hot(nodes, NODE_CLASSES, dtype=jnp.float32)
    h = jnp.maximum(oh @ w1 + b1, 0.0)
    return h @ w2 + b2


def _ref_edge(dists, params, centers, gamma):
    w1, b1, w2, b2 = params
    diff = dists.reshape(-1, 1) - centers.reshape(1, -1)
    rbf = jnp.exp(-gamma * diff * diff)
    h = jnp.maximum(rbf @ w1 + b1, 0.0)
    return h @ w2 + b2


# ---------------------------------------------------------------------------
if __name__ == "__main__":
    key = jax.random.PRNGKey(0)
    k_nodes, k_edges, k_nmlp, k_emlp = jax.random.split(key, 4)

    # Small batch of 4 molecules concatenated along the entity axis (8 atoms / 32 edges each).
    N, E = 32, 128
    nodes = jax.random.randint(k_nodes, (N,), 0, NODE_CLASSES, dtype=jnp.int32)
    edges = jax.random.uniform(k_edges, (E,), jnp.float32, 0.0, 3.0)

    node_params = _init_mlp(k_nmlp, (NODE_CLASSES, HIDDEN, NODE_FEATURES))
    edge_params = _init_mlp(k_emlp, (RBF_DIM, HIDDEN, EDGE_FEATURES))
    edge_centers, edge_gamma = _rbf_centers(RBF_DIM, 0.0, 3.0)
    # face_encoder params (RBF(16,(0,1)) + MLP(16,128,32)) are unused by the reference forward();
    # see TODO(synk) at top of file.

    node_feats, edge_feats = molecule_encoder(
        nodes, edges, node_params, edge_params, edge_centers, edge_gamma)
    node_feats = jax.block_until_ready(node_feats)
    edge_feats = jax.block_until_ready(edge_feats)

    # Correctness against the pure-JAX f32 reference.
    ref_nodes = _ref_node(nodes, node_params)
    ref_edges = _ref_edge(edges, edge_params, edge_centers, edge_gamma)
    assert node_feats.shape == (N, NODE_FEATURES)
    assert edge_feats.shape == (E, EDGE_FEATURES)
    # Node path: exact 12-way table selection.
    assert jnp.allclose(node_feats, ref_nodes, atol=1e-3, rtol=1e-3)
    # Edge path: f32 kernel matmuls vs default-precision XLA reference -> loose tolerance
    # to cover backend matmul-precision differences.
    assert jnp.allclose(edge_feats, ref_edges, atol=2e-2, rtol=2e-2)

    print("KERNEL_OK")
</pallas_src>

<mosaic_0001>
module attributes {stable_mosaic.version = 11 : i64} {
  func.func @_edge_kernel(%arg0: i32, %arg1: memref<1x2048xf32, #tpu.memory_space<vmem>>, %arg2: memref<16x1xf32, #tpu.memory_space<vmem>>, %arg3: memref<128x16xf32, #tpu.memory_space<vmem>>, %arg4: memref<128x1xf32, #tpu.memory_space<vmem>>, %arg5: memref<32x128xf32, #tpu.memory_space<vmem>>, %arg6: memref<32x1xf32, #tpu.memory_space<vmem>>, %arg7: memref<32x2048xf32, #tpu.memory_space<vmem>>) attributes {dimension_semantics = [#tpu.dimension_semantics<parallel>], iteration_bounds = array<i64: 1>, scalar_prefetch = 0 : i64, scratch_operands = 0 : i64, tpu.core_type = #tpu.core_type<tc>, window_params = [{transform_indices = @transform_0, window_bounds = array<i64: 1, 2048>}, {pipeline_mode = #tpu.pipeline_mode<synchronous>, transform_indices = @transform_1, window_bounds = array<i64: 16, 1>}, {pipeline_mode = #tpu.pipeline_mode<synchronous>, transform_indices = @transform_2, window_bounds = array<i64: 128, 16>}, {pipeline_mode = #tpu.pipeline_mode<synchronous>, transform_indices = @transform_3, window_bounds = array<i64: 128, 1>}, {pipeline_mode = #tpu.pipeline_mode<synchronous>, transform_indices = @transform_4, window_bounds = array<i64: 32, 128>}, {pipeline_mode = #tpu.pipeline_mode<synchronous>, transform_indices = @transform_5, window_bounds = array<i64: 32, 1>}, {transform_indices = @transform_6, window_bounds = array<i64: 32, 2048>}]} {
    %c0 = arith.constant 0 : index
    %c0_0 = arith.constant 0 : index
    %0 = vector.load %arg1[%c0, %c0_0] : memref<1x2048xf32, #tpu.memory_space<vmem>>, vector<1x2048xf32>
    %c0_1 = arith.constant 0 : index
    %c0_2 = arith.constant 0 : index
    %1 = vector.load %arg2[%c0_1, %c0_2] : memref<16x1xf32, #tpu.memory_space<vmem>>, vector<16x1xf32>
    %2 = vector.broadcast %0 : vector<1x2048xf32> to vector<16x2048xf32>
    %3 = vector.broadcast %1 : vector<16x1xf32> to vector<16x2048xf32>
    %4 = arith.subf %2, %3 : vector<16x2048xf32>
    %5 = arith.mulf %4, %4 : vector<16x2048xf32>
    %cst = arith.constant 0.000000e+00 : f32
    %6 = vector.broadcast %cst : f32 to vector<16x2048xf32>
    %7 = arith.subf %6, %5 : vector<16x2048xf32>
    %8 = math.exp %7 : vector<16x2048xf32>
    %c0_3 = arith.constant 0 : index
    %c0_4 = arith.constant 0 : index
    %9 = vector.load %arg3[%c0_3, %c0_4] : memref<128x16xf32, #tpu.memory_space<vmem>>, vector<128x16xf32>
    %cst_5 = arith.constant dense<0.000000e+00> : vector<128x2048xf32>
    %10 = tpu.matmul %9, %8, %cst_5 {dimension_numbers = #tpu.dot_dimension_numbers<[1], [0], [0], [1], [0, 0, 1, 1], [], []>} : vector<128x16xf32>, vector<16x2048xf32>, vector<128x2048xf32> -> vector<128x2048xf32>
    %c0_6 = arith.constant 0 : index
    %c0_7 = arith.constant 0 : index
    %11 = vector.load %arg4[%c0_6, %c0_7] : memref<128x1xf32, #tpu.memory_space<vmem>>, vector<128x1xf32>
    %12 = vector.broadcast %11 : vector<128x1xf32> to vector<128x2048xf32>
    %13 = arith.addf %10, %12 : vector<128x2048xf32>
    %cst_8 = arith.constant 0.000000e+00 : f32
    %14 = vector.broadcast %cst_8 : f32 to vector<128x2048xf32>
    %15 = arith.maximumf %13, %14 : vector<128x2048xf32>
    %c0_9 = arith.constant 0 : index
    %c0_10 = arith.constant 0 : index
    %16 = vector.load %arg5[%c0_9, %c0_10] : memref<32x128xf32, #tpu.memory_space<vmem>>, vector<32x128xf32>
    %cst_11 = arith.constant dense<0.000000e+00> : vector<32x2048xf32>
    %17 = tpu.matmul %16, %15, %cst_11 {dimension_numbers = #tpu.dot_dimension_numbers<[1], [0], [0], [1], [0, 0, 1, 1], [], []>} : vector<32x128xf32>, vector<128x2048xf32>, vector<32x2048xf32> -> vector<32x2048xf32>
    %c0_12 = arith.constant 0 : index
    %c0_13 = arith.constant 0 : index
    %18 = vector.load %arg6[%c0_12, %c0_13] : memref<32x1xf32, #tpu.memory_space<vmem>>, vector<32x1xf32>
    %19 = vector.broadcast %18 : vector<32x1xf32> to vector<32x2048xf32>
    %20 = arith.addf %17, %19 : vector<32x2048xf32>
    %c0_14 = arith.constant 0 : index
    %c0_15 = arith.constant 0 : index
    %21 = vector.load %arg7[%c0_14, %c0_15] : memref<32x2048xf32, #tpu.memory_space<vmem>>, vector<32x2048xf32>
    tpu.vector_store %arg7[%c0_14, %c0_15], %20 {strides = array<i32>} : memref<32x2048xf32, #tpu.memory_space<vmem>>, vector<32x2048xf32>,
    return
  }
  func.func @transform_0(%arg0: i32) -> (i32, i32) {
    %c0_i32 = arith.constant 0 : i32
    %c0_i32_0 = arith.constant 0 : i32
    return %c0_i32, %arg0 : i32, i32
  }
  func.func @transform_1(%arg0: i32) -> (i32, i32) {
    %c0_i32 = arith.constant 0 : i32
    %c0_i32_0 = arith.constant 0 : i32
    %c0_i32_1 = arith.constant 0 : i32
    return %c0_i32, %c0_i32_0 : i32, i32
  }
  func.func @transform_2(%arg0: i32) -> (i32, i32) {
    %c0_i32 = arith.constant 0 : i32
    %c0_i32_0 = arith.constant 0 : i32
    %c0_i32_1 = arith.constant 0 : i32
    return %c0_i32, %c0_i32_0 : i32, i32
  }
  func.func @transform_3(%arg0: i32) -> (i32, i32) {
    %c0_i32 = arith.constant 0 : i32
    %c0_i32_0 = arith.constant 0 : i32
    %c0_i32_1 = arith.constant 0 : i32
    return %c0_i32, %c0_i32_0 : i32, i32
  }
  func.func @transform_4(%arg0: i32) -> (i32, i32) {
    %c0_i32 = arith.constant 0 : i32
    %c0_i32_0 = arith.constant 0 : i32
    %c0_i32_1 = arith.constant 0 : i32
    return %c0_i32, %c0_i32_0 : i32, i32
  }
  func.func @transform_5(%arg0: i32) -> (i32, i32) {
    %c0_i32 = arith.constant 0 : i32
    %c0_i32_0 = arith.constant 0 : i32
    %c0_i32_1 = arith.constant 0 : i32
    return %c0_i32, %c0_i32_0 : i32, i32
  }
  func.func @transform_6(%arg0: i32) -> (i32, i32) {
    %c0_i32 = arith.constant 0 : i32
    %c0_i32_0 = arith.constant 0 : i32
    return %c0_i32, %arg0 : i32, i32
  }
}

module attributes {stable_mosaic.version = 11 : i64} {
  func.func @_node_kernel(%arg0: i32, %arg1: memref<1x2048xi32, #tpu.memory_space<vmem>>, %arg2: memref<32x12xf32, #tpu.memory_space<vmem>>, %arg3: memref<32x2048xf32, #tpu.memory_space<vmem>>) attributes {dimension_semantics = [#tpu.dimension_semantics<parallel>], iteration_bounds = array<i64: 1>, scalar_prefetch = 0 : i64, scratch_operands = 0 : i64, tpu.core_type = #tpu.core_type<tc>, window_params = [{transform_indices = @transform_0, window_bounds = array<i64: 1, 2048>}, {pipeline_mode = #tpu.pipeline_mode<synchronous>, transform_indices = @transform_1, window_bounds = array<i64: 32, 12>}, {transform_indices = @transform_2, window_bounds = array<i64: 32, 2048>}]} {
    %c0 = arith.constant 0 : index
    %c0_0 = arith.constant 0 : index
    %0 = vector.load %arg1[%c0, %c0_0] : memref<1x2048xi32, #tpu.memory_space<vmem>>, vector<1x2048xi32>
    %1 = tpu.iota {dimensions = array<i32: 0>} : vector<12x2048xi32>
    %2 = vector.broadcast %0 : vector<1x2048xi32> to vector<12x2048xi32>
    %3 = arith.cmpi eq, %2, %1 : vector<12x2048xi32>
    %4 = arith.extui %3 : vector<12x2048xi1> to vector<12x2048xi32>
    %5 = arith.sitofp %4 : vector<12x2048xi32> to vector<12x2048xf32>
    %c0_1 = arith.constant 0 : index
    %c0_2 = arith.constant 0 : index
    %6 = vector.load %arg2[%c0_1, %c0_2] : memref<32x12xf32, #tpu.memory_space<vmem>>, vector<32x12xf32>
    %cst = arith.constant dense<0.000000e+00> : vector<32x2048xf32>
    %7 = tpu.matmul %6, %5, %cst {dimension_numbers = #tpu.dot_dimension_numbers<[1], [0], [0], [1], [0, 0, 1, 1], [], []>} : vector<32x12xf32>, vector<12x2048xf32>, vector<32x2048xf32> -> vector<32x2048xf32>
    %c0_3 = arith.constant 0 : index
    %c0_4 = arith.constant 0 : index
    %8 = vector.load %arg3[%c0_3, %c0_4] : memref<32x2048xf32, #tpu.memory_space<vmem>>, vector<32x2048xf32>
    tpu.vector_store %arg3[%c0_3, %c0_4], %7 {strides = array<i32>} : memref<32x2048xf32, #tpu.memory_space<vmem>>, vector<32x2048xf32>,
    return
  }
  func.func @transform_0(%arg0: i32) -> (i32, i32) {
    %c0_i32 = arith.constant 0 : i32
    %c0_i32_0 = arith.constant 0 : i32
    return %c0_i32, %arg0 : i32, i32
  }
  func.func @transform_1(%arg0: i32) -> (i32, i32) {
    %c0_i32 = arith.constant 0 : i32
    %c0_i32_0 = arith.constant 0 : i32
    %c0_i32_1 = arith.constant 0 : i32
    return %c0_i32, %c0_i32_0 : i32, i32
  }
  func.func @transform_2(%arg0: i32) -> (i32, i32) {
    %c0_i32 = arith.constant 0 : i32
    %c0_i32_0 = arith.constant 0 : i32
    return %c0_i32, %arg0 : i32, i32
  }
}

</mosaic_0001>

<bundles_post_ra>
// kernel: molecule_encoder.2
= control target key start
LH: loop header
LB: loop body
LE: loop exit
PB: predicated region body
PF: predicated region fallthrough
CT: control target
= control target key end

     0   :  { %v13_v0 = vlaneseq  ;;  %v1120_v1 = vmov 0.0   ;;  %vm193_vm0 = vcmask 1043456   ;;  %vm180_vm9 = vcmask 97280   ;;  %s1584_s0 = inlined_call_operand.vmem [shape: s32[1,2048], index: 0, kind: input, shape index: {}]   ;;  %s1585_s1 = inlined_call_operand.vmem [shape: f32[32,12], index: 1, kind: input, shape index: {}]   ;;  %s1586_s2 = inlined_call_operand.vmem [shape: f32[32,2048], index: 2, kind: output, shape index: {}]  }
   0x1   :  { %306 = vmatprep.mubr.f32.mxu0 %v1120_v1  ;;  %395 = vmatprep.mubr.f32.mxu1 %v1120_v1  ;;  %v11_v3 = vld [vmem:[%s1584_s0] sm:$0xff]  ;;  %v1182_v24 = vld [vmem:[%s1584_s0 + $0x8] sm:$0xff]  ;;  %v1121_v26 = vmov 1.0   ;;  %v1243_v35 = vld [vmem:[%s1585_s1 + $0x10] sm:$0xff] }
   0x2   :  { %v1139_v2 = vshrl.u32 %v13_v0, 7  ;;  %v1189_v25 = vld [vmem:[%s1585_s1] sm:$0xff]  ;;  %v1221_v33 = vld [vmem:[%s1585_s1 + $0x8] sm:$0xff]  ;;  %v1266_v40 = vld [vmem:[%s1585_s1 + $0x18] sm:$0xff] }
   0x4   :  { %v1145_v4 = vadd.s32 8, %v1139_v2  ;;  %v22_v5 = vsub.s32 1, %v1139_v2  ;;  %v30_v6 = vsub.s32 3, %v1139_v2  ;;  %v18_v7 = vsub.s32 0, %v1139_v2 }
   0x5   :  { %v26_v8 = vsub.s32 2, %v1139_v2  ;;  %v38_v9 = vsub.s32 5, %v1139_v2  ;;  %v46_v10 = vsub.s32 7, %v1139_v2  ;;  %v34_v11 = vsub.s32 4, %v1139_v2 }
   0x6   :  { %v23_v12 = vrot.slane %v11_v3, %v22_v5  ;;  %v31_v13 = vrot.slane %v11_v3, %v30_v6  ;;  %v19_v14 = vrot.slane %v11_v3, %v18_v7  ;;  %v42_v15 = vsub.s32 6, %v1139_v2 }
   0x7   :  { %v27_v16 = vrot.slane %v11_v3, %v26_v8  ;;  %v39_v17 = vrot.slane %v11_v3, %v38_v9  ;;  %v47_v18 = vrot.slane %v11_v3, %v46_v10  ;;  %v35_v19 = vrot.slane %v11_v3, %v34_v11 }
   0x8   :  { %vm97_vm1 = vcmp.eq.s32.totalorder %v23_v12, %v1145_v4  ;;  %vm99_vm2 = vcmp.eq.s32.totalorder %v31_v13, %v1145_v4  ;;  %vm96_vm3 = vcmp.eq.s32.totalorder %v19_v14, %v1145_v4  ;;  %vm81_vm4 = vcmp.eq.s32.totalorder %v23_v12, %v1139_v2 }
   0x9   :  { %v1039_v20 = vsel %vm97_vm1, 1.0, %v1120_v1  ;;  %v1041_v21 = vsel %vm99_vm2, 1.0, %v1120_v1  ;;  %v1038_v22 = vsel %vm96_vm3, 1.0, %v1120_v1  ;;  %vm98_vm5 = vcmp.eq.s32.totalorder %v27_v16, %v1145_v4 }
   0xa   :  { %1054 = vmatprep.subr.msk.mxu0 %vm193_vm0, %v1039_v20  ;;  %1062 = vmatprep.subr.msk.mxu1 %vm193_vm0, %v1041_v21  ;;  %v1040_v23 = vsel %vm98_vm5, 1.0, %v1120_v1  ;;  %vm83_vm6 = vcmp.eq.s32.totalorder %v31_v13, %v1139_v2  ;;  %vm80_vm7 = vcmp.eq.s32.totalorder %v19_v14, %v1139_v2  ;;  %vm82_vm8 = vcmp.eq.s32.totalorder %v27_v16, %v1139_v2 }
   0xb   :  { %1055 = vmatpush1.msk.msra.mxu0 %vm193_vm0, %v1038_v22  ;;  %1063 = vmatpush1.msk.msra.mxu1 %vm193_vm0, %v1040_v23  ;;  %vm101_vm10 = vcmp.eq.s32.totalorder %v39_v17, %v1145_v4  ;;  %vm103_vm11 = vcmp.eq.s32.totalorder %v47_v18, %v1145_v4  ;;  %vm100_vm12 = vcmp.eq.s32.totalorder %v35_v19, %v1145_v4 }
   0xc   :  { %1056 = vmatprep.subr.msk.mxu0 %vm81_vm4, %v1121_v26  ;;  %1064 = vmatprep.subr.msk.mxu1 %vm83_vm6, %v1121_v26  ;;  %v1043_v27 = vsel %vm101_vm10, 1.0, %v1120_v1  ;;  %v1045_v28 = vsel %vm103_vm11, 1.0, %v1120_v1  ;;  %v43_v29 = vrot.slane %v11_v3, %v42_v15  ;;  %v1042_v30 = vsel %vm100_vm12, 1.0, %v1120_v1 }
   0xd   :  { %1057 = vmatpush1.msk.msra.mxu0 %vm80_vm7, %v1121_v26  ;;  %1065 = vmatpush1.msk.msra.mxu1 %vm82_vm8, %v1121_v26  ;;  %v55_v31 = vrot.slane %v1182_v24, %v22_v5  ;;  %v63_v34 = vrot.slane %v1182_v24, %v30_v6  ;;  %vm85_vm14 = vcmp.eq.s32.totalorder %v39_v17, %v1139_v2 }
   0xe   :  { %1058 = vmatmul.mubr.msk.f32.vlgmr.msra.gmra.mxu0 %vm180_vm9, %v1189_v25  ;;  %1066 = vmatmul.mubr.msk.f32.vlgmr.msra.gmra.mxu1 %vm180_vm9, %v1189_v25  ;;  %vm102_vm13 = vcmp.eq.s32.totalorder %v43_v29, %v1145_v4  ;;  %vm87_vm15 = vcmp.eq.s32.totalorder %v47_v18, %v1139_v2  ;;  %vm84_vm1 = vcmp.eq.s32.totalorder %v35_v19, %v1139_v2 }
   0xf   :  { %1070 = vmatprep.subr.msk.mxu0 %vm193_vm0, %v1043_v27  ;;  %1078 = vmatprep.subr.msk.mxu1 %vm193_vm0, %v1045_v28  ;;  %v1044_v32 = vsel %vm102_vm13, 1.0, %v1120_v1  ;;  %vm86_vm2 = vcmp.eq.s32.totalorder %v43_v29, %v1139_v2  ;;  %vm105_vm3 = vcmp.eq.s32.totalorder %v55_v31, %v1145_v4  ;;  %vm107_vm4 = vcmp.eq.s32.totalorder %v63_v34, %v1145_v4 }
  0x10   :  { %1071 = vmatpush1.msk.msra.mxu0 %vm193_vm0, %v1042_v30  ;;  %1079 = vmatpush1.msk.msra.mxu1 %vm193_vm0, %v1044_v32  ;;  %v1047_v36 = vsel %vm105_vm3, 1.0, %v1120_v1  ;;  %v1049_v37 = vsel %vm107_vm4, 1.0, %v1120_v1  ;;  %v51_v38 = vrot.slane %v1182_v24, %v18_v7  ;;  %v59_v39 = vrot.slane %v1182_v24, %v26_v8 }
  0x11   :  { %312 = vmatprep.mubr.f32.mxu0 %v1120_v1  ;;  %401 = vmatprep.mubr.f32.mxu1 %v1120_v1  ;;  %v71_v41 = vrot.slane %v1182_v24, %v38_v9  ;;  %v79_v42 = vrot.slane %v1182_v24, %v46_v10  ;;  %vm89_vm7 = vcmp.eq.s32.totalorder %v55_v31, %v1139_v2 }
  0x12   :  { %1059 = vmatmul.mubr.msk.f32.gmra.mxu0 %vm180_vm9, %v1221_v33  ;;  %1067 = vmatmul.mubr.msk.f32.gmra.mxu1 %vm180_vm9, %v1221_v33  ;;  %vm104_vm5 = vcmp.eq.s32.totalorder %v51_v38, %v1145_v4  ;;  %vm106_vm6 = vcmp.eq.s32.totalorder %v59_v39, %v1145_v4  ;;  %vm91_vm8 = vcmp.eq.s32.totalorder %v63_v34, %v1139_v2 }
  0x13   :  { %318 = vmatprep.mubr.f32.mxu0 %v1120_v1  ;;  %407 = vmatprep.mubr.f32.mxu1 %v1120_v1  ;;  %v1046_v43 = vsel %vm104_vm5, 1.0, %v1120_v1  ;;  %v1048_v44 = vsel %vm106_vm6, 1.0, %v1120_v1  ;;  %vm109_vm10 = vcmp.eq.s32.totalorder %v71_v41, %v1145_v4  ;;  %vm111_vm11 = vcmp.eq.s32.totalorder %v79_v42, %v1145_v4 }
  0x14   :  { %1072 = vmatprep.subr.msk.mxu0 %vm85_vm14, %v1121_v26  ;;  %1080 = vmatprep.subr.msk.mxu1 %vm87_vm15, %v1121_v26  ;;  %vm88_vm12 = vcmp.eq.s32.totalorder %v51_v38, %v1139_v2  ;;  %vm90_vm13 = vcmp.eq.s32.totalorder %v59_v39, %v1139_v2  ;;  %v1051_v45 = vsel %vm109_vm10, 1.0, %v1120_v1  ;;  %v1053_v46 = vsel %vm111_vm11, 1.0, %v1120_v1 }
  0x15   :  { %1073 = vmatpush1.msk.msra.mxu0 %vm84_vm1, %v1121_v26  ;;  %1081 = vmatpush1.msk.msra.mxu1 %vm86_vm2, %v1121_v26  ;;  %v67_v47 = vrot.slane %v1182_v24, %v34_v11  ;;  %v75_v48 = vrot.slane %v1182_v24, %v42_v15  ;;  %vm93_vm1 = vcmp.eq.s32.totalorder %v71_v41, %v1139_v2 }
  0x16   :  { %1060 = vmatmul.mubr.msk.f32.gmra.mxu0 %vm180_vm9, %v1243_v35  ;;  %1068 = vmatmul.mubr.msk.f32.gmra.mxu1 %vm180_vm9, %v1243_v35  ;;  %vm95_vm2 = vcmp.eq.s32.totalorder %v79_v42, %v1139_v2 }
  0x17   :  { %324 = vmatprep.mubr.f32.mxu0 %v1120_v1  ;;  %413 = vmatprep.mubr.f32.mxu1 %v1120_v1  ;;  %vm108_vm14 = vcmp.eq.s32.totalorder %v67_v47, %v1145_v4  ;;  %vm110_vm15 = vcmp.eq.s32.totalorder %v75_v48, %v1145_v4  ;;  %vm92_vm3 = vcmp.eq.s32.totalorder %v67_v47, %v1139_v2 }
  0x18   :  { %1086 = vmatprep.subr.msk.mxu0 %vm193_vm0, %v1047_v36  ;;  %1094 = vmatprep.subr.msk.mxu1 %vm193_vm0, %v1049_v37  ;;  %v1050_v49 = vsel %vm108_vm14, 1.0, %v1120_v1  ;;  %v1052_v50 = vsel %vm110_vm15, 1.0, %v1120_v1  ;;  %vm94_vm4 = vcmp.eq.s32.totalorder %v75_v48, %v1139_v2 }
  0x1a   :  { %1061 = vmatmul.mubr.msk.f32.gmra.mxu0 %vm180_vm9, %v1266_v40  ;;  %1069 = vmatmul.mubr.msk.f32.gmra.mxu1 %vm180_vm9, %v1266_v40 }
  0x1b   :  { %484 = vmatprep.mubr.f32.mxu0 %v1120_v1  ;;  %573 = vmatprep.mubr.f32.mxu1 %v1120_v1 }
  0x1e   :  { %1074 = vmatmul.mubr.msk.f32.vlgmr.msra.gmra.mxu0 %vm180_vm9, %v1189_v25  ;;  %1082 = vmatmul.mubr.msk.f32.vlgmr.msra.gmra.mxu1 %vm180_vm9, %v1189_v25 }
  0x1f   :  { %1087 = vmatpush1.msk.msra.mxu0 %vm193_vm0, %v1046_v43  ;;  %1095 = vmatpush1.msk.msra.mxu1 %vm193_vm0, %v1048_v44 }
  0x20   :  { %490 = vmatprep.mubr.f32.mxu0 %v1120_v1  ;;  %579 = vmatprep.mubr.f32.mxu1 %v1120_v1 }
  0x21   :  { %1088 = vmatprep.subr.msk.mxu0 %vm89_vm7, %v1121_v26  ;;  %1096 = vmatprep.subr.msk.mxu1 %vm91_vm8, %v1121_v26 }
  0x22   :  { %1075 = vmatmul.mubr.msk.f32.gmra.mxu0 %vm180_vm9, %v1221_v33  ;;  %1083 = vmatmul.mubr.msk.f32.gmra.mxu1 %vm180_vm9, %v1221_v33 }
  0x23   :  { %496 = vmatprep.mubr.f32.mxu0 %v1120_v1  ;;  %585 = vmatprep.mubr.f32.mxu1 %v1120_v1 }
  0x24   :  { %1089 = vmatpush1.msk.msra.mxu0 %vm88_vm12, %v1121_v26  ;;  %1097 = vmatpush1.msk.msra.mxu1 %vm90_vm13, %v1121_v26 }
  0x25   :  { %1102 = vmatprep.subr.msk.mxu0 %vm193_vm0, %v1051_v45  ;;  %1110 = vmatprep.subr.msk.mxu1 %vm193_vm0, %v1053_v46 }
  0x26   :  { %1076 = vmatmul.mubr.msk.f32.gmra.mxu0 %vm180_vm9, %v1243_v35  ;;  %1084 = vmatmul.mubr.msk.f32.gmra.mxu1 %vm180_vm9, %v1243_v35 }
  0x27   :  { %502 = vmatprep.mubr.f32.mxu0 %v1120_v1  ;;  %591 = vmatprep.mubr.f32.mxu1 %v1120_v1 }
  0x2a   :  { %1077 = vmatmul.mubr.msk.f32.gmra.mxu0 %vm180_vm9, %v1266_v40  ;;  %1085 = vmatmul.mubr.msk.f32.gmra.mxu1 %vm180_vm9, %v1266_v40 }
  0x2b   :  { %662 = vmatprep.mubr.f32.mxu0 %v1120_v1  ;;  %751 = vmatprep.mubr.f32.mxu1 %v1120_v1 }
  0x2e   :  { %1090 = vmatmul.mubr.msk.f32.vlgmr.msra.gmra.mxu0 %vm180_vm9, %v1189_v25  ;;  %1098 = vmatmul.mubr.msk.f32.vlgmr.msra.gmra.mxu1 %vm180_vm9, %v1189_v25 }
  0x2f   :  { %1103 = vmatpush1.msk.msra.mxu0 %vm193_vm0, %v1050_v49  ;;  %1111 = vmatpush1.msk.msra.mxu1 %vm193_vm0, %v1052_v50 }
  0x30   :  { %668 = vmatprep.mubr.f32.mxu0 %v1120_v1  ;;  %757 = vmatprep.mubr.f32.mxu1 %v1120_v1 }
  0x31   :  { %1104 = vmatprep.subr.msk.mxu0 %vm93_vm1, %v1121_v26  ;;  %1112 = vmatprep.subr.msk.mxu1 %vm95_vm2, %v1121_v26 }
  0x32   :  { %1091 = vmatmul.mubr.msk.f32.gmra.mxu0 %vm180_vm9, %v1221_v33  ;;  %1099 = vmatmul.mubr.msk.f32.gmra.mxu1 %vm180_vm9, %v1221_v33 }
  0x33   :  { %674 = vmatprep.mubr.f32.mxu0 %v1120_v1  ;;  %763 = vmatprep.mubr.f32.mxu1 %v1120_v1 }
  0x34   :  { %1105 = vmatpush1.msk.msra.mxu0 %vm92_vm3, %v1121_v26  ;;  %1113 = vmatpush1.msk.msra.mxu1 %vm94_vm4, %v1121_v26 }
  0x36   :  { %1092 = vmatmul.mubr.msk.f32.gmra.mxu0 %vm180_vm9, %v1243_v35  ;;  %1100 = vmatmul.mubr.msk.f32.gmra.mxu1 %vm180_vm9, %v1243_v35 }
  0x37   :  { %680 = vmatprep.mubr.f32.mxu0 %v1120_v1  ;;  %769 = vmatprep.mubr.f32.mxu1 %v1120_v1 }
  0x3a   :  { %1093 = vmatmul.mubr.msk.f32.gmra.mxu0 %vm180_vm9, %v1266_v40  ;;  %1101 = vmatmul.mubr.msk.f32.gmra.mxu1 %vm180_vm9, %v1266_v40 }
  0x3b   :  { %840 = vmatprep.mubr.f32.mxu0 %v1120_v1  ;;  %929 = vmatprep.mubr.f32.mxu1 %v1120_v1 }
  0x3e   :  { %1106 = vmatmul.mubr.msk.f32.vlgmr.msra.gmra.mxu0 %vm180_vm9, %v1189_v25  ;;  %1114 = vmatmul.mubr.msk.f32.vlgmr.msra.gmra.mxu1 %vm180_vm9, %v1189_v25 }
  0x3f   :  { %846 = vmatprep.mubr.f32.mxu0 %v1120_v1  ;;  %935 = vmatprep.mubr.f32.mxu1 %v1120_v1 }
  0x42   :  { %1107 = vmatmul.mubr.msk.f32.gmra.mxu0 %vm180_vm9, %v1221_v33  ;;  %1115 = vmatmul.mubr.msk.f32.gmra.mxu1 %vm180_vm9, %v1221_v33 }
  0x43   :  { %852 = vmatprep.mubr.f32.mxu0 %v1120_v1  ;;  %941 = vmatprep.mubr.f32.mxu1 %v1120_v1 }
  0x46   :  { %1108 = vmatmul.mubr.msk.f32.gmra.mxu0 %vm180_vm9, %v1243_v35  ;;  %1116 = vmatmul.mubr.msk.f32.gmra.mxu1 %vm180_vm9, %v1243_v35 }
  0x47   :  { %858 = vmatprep.mubr.f32.mxu0 %v1120_v1  ;;  %947 = vmatprep.mubr.f32.mxu1 %v1120_v1 }
  0x4a   :  { %1109 = vmatmul.mubr.msk.f32.gmra.mxu0 %vm180_vm9, %v1266_v40  ;;  %1117 = vmatmul.mubr.msk.f32.gmra.mxu1 %vm180_vm9, %v1266_v40 }
  0xce   :  { %v308_v51 = vpop.f32.mrf.mxu0  ;;  %v397_v52 = vpop.f32.mrf.mxu1 }
  0xcf   :  { %954 = vst [vmem:[%s1586_s2] sm:$0xff] %v308_v51  ;;  %956 = vst [vmem:[%s1586_s2 + $0x10] sm:$0xff] %v397_v52 }
  0xd0   :  { %v310_v53 = vpop.f32.mrf.mxu0  ;;  %v399_v54 = vpop.f32.mrf.mxu1 }
  0xd1   :  { %955 = vst [vmem:[%s1586_s2 + $0x8] sm:$0xff] %v310_v53  ;;  %957 = vst [vmem:[%s1586_s2 + $0x18] sm:$0xff] %v399_v54 }
  0xd2   :  { %v314_v55 = vpop.f32.mrf.mxu0  ;;  %v403_v56 = vpop.f32.mrf.mxu1 }
  0xd3   :  { %970 = vst [vmem:[%s1586_s2 + $0x80] sm:$0xff] %v314_v55  ;;  %972 = vst [vmem:[%s1586_s2 + $0x90] sm:$0xff] %v403_v56 }
  0xd4   :  { %v316_v57 = vpop.f32.mrf.mxu0  ;;  %v405_v58 = vpop.f32.mrf.mxu1 }
  0xd5   :  { %971 = vst [vmem:[%s1586_s2 + $0x88] sm:$0xff] %v316_v57  ;;  %973 = vst [vmem:[%s1586_s2 + $0x98] sm:$0xff] %v405_v58 }
  0xd6   :  { %v320_v59 = vpop.f32.mrf.mxu0  ;;  %v409_v60 = vpop.f32.mrf.mxu1 }
  0xd7   :  { %986 = vst [vmem:[%s1586_s2 + $0x100] sm:$0xff] %v320_v59  ;;  %988 = vst [vmem:[%s1586_s2 + $0x110] sm:$0xff] %v409_v60 }
  0xd8   :  { %v322_v61 = vpop.f32.mrf.mxu0  ;;  %v411_v62 = vpop.f32.mrf.mxu1 }
  0xd9   :  { %987 = vst [vmem:[%s1586_s2 + $0x108] sm:$0xff] %v322_v61  ;;  %989 = vst [vmem:[%s1586_s2 + $0x118] sm:$0xff] %v411_v62 }
  0xda   :  { %v326_v63 = vpop.f32.mrf.mxu0  ;;  %v415_v0 = vpop.f32.mrf.mxu1 }
  0xdb   :  { %1002 = vst [vmem:[%s1586_s2 + $0x180] sm:$0xff] %v326_v63  ;;  %1004 = vst [vmem:[%s1586_s2 + $0x190] sm:$0xff] %v415_v0 }
  0xdc   :  { %v328_v1 = vpop.f32.mrf.mxu0  ;;  %v417_v2 = vpop.f32.mrf.mxu1 }
  0xdd   :  { %1003 = vst [vmem:[%s1586_s2 + $0x188] sm:$0xff] %v328_v1  ;;  %1005 = vst [vmem:[%s1586_s2 + $0x198] sm:$0xff] %v417_v2 }
  0xde   :  { %v486_v3 = vpop.f32.mrf.mxu0  ;;  %v575_v4 = vpop.f32.mrf.mxu1 }
  0xdf   :  { %958 = vst [vmem:[%s1586_s2 + $0x20] sm:$0xff] %v486_v3  ;;  %960 = vst [vmem:[%s1586_s2 + $0x30] sm:$0xff] %v575_v4 }
  0xe0   :  { %v488_v5 = vpop.f32.mrf.mxu0  ;;  %v577_v6 = vpop.f32.mrf.mxu1 }
  0xe1   :  { %959 = vst [vmem:[%s1586_s2 + $0x28] sm:$0xff] %v488_v5  ;;  %961 = vst [vmem:[%s1586_s2 + $0x38] sm:$0xff] %v577_v6 }
  0xe2   :  { %v492_v7 = vpop.f32.mrf.mxu0  ;;  %v581_v8 = vpop.f32.mrf.mxu1 }
  0xe3   :  { %974 = vst [vmem:[%s1586_s2 + $0xa0] sm:$0xff] %v492_v7  ;;  %976 = vst [vmem:[%s1586_s2 + $0xb0] sm:$0xff] %v581_v8 }
  0xe4   :  { %v494_v9 = vpop.f32.mrf.mxu0  ;;  %v583_v10 = vpop.f32.mrf.mxu1 }
  0xe5   :  { %975 = vst [vmem:[%s1586_s2 + $0xa8] sm:$0xff] %v494_v9  ;;  %977 = vst [vmem:[%s1586_s2 + $0xb8] sm:$0xff] %v583_v10 }
  0xe6   :  { %v498_v11 = vpop.f32.mrf.mxu0  ;;  %v587_v12 = vpop.f32.mrf.mxu1 }
  0xe7   :  { %990 = vst [vmem:[%s1586_s2 + $0x120] sm:$0xff] %v498_v11  ;;  %992 = vst [vmem:[%s1586_s2 + $0x130] sm:$0xff] %v587_v12 }
  0xe8   :  { %v500_v13 = vpop.f32.mrf.mxu0  ;;  %v589_v14 = vpop.f32.mrf.mxu1 }
  0xe9   :  { %991 = vst [vmem:[%s1586_s2 + $0x128] sm:$0xff] %v500_v13  ;;  %993 = vst [vmem:[%s1586_s2 + $0x138] sm:$0xff] %v589_v14 }
  0xea   :  { %v504_v15 = vpop.f32.mrf.mxu0  ;;  %v593_v16 = vpop.f32.mrf.mxu1 }
  0xeb   :  { %1006 = vst [vmem:[%s1586_s2 + $0x1a0] sm:$0xff] %v504_v15  ;;  %1008 = vst [vmem:[%s1586_s2 + $0x1b0] sm:$0xff] %v593_v16 }
  0xec   :  { %v506_v17 = vpop.f32.mrf.mxu0  ;;  %v595_v18 = vpop.f32.mrf.mxu1 }
  0xed   :  { %1007 = vst [vmem:[%s1586_s2 + $0x1a8] sm:$0xff] %v506_v17  ;;  %1009 = vst [vmem:[%s1586_s2 + $0x1b8] sm:$0xff] %v595_v18 }
  0xee   :  { %v664_v19 = vpop.f32.mrf.mxu0  ;;  %v753_v20 = vpop.f32.mrf.mxu1 }
  0xef   :  { %962 = vst [vmem:[%s1586_s2 + $0x40] sm:$0xff] %v664_v19  ;;  %964 = vst [vmem:[%s1586_s2 + $0x50] sm:$0xff] %v753_v20 }
  0xf0   :  { %v666_v21 = vpop.f32.mrf.mxu0  ;;  %v755_v22 = vpop.f32.mrf.mxu1 }
  0xf1   :  { %963 = vst [vmem:[%s1586_s2 + $0x48] sm:$0xff] %v666_v21  ;;  %965 = vst [vmem:[%s1586_s2 + $0x58] sm:$0xff] %v755_v22 }
  0xf2   :  { %v670_v23 = vpop.f32.mrf.mxu0  ;;  %v759_v24 = vpop.f32.mrf.mxu1 }
  0xf3   :  { %978 = vst [vmem:[%s1586_s2 + $0xc0] sm:$0xff] %v670_v23  ;;  %980 = vst [vmem:[%s1586_s2 + $0xd0] sm:$0xff] %v759_v24 }
  0xf4   :  { %v672_v25 = vpop.f32.mrf.mxu0  ;;  %v761_v26 = vpop.f32.mrf.mxu1 }
  0xf5   :  { %979 = vst [vmem:[%s1586_s2 + $0xc8] sm:$0xff] %v672_v25  ;;  %981 = vst [vmem:[%s1586_s2 + $0xd8] sm:$0xff] %v761_v26 }
  0xf6   :  { %v676_v27 = vpop.f32.mrf.mxu0  ;;  %v765_v28 = vpop.f32.mrf.mxu1 }
  0xf7   :  { %994 = vst [vmem:[%s1586_s2 + $0x140] sm:$0xff] %v676_v27  ;;  %996 = vst [vmem:[%s1586_s2 + $0x150] sm:$0xff] %v765_v28 }
  0xf8   :  { %v678_v29 = vpop.f32.mrf.mxu0  ;;  %v767_v30 = vpop.f32.mrf.mxu1 }
  0xf9   :  { %995 = vst [vmem:[%s1586_s2 + $0x148] sm:$0xff] %v678_v29  ;;  %997 = vst [vmem:[%s1586_s2 + $0x158] sm:$0xff] %v767_v30 }
  0xfa   :  { %v682_v31 = vpop.f32.mrf.mxu0  ;;  %v771_v32 = vpop.f32.mrf.mxu1 }
  0xfb   :  { %1010 = vst [vmem:[%s1586_s2 + $0x1c0] sm:$0xff] %v682_v31  ;;  %1012 = vst [vmem:[%s1586_s2 + $0x1d0] sm:$0xff] %v771_v32 }
  0xfc   :  { %v684_v33 = vpop.f32.mrf.mxu0  ;;  %v773_v34 = vpop.f32.mrf.mxu1 }
  0xfd   :  { %1011 = vst [vmem:[%s1586_s2 + $0x1c8] sm:$0xff] %v684_v33  ;;  %1013 = vst [vmem:[%s1586_s2 + $0x1d8] sm:$0xff] %v773_v34 }
  0xfe   :  { %v842_v35 = vpop.f32.mrf.mxu0  ;;  %v931_v36 = vpop.f32.mrf.mxu1 }
  0xff   :  { %966 = vst [vmem:[%s1586_s2 + $0x60] sm:$0xff] %v842_v35  ;;  %968 = vst [vmem:[%s1586_s2 + $0x70] sm:$0xff] %v931_v36 }
 0x100   :  { %v844_v37 = vpop.f32.mrf.mxu0  ;;  %v933_v38 = vpop.f32.mrf.mxu1 }
 0x101   :  { %967 = vst [vmem:[%s1586_s2 + $0x68] sm:$0xff] %v844_v37  ;;  %969 = vst [vmem:[%s1586_s2 + $0x78] sm:$0xff] %v933_v38 }
 0x102   :  { %v848_v39 = vpop.f32.mrf.mxu0  ;;  %v937_v40 = vpop.f32.mrf.mxu1 }
 0x103   :  { %982 = vst [vmem:[%s1586_s2 + $0xe0] sm:$0xff] %v848_v39  ;;  %984 = vst [vmem:[%s1586_s2 + $0xf0] sm:$0xff] %v937_v40 }
 0x104   :  { %v850_v41 = vpop.f32.mrf.mxu0  ;;  %v939_v42 = vpop.f32.mrf.mxu1 }
 0x105   :  { %983 = vst [vmem:[%s1586_s2 + $0xe8] sm:$0xff] %v850_v41  ;;  %985 = vst [vmem:[%s1586_s2 + $0xf8] sm:$0xff] %v939_v42 }
 0x106   :  { %v854_v43 = vpop.f32.mrf.mxu0  ;;  %v943_v44 = vpop.f32.mrf.mxu1 }
 0x107   :  { %998 = vst [vmem:[%s1586_s2 + $0x160] sm:$0xff] %v854_v43  ;;  %1000 = vst [vmem:[%s1586_s2 + $0x170] sm:$0xff] %v943_v44 }
 0x108   :  { %v856_v45 = vpop.f32.mrf.mxu0  ;;  %v945_v46 = vpop.f32.mrf.mxu1 }
 0x109   :  { %999 = vst [vmem:[%s1586_s2 + $0x168] sm:$0xff] %v856_v45  ;;  %1001 = vst [vmem:[%s1586_s2 + $0x178] sm:$0xff] %v945_v46 }
 0x10a   :  { %v860_v47 = vpop.f32.mrf.mxu0  ;;  %v949_v48 = vpop.f32.mrf.mxu1 }
 0x10b   :  { %1014 = vst [vmem:[%s1586_s2 + $0x1e0] sm:$0xff] %v860_v47  ;;  %1016 = vst [vmem:[%s1586_s2 + $0x1f0] sm:$0xff] %v949_v48 }
 0x10c   :  { %v862_v49 = vpop.f32.mrf.mxu0  ;;  %v951_v50 = vpop.f32.mrf.mxu1 }
 0x10d   :  { %1015 = vst [vmem:[%s1586_s2 + $0x1e8] sm:$0xff] %v862_v49  ;;  %1017 = vst [vmem:[%s1586_s2 + $0x1f8] sm:$0xff] %v951_v50 }

// kernel: molecule_encoder.3
= control target key start
LH: loop header
LB: loop body
LE: loop exit
PB: predicated region body
PF: predicated region fallthrough
CT: control target
= control target key end

     0   :  { %v29_v0 = vlaneseq  ;;  %v2992_v1 = vmov 0   ;;  %v4916_v23 = vmov 0.0   ;;  %vm391_vm0 = vcmask 130048   ;;  %s4909_s1 = inlined_call_operand.vmem [shape: f32[16,1], index: 1, kind: input, shape index: {}]   ;;  %s4910_s0 = inlined_call_operand.vmem [shape: f32[1,2048], index: 0, kind: input, shape index: {}]   ;;  %s4911_s3 = inlined_call_operand.vmem [shape: f32[128,1], index: 3, kind: input, shape index: {}]   ;;  %s4912_s5 = inlined_call_operand.vmem [shape: f32[32,1], index: 5, kind: input, shape index: {}]   ;;  %s4913_s2 = inlined_call_operand.vmem [shape: f32[128,16], index: 2, kind: input, shape index: {}]   ;;  %s4914_s4 = inlined_call_operand.vmem [shape: f32[32,128], index: 4, kind: input, shape index: {}]   ;;  %s4915_s6 = inlined_call_operand.vmem [shape: f32[32,2048], index: 6, kind: output, shape index: {}]  }
   0x1   :  { %2922 = vset.pattern.permute.xlu0 %v2992_v1  ;;  %v26_v2 = vld [vmem:[%s4909_s1 + $0x8] sm:$0xff]  ;;  %2923 = vset.pattern.permute.xlu1 %v2992_v1  ;;  %v25_v4 = vld [vmem:[%s4909_s1] sm:$0xff]  ;;  %v306_v11 = vld [vmem:[%s4911_s3 + $0x58] sm:$0xff] }
   0x2   :  { %116 = vperm.xlu0 %2922, %v26_v2   ;;  %v3032_v3 = vshrl.u32 %v29_v0, 7  ;;  %v3042_v7 = vld [vmem:[%s4910_s0 + $0x8] sm:$0xff]  ;;  %v302_v13 = vld [vmem:[%s4911_s3 + $0x38] sm:$0xff]  ;;  %v1988_v21 = vld [vmem:[%s4912_s5] sm:$0xff]  ;;  %504 = vmatprep.mubr.f32.mxu0 %v4916_v23 }
   0x3   :  { %v308_v8 = vld [vmem:[%s4911_s3 + $0x68] sm:$0xff]  ;;  %v298_v18 = vld [vmem:[%s4911_s3 + $0x18] sm:$0xff]  ;;  %v1990_v22 = vld [vmem:[%s4912_s5 + $0x10] sm:$0xff]  ;;  %665 = vmatprep.mubr.f32.mxu1 %v4916_v23 }
   0x4   :  { %v47_v5 = vsub.s32 4, %v3032_v3  ;;  %v55_v6 = vsub.s32 6, %v3032_v3  ;;  %v304_v12 = vld [vmem:[%s4911_s3 + $0x48] sm:$0xff]  ;;  %v51_v14 = vsub.s32 5, %v3032_v3  ;;  %v59_v16 = vsub.s32 7, %v3032_v3  ;;  %v310_v24 = vld [vmem:[%s4911_s3 + $0x78] sm:$0xff] }
   0x5   :  { %v300_v15 = vld [vmem:[%s4911_s3 + $0x28] sm:$0xff]  ;;  %388 = vperm.xlu1 %2923, %v310_v24   ;;  %v309_v25 = vld [vmem:[%s4911_s3 + $0x70] sm:$0xff]  ;;  %v307_v26 = vld [vmem:[%s4911_s3 + $0x60] sm:$0xff]  ;;  %v35_v32 = vsub.s32 1, %v3032_v3  ;;  %v43_v40 = vsub.s32 3, %v3032_v3  ;;  %v31_v46 = vsub.s32 0, %v3032_v3 }
   0x6   :  { %111 = vperm.xlu0 %2922, %v25_v4   ;;  %v80_v9 = vrot.slane %v3042_v7, %v47_v5  ;;  %v88_v10 = vrot.slane %v3042_v7, %v55_v6  ;;  %v3070_v17 = vrot.slane %v3042_v7, %v51_v14  ;;  %v3078_v19 = vrot.slane %v3042_v7, %v59_v16  ;;  %v296_v20 = vld [vmem:[%s4911_s3 + $0x8] sm:$0xff]  ;;  %v305_v27 = vld [vmem:[%s4911_s3 + $0x50] sm:$0xff]  ;;  %v303_v28 = vld [vmem:[%s4911_s3 + $0x40] sm:$0xff] }
   0x7   :  { %v301_v29 = vld [vmem:[%s4911_s3 + $0x30] sm:$0xff]  ;;  %v299_v30 = vld [vmem:[%s4911_s3 + $0x20] sm:$0xff]  ;;  %v39_v51 = vsub.s32 2, %v3032_v3  ;;  %v64_v54 = vrot.slane %v3042_v7, %v31_v46  ;;  %v3150_v55 = vrot.slane %v3042_v7, %v35_v32  ;;  %v3158_v62 = vrot.slane %v3042_v7, %v43_v40 }
   0x8   :  { %v297_v31 = vld [vmem:[%s4911_s3 + $0x10] sm:$0xff]  ;;  %v295_v33 = vld [vmem:[%s4911_s3] sm:$0xff] }
   0x9   :  { %383 = vperm.xlu1 %2923, %v309_v25   ;;  %v23_v34 = vld [vmem:[%s4910_s0] sm:$0xff]  ;;  %v72_v1 = vrot.slane %v3042_v7, %v39_v51 }
   0xa   :  { %378 = vperm.xlu0 %2922, %v308_v8   ;;  %v36_v35 = vrot.slane %v23_v34, %v35_v32  ;;  %v44_v45 = vrot.slane %v23_v34, %v43_v40  ;;  %v48_v49 = vrot.slane %v23_v34, %v47_v5  ;;  %v56_v52 = vrot.slane %v23_v34, %v55_v6 }
   0xb   :  { %v32_v53 = vrot.slane %v23_v34, %v31_v46  ;;  %v40_v0 = vrot.slane %v23_v34, %v39_v51  ;;  %v52_v6 = vrot.slane %v23_v34, %v51_v14  ;;  %v60_v25 = vrot.slane %v23_v34, %v59_v16 }
   0xd   :  { %373 = vperm.xlu1 %2923, %v307_v26  }
   0xe   :  { %368 = vperm.xlu0 %2922, %v306_v11  }
  0x11   :  { %363 = vperm.xlu1 %2923, %v305_v27  }
  0x12   :  { %358 = vperm.xlu0 %2922, %v304_v12  }
  0x15   :  { %353 = vperm.xlu1 %2923, %v303_v28  }
  0x16   :  { %348 = vperm.xlu0 %2922, %v302_v13  }
  0x19   :  { %343 = vperm.xlu1 %2923, %v301_v29  }
  0x1a   :  { %338 = vperm.xlu0 %2922, %v300_v15  }
  0x1d   :  { %333 = vperm.xlu1 %2923, %v299_v30  }
  0x1e   :  { %328 = vperm.xlu0 %2922, %v298_v18  }
  0x21   :  { %323 = vperm.xlu1 %2923, %v297_v31  }
  0x22   :  { %318 = vperm.xlu0 %2922, %v296_v20  }
  0x25   :  { %313 = vperm.xlu1 %2923, %v295_v33  }
  0x26   :  { %1994 = vperm.xlu0 %2922, %v1988_v21  }
  0x2a   :  { %2004 = vperm.xlu0 %2922, %v1990_v22  }
  0x7d   :  { %v3122_v36 = vpop.permute.xlu0 %116 }
  0x7e   :  { %v3125_v37 = vsub.f32 %v80_v9, %v3122_v36  ;;  %v3128_v38 = vsub.f32 %v88_v10, %v3122_v36  ;;  %v136_v39 = vsub.f32 %v36_v35, %v3122_v36  ;;  %v138_v48 = vsub.f32 %v44_v45, %v3122_v36 }
  0x7f   :  { %v139_v58 = vsub.f32 %v48_v49, %v3122_v36  ;;  %v141_v2 = vsub.f32 %v56_v52, %v3122_v36  ;;  %v135_v4 = vsub.f32 %v32_v53, %v3122_v36  ;;  %v3165_v5 = vsub.f32 %v64_v54, %v3122_v36 }
  0x80   :  { %v168_v44 = vmul.f32 %v136_v39, %v136_v39  ;;  %v170_v57 = vmul.f32 %v138_v48, %v138_v48  ;;  %v144_v8 = vsub.f32 %v3150_v55, %v3122_v36  ;;  %v146_v24 = vsub.f32 %v3158_v62, %v3122_v36 }
  0x81   :  { %v3132_v41 = vpop.permute.xlu0 %111  ;;  %v171_v12 = vmul.f32 %v139_v58, %v139_v58  ;;  %v167_v13 = vmul.f32 %v135_v4, %v135_v4  ;;  %v173_v22 = vmul.f32 %v141_v2, %v141_v2  ;;  %v137_v28 = vsub.f32 %v40_v0, %v3122_v36 }
  0x82   :  { %v3135_v42 = vsub.f32 %v80_v9, %v3132_v41  ;;  %v3138_v43 = vsub.f32 %v88_v10, %v3132_v41  ;;  %v200_v47 = vsub.f32 0.0, %v168_v44  ;;  %v120_v50 = vsub.f32 %v36_v35, %v3132_v41 }
  0x83   :  { %v119_v60 = vsub.f32 %v32_v53, %v3132_v41  ;;  %v3155_v61 = vsub.f32 %v64_v54, %v3132_v41  ;;  %v122_v63 = vsub.f32 %v44_v45, %v3132_v41  ;;  %v202_v9 = vsub.f32 0.0, %v170_v57 }
  0x84   :  { %v249_v56 = vmul.f32 1.442695, %v200_v47  ;;  %v152_v59 = vmul.f32 %v120_v50, %v120_v50  ;;  %v123_v11 = vsub.f32 %v48_v49, %v3132_v41  ;;  %v121_v20 = vsub.f32 %v40_v0, %v3132_v41 }
  0x85   :  { %v151_v10 = vmul.f32 %v119_v60, %v119_v60  ;;  %v154_v15 = vmul.f32 %v122_v63, %v122_v63  ;;  %v3174_v21 = vsub.f32 %v72_v1, %v3132_v41  ;;  %v125_v14 = vsub.f32 %v56_v52, %v3132_v41 }
  0x86   :  { %2924 = vpow2.f32 %v249_v56  ;;  %v184_v7 = vsub.f32 0.0, %v152_v59  ;;  %v253_v26 = vmul.f32 1.442695, %v202_v9  ;;  %v199_v27 = vsub.f32 0.0, %v167_v13 }
  0x87   :  { %v183_v18 = vsub.f32 0.0, %v151_v10  ;;  %v3183_v29 = vsub.f32 %v72_v1, %v3122_v36  ;;  %v155_v30 = vmul.f32 %v123_v11, %v123_v11  ;;  %v176_v31 = vmul.f32 %v144_v8, %v144_v8 }
  0x88   :  { %v203_v32 = vsub.f32 0.0, %v171_v12  ;;  %v217_v33 = vmul.f32 1.442695, %v184_v7  ;;  %v186_v35 = vsub.f32 0.0, %v154_v15  ;;  %v153_v40 = vmul.f32 %v121_v20, %v121_v20 }
  0x89   :  { %v215_v39 = vmul.f32 1.442695, %v183_v18  ;;  %v169_v44 = vmul.f32 %v137_v28, %v137_v28  ;;  %v157_v45 = vmul.f32 %v125_v14, %v125_v14  ;;  %v205_v46 = vsub.f32 0.0, %v173_v22 }
  0x8a   :  { %v140_v3 = vsub.f32 %v52_v6, %v3122_v36  ;;  %v142_v16 = vsub.f32 %v60_v25, %v3122_v36  ;;  %2926 = vpow2.f32 %v253_v26  ;;  %v247_v34 = vmul.f32 1.442695, %v199_v27 }
  0x8b   :  { %v185_v47 = vsub.f32 0.0, %v153_v40  ;;  %v201_v48 = vsub.f32 0.0, %v169_v44  ;;  %2928 = vpow2.f32 %v217_v33  ;;  %v255_v49 = vmul.f32 1.442695, %v203_v32 }
  0x8c   :  { %v172_v50 = vmul.f32 %v140_v3, %v140_v3  ;;  %v174_v51 = vmul.f32 %v142_v16, %v142_v16  ;;  %v187_v52 = vsub.f32 0.0, %v155_v30  ;;  %v178_v53 = vmul.f32 %v146_v24, %v146_v24  ;;  %v3218_v3 = vld [vmem:[%s4913_s2 + $0x8] sm:$0xff] }
  0x8d   :  { %v221_v54 = vmul.f32 1.442695, %v186_v35  ;;  %2930 = vpow2.f32 %v215_v39  ;;  %v219_v56 = vmul.f32 1.442695, %v185_v47  ;;  %v251_v57 = vmul.f32 1.442695, %v201_v48 }
  0x8e   :  { %v204_v58 = vsub.f32 0.0, %v172_v50  ;;  %v206_v59 = vsub.f32 0.0, %v174_v51  ;;  %2932 = vpow2.f32 %v247_v34  ;;  %v124_v60 = vsub.f32 %v52_v6, %v3132_v41  ;;  %v3240_v50 = vld [vmem:[%s4913_s2 + $0x18] sm:$0xff]  ;;  %v3251_v51 = vld [vmem:[%s4913_s2 + $0x20] sm:$0xff] }
  0x8f   :  { %v126_v63 = vsub.f32 %v60_v25, %v3132_v41  ;;  %v3191_v0 = vsub.f32 %v3070_v17, %v3122_v36  ;;  %v189_v2 = vsub.f32 0.0, %v157_v45  ;;  %2934 = vpow2.f32 %v255_v49  ;;  %v3228_v49 = vld [vmem:[%s4913_s2 + $0x10] sm:$0xff] }
  0x90   :  { %v259_v4 = vmul.f32 1.442695, %v205_v46  ;;  %v3195_v8 = vsub.f32 %v3078_v19, %v3122_v36  ;;  %2936 = vpow2.f32 %v221_v54  ;;  %v257_v9 = vmul.f32 1.442695, %v204_v58  ;;  %v3284_v54 = vld [vmem:[%s4913_s2 + $0x38] sm:$0xff]  ;;  %v3308_v58 = vld [vmem:[%s4913_s2 + $0x48] sm:$0xff] }
  0x91   :  { %v156_v10 = vmul.f32 %v124_v60, %v124_v60  ;;  %v158_v11 = vmul.f32 %v126_v63, %v126_v63  ;;  %2938 = vpow2.f32 %v219_v56  ;;  %v261_v6 = vmul.f32 1.442695, %v206_v59  ;;  %v3295_v56 = vld [vmem:[%s4913_s2 + $0x40] sm:$0xff] }
  0x92   :  { %v3199_v12 = vsub.f32 %v3070_v17, %v3132_v41  ;;  %v3203_v7 = vsub.f32 %v3078_v19, %v3132_v41  ;;  %v208_v13 = vsub.f32 0.0, %v176_v31  ;;  %2940 = vpow2.f32 %v251_v57  ;;  %v3208_v31 = vld [vmem:[%s4913_s2] sm:$0xff] }
  0x93   :  { %v2925_v1 = vpop.eup %2924  ;;  %v188_v15 = vsub.f32 0.0, %v156_v10  ;;  %v190_v36 = vsub.f32 0.0, %v158_v11  ;;  %2942 = vpow2.f32 %v259_v4  ;;  %v210_v18 = vsub.f32 0.0, %v178_v53  ;;  %v3273_v53 = vld [vmem:[%s4913_s2 + $0x30] sm:$0xff]  ;;  %v3338_v4 = vld [vmem:[%s4913_s2 + $0x58] sm:$0xff] }
  0x94   :  { %468 = vmatprep.subr.mxu0 %v2925_v1  ;;  %v223_v20 = vmul.f32 1.442695, %v187_v52  ;;  %2944 = vpow2.f32 %v257_v9  ;;  %v227_v24 = vmul.f32 1.442695, %v189_v2  ;;  %v265_v25 = vmul.f32 1.442695, %v208_v13 }
  0x95   :  { %v225_v14 = vmul.f32 1.442695, %v188_v15  ;;  %v229_v22 = vmul.f32 1.442695, %v190_v36  ;;  %2946 = vpow2.f32 %v261_v6  ;;  %v269_v26 = vmul.f32 1.442695, %v210_v18 }
  0x96   :  { %v3262_v52 = vld [vmem:[%s4913_s2 + $0x28] sm:$0xff]  ;;  %v128_v57 = vsub.f32 %v3150_v55, %v3132_v41  ;;  %v130_v59 = vsub.f32 %v3158_v62, %v3132_v41  ;;  %v3321_v55 = vld [vmem:[%s4913_s2 + $0x50] sm:$0xff]  ;;  %v175_v41 = vmul.f32 %v3165_v5, %v3165_v5  ;;  %v177_v62 = vmul.f32 %v3183_v29, %v3183_v29 }
  0x97   :  { %2948 = vpow2.f32 %v225_v14  ;;  %v2927_v17 = vpop.eup %2926  ;;  %v159_v2 = vmul.f32 %v3155_v61, %v3155_v61  ;;  %v161_v29 = vmul.f32 %v3174_v21, %v3174_v21  ;;  %v180_v61 = vmul.f32 %v3191_v0, %v3191_v0  ;;  %v3355_v21 = vld [vmem:[%s4913_s2 + $0x60] sm:$0xff] }
  0x98   :  { %2950 = vpow2.f32 %v229_v22  ;;  %v2929_v27 = vpop.eup %2928  ;;  %629 = vmatprep.subr.mxu1 %v2927_v17  ;;  %v160_v60 = vmul.f32 %v128_v57, %v128_v57  ;;  %v162_v63 = vmul.f32 %v130_v59, %v130_v59  ;;  %v207_v9 = vsub.f32 0.0, %v175_v41  ;;  %v3366_v22 = vld [vmem:[%s4913_s2 + $0x68] sm:$0xff] }
  0x99   :  { %2952 = vpow2.f32 %v223_v20  ;;  %v209_v10 = vsub.f32 0.0, %v177_v62  ;;  %v182_v11 = vmul.f32 %v3195_v8, %v3195_v8  ;;  %v191_v13 = vsub.f32 0.0, %v159_v2 }
  0x9a   :  { %v2931_v19 = vpop.eup %2930  ;;  %2954 = vpow2.f32 %v227_v24  ;;  %v192_v1 = vsub.f32 0.0, %v160_v60  ;;  %v194_v5 = vsub.f32 0.0, %v162_v63  ;;  %v193_v15 = vsub.f32 0.0, %v161_v29 }
  0x9b   :  { %2956 = vpow2.f32 %v265_v25  ;;  %v2933_v28 = vpop.eup %2932  ;;  %v263_v36 = vmul.f32 1.442695, %v207_v9  ;;  %v212_v18 = vsub.f32 0.0, %v180_v61  ;;  %v267_v20 = vmul.f32 1.442695, %v209_v10 }
  0x9c   :  { %2958 = vpow2.f32 %v269_v26  ;;  %v2935_v30 = vpop.eup %2934  ;;  %469 = vmatpush1.msra.mxu0 %v2933_v28  ;;  %v233_v6 = vmul.f32 1.442695, %v192_v1  ;;  %v237_v0 = vmul.f32 1.442695, %v194_v5  ;;  %v214_v8 = vsub.f32 0.0, %v182_v11  ;;  %v3377_v26 = vld [vmem:[%s4913_s2 + $0x70] sm:$0xff] }
  0x9d   :  { %v2937_v32 = vpop.eup %2936  ;;  %470 = vmatprep.subr.mxu0 %v2929_v27  ;;  %v231_v14 = vmul.f32 1.442695, %v191_v13  ;;  %v235_v24 = vmul.f32 1.442695, %v193_v15  ;;  %v273_v25 = vmul.f32 1.442695, %v212_v18 }
  0x9e   :  { %v2939_v33 = vpop.eup %2938  ;;  %471 = vmatpush1.msra.mxu0 %v2931_v19  ;;  %2960 = vpow2.f32 %v233_v6  ;;  %v277_v17 = vmul.f32 1.442695, %v214_v8  ;;  %v3388_v27 = vld [vmem:[%s4913_s2 + $0x78] sm:$0xff] }
  0x9f   :  { %v2941_v35 = vpop.eup %2940  ;;  %2792 = vmatmul.mubr.msk.f32.vlgmr.msra.gmra.mxu0 %vm391_vm0, %v3208_v31  ;;  %2962 = vpow2.f32 %v237_v0 }
  0xa0   :  { %v2943_v39 = vpop.eup %2942  ;;  %630 = vmatpush1.msra.mxu1 %v2941_v35  ;;  %510 = vmatprep.mubr.f32.mxu0 %v4916_v23  ;;  %2964 = vpow2.f32 %v263_v36 }
  0xa1   :  { %v2945_v40 = vpop.eup %2944  ;;  %631 = vmatprep.subr.mxu1 %v2937_v32  ;;  %2966 = vpow2.f32 %v267_v20 }
  0xa2   :  { %v2947_v44 = vpop.eup %2946  ;;  %632 = vmatpush1.msra.mxu1 %v2939_v33  ;;  %790 = vmatprep.subr.mxu0 %v2945_v40  ;;  %2968 = vpow2.f32 %v231_v14 }
  0xa3   :  { %2808 = vmatmul.mubr.msk.f32.vlgmr.msra.gmra.mxu1 %vm391_vm0, %v3208_v31  ;;  %951 = vmatprep.subr.mxu1 %v2947_v44  ;;  %2970 = vpow2.f32 %v235_v24  ;;  %v1989_v44 = vld [vmem:[%s4912_s5 + $0x8] sm:$0xff] }
  0xa4   :  { %v2949_v45 = vpop.eup %2948  ;;  %791 = vmatpush1.msra.mxu0 %v2935_v30  ;;  %952 = vmatpush1.msra.mxu1 %v2943_v39  ;;  %2972 = vpow2.f32 %v273_v25 }
  0xa5   :  { %v2951_v46 = vpop.eup %2950  ;;  %792 = vmatprep.subr.mxu0 %v2949_v45  ;;  %671 = vmatprep.mubr.f32.mxu1 %v4916_v23  ;;  %2974 = vpow2.f32 %v277_v17  ;;  %v1991_v45 = vld [vmem:[%s4912_s5 + $0x18] sm:$0xff] }
  0xa6   :  { %v2953_v16 = vpop.eup %2952  ;;  %953 = vmatprep.subr.mxu1 %v2951_v46  ;;  %2793 = vmatmul.mubr.msk.f32.gmra.mxu0 %vm391_vm0, %v3218_v3  ;;  %v163_v46 = vmul.f32 %v3135_v42, %v3135_v42 }
  0xa7   :  { %v2955_v34 = vpop.eup %2954  ;;  %793 = vmatpush1.msra.mxu0 %v2953_v16  ;;  %2809 = vmatmul.mubr.msk.f32.gmra.mxu1 %vm391_vm0, %v3218_v3  ;;  %v179_v16 = vmul.f32 %v3125_v37, %v3125_v37  ;;  %v166_v37 = vmul.f32 %v3203_v7, %v3203_v7 }
  0xa8   :  { %v2957_v47 = vpop.eup %2956  ;;  %954 = vmatpush1.msra.mxu1 %v2955_v34  ;;  %516 = vmatprep.mubr.f32.mxu0 %v4916_v23  ;;  %v181_v34 = vmul.f32 %v3128_v38, %v3128_v38  ;;  %v195_v42 = vsub.f32 0.0, %v163_v46 }
  0xa9   :  { %v2959_v48 = vpop.eup %2958  ;;  %1112 = vmatprep.subr.mxu0 %v2957_v47  ;;  %677 = vmatprep.mubr.f32.mxu1 %v4916_v23  ;;  %v164_v47 = vmul.f32 %v3199_v12, %v3199_v12  ;;  %v211_v57 = vsub.f32 0.0, %v179_v16  ;;  %v198_v60 = vsub.f32 0.0, %v166_v37 }
  0xaa   :  { %1273 = vmatprep.subr.mxu1 %v2959_v48  ;;  %2794 = vmatmul.mubr.msk.f32.gmra.mxu0 %vm391_vm0, %v3228_v49  ;;  %v165_v48 = vmul.f32 %v3138_v43, %v3138_v43  ;;  %v213_v38 = vsub.f32 0.0, %v181_v34  ;;  %v239_v59 = vmul.f32 1.442695, %v195_v42 }
  0xab   :  { %2810 = vmatmul.mubr.msk.f32.gmra.mxu1 %vm391_vm0, %v3228_v49  ;;  %522 = vmatprep.mubr.f32.mxu0 %v4916_v23  ;;  %v2961_v19 = vpop.eup %2960  ;;  %v196_v12 = vsub.f32 0.0, %v164_v47  ;;  %v271_v7 = vmul.f32 1.442695, %v211_v57  ;;  %v245_v62 = vmul.f32 1.442695, %v198_v60 }
  0xac   :  { %683 = vmatprep.mubr.f32.mxu1 %v4916_v23  ;;  %v2963_v28 = vpop.eup %2962  ;;  %1999 = vperm.xlu1 %2923, %v1989_v44   ;;  %v197_v63 = vsub.f32 0.0, %v165_v48  ;;  %v275_v43 = vmul.f32 1.442695, %v213_v38  ;;  %2976 = vpow2.f32 %v239_v59 }
  0xad   :  { %v2965_v30 = vpop.eup %2964  ;;  %v241_v41 = vmul.f32 1.442695, %v196_v12  ;;  %2978 = vpow2.f32 %v271_v7  ;;  %v3748_v12 = vpop.permute.xlu1 %388 }
  0xae   :  { %2795 = vmatmul.mubr.msk.f32.gmra.mxu0 %vm391_vm0, %v3240_v50  ;;  %v2967_v32 = vpop.eup %2966  ;;  %v243_v1 = vmul.f32 1.442695, %v197_v63  ;;  %2980 = vpow2.f32 %v275_v43  ;;  %4983 = vst [vmem:[#allocation22_spill] sm:$0xff] %v3748_v12 }
  0xaf   :  { %2811 = vmatmul.mubr.msk.f32.gmra.mxu1 %vm391_vm0, %v3240_v50  ;;  %528 = vmatprep.mubr.f32.mxu0 %v4916_v23  ;;  %v2969_v33 = vpop.eup %2968  ;;  %2982 = vpow2.f32 %v241_v41 }
  0xb0   :  { %689 = vmatprep.mubr.f32.mxu1 %v4916_v23  ;;  %v2971_v35 = vpop.eup %2970  ;;  %2009 = vperm.xlu1 %2923, %v1991_v45   ;;  %2984 = vpow2.f32 %v245_v62 }
  0xb1   :  { %v2973_v39 = vpop.eup %2972  ;;  %2986 = vpow2.f32 %v243_v1  ;;  %v3769_v41 = vpop.permute.xlu1 %383 }
  0xb2   :  { %2796 = vmatmul.mubr.msk.f32.gmra.mxu0 %vm391_vm0, %v3251_v51  ;;  %v2975_v40 = vpop.eup %2974  ;;  %4984 = vst [vmem:[#allocation23_spill] sm:$0xff] %v3769_v41 }
  0xb3   :  { %2812 = vmatmul.mubr.msk.f32.gmra.mxu1 %vm391_vm0, %v3251_v51  ;;  %534 = vmatprep.mubr.f32.mxu0 %v4916_v23 }
  0xb4   :  { %695 = vmatprep.mubr.f32.mxu1 %v4916_v23 }
  0xb6   :  { %2797 = vmatmul.mubr.msk.f32.gmra.mxu0 %vm391_vm0, %v3262_v52 }
  0xb7   :  { %2813 = vmatmul.mubr.msk.f32.gmra.mxu1 %vm391_vm0, %v3262_v52  ;;  %540 = vmatprep.mubr.f32.mxu0 %v4916_v23 }
  0xb8   :  { %701 = vmatprep.mubr.f32.mxu1 %v4916_v23 }
  0xb9   :  { %v2977_v2 = vpop.eup %2976 }
  0xba   :  { %2798 = vmatmul.mubr.msk.f32.gmra.mxu0 %vm391_vm0, %v3273_v53  ;;  %v2979_v5 = vpop.eup %2978 }
  0xbb   :  { %2814 = vmatmul.mubr.msk.f32.gmra.mxu1 %vm391_vm0, %v3273_v53  ;;  %546 = vmatprep.mubr.f32.mxu0 %v4916_v23  ;;  %v2981_v29 = vpop.eup %2980 }
  0xbc   :  { %707 = vmatprep.mubr.f32.mxu1 %v4916_v23  ;;  %v2983_v9 = vpop.eup %2982 }
  0xbd   :  { %v2985_v61 = vpop.eup %2984 }
  0xbe   :  { %2799 = vmatmul.mubr.msk.f32.gmra.mxu0 %vm391_vm0, %v3284_v54  ;;  %v2987_v10 = vpop.eup %2986 }
  0xbf   :  { %2815 = vmatmul.mubr.msk.f32.gmra.mxu1 %vm391_vm0, %v3284_v54  ;;  %552 = vmatprep.mubr.f32.mxu0 %v4916_v23 }
  0xc0   :  { %713 = vmatprep.mubr.f32.mxu1 %v4916_v23 }
  0xc2   :  { %2800 = vmatmul.mubr.msk.f32.gmra.mxu0 %vm391_vm0, %v3295_v56 }
  0xc3   :  { %2816 = vmatmul.mubr.msk.f32.gmra.mxu1 %vm391_vm0, %v3295_v56  ;;  %558 = vmatprep.mubr.f32.mxu0 %v4916_v23 }
  0xc4   :  { %719 = vmatprep.mubr.f32.mxu1 %v4916_v23 }
  0xc6   :  { %2801 = vmatmul.mubr.msk.f32.gmra.mxu0 %vm391_vm0, %v3308_v58 }
  0xc7   :  { %2817 = vmatmul.mubr.msk.f32.gmra.mxu1 %vm391_vm0, %v3308_v58  ;;  %564 = vmatprep.mubr.f32.mxu0 %v4916_v23 }
  0xc8   :  { %725 = vmatprep.mubr.f32.mxu1 %v4916_v23 }
  0xca   :  { %2802 = vmatmul.mubr.msk.f32.gmra.mxu0 %vm391_vm0, %v3321_v55 }
  0xcb   :  { %2818 = vmatmul.mubr.msk.f32.gmra.mxu1 %vm391_vm0, %v3321_v55  ;;  %570 = vmatprep.mubr.f32.mxu0 %v4916_v23 }
  0xcc   :  { %731 = vmatprep.mubr.f32.mxu1 %v4916_v23 }
  0xce   :  { %2803 = vmatmul.mubr.msk.f32.gmra.mxu0 %vm391_vm0, %v3338_v4 }
  0xcf   :  { %2819 = vmatmul.mubr.msk.f32.gmra.mxu1 %vm391_vm0, %v3338_v4  ;;  %576 = vmatprep.mubr.f32.mxu0 %v4916_v23 }
  0xd0   :  { %737 = vmatprep.mubr.f32.mxu1 %v4916_v23 }
  0xd2   :  { %2804 = vmatmul.mubr.msk.f32.gmra.mxu0 %vm391_vm0, %v3355_v21 }
  0xd3   :  { %2820 = vmatmul.mubr.msk.f32.gmra.mxu1 %vm391_vm0, %v3355_v21  ;;  %582 = vmatprep.mubr.f32.mxu0 %v4916_v23 }
  0xd4   :  { %743 = vmatprep.mubr.f32.mxu1 %v4916_v23 }
  0xd6   :  { %2805 = vmatmul.mubr.msk.f32.gmra.mxu0 %vm391_vm0, %v3366_v22 }
  0xd7   :  { %2821 = vmatmul.mubr.msk.f32.gmra.mxu1 %vm391_vm0, %v3366_v22  ;;  %588 = vmatprep.mubr.f32.mxu0 %v4916_v23 }
  0xd8   :  { %749 = vmatprep.mubr.f32.mxu1 %v4916_v23 }
  0xda   :  { %2806 = vmatmul.mubr.msk.f32.gmra.mxu0 %vm391_vm0, %v3377_v26 }
  0xdb   :  { %2822 = vmatmul.mubr.msk.f32.gmra.mxu1 %vm391_vm0, %v3377_v26  ;;  %594 = vmatprep.mubr.f32.mxu0 %v4916_v23 }
  0xdc   :  { %755 = vmatprep.mubr.f32.mxu1 %v4916_v23 }
  0xde   :  { %2807 = vmatmul.mubr.msk.f32.gmra.mxu0 %vm391_vm0, %v3388_v27 }
  0xdf   :  { %2823 = vmatmul.mubr.msk.f32.gmra.mxu1 %vm391_vm0, %v3388_v27  ;;  %826 = vmatprep.mubr.f32.mxu0 %v4916_v23 }
  0xe0   :  { %987 = vmatprep.mubr.f32.mxu1 %v4916_v23 }
  0xe2   :  { %2824 = vmatmul.mubr.msk.f32.vlgmr.msra.gmra.mxu0 %vm391_vm0, %v3208_v31 }
  0xe3   :  { %2840 = vmatmul.mubr.msk.f32.vlgmr.msra.gmra.mxu1 %vm391_vm0, %v3208_v31  ;;  %1113 = vmatpush1.msra.mxu0 %v2965_v30 }
  0xe4   :  { %1274 = vmatpush1.msra.mxu1 %v2967_v32  ;;  %1114 = vmatprep.subr.mxu0 %v2961_v19 }
  0xe5   :  { %1275 = vmatprep.subr.mxu1 %v2963_v28  ;;  %1115 = vmatpush1.msra.mxu0 %v2969_v33 }
  0xe6   :  { %1276 = vmatpush1.msra.mxu1 %v2971_v35  ;;  %832 = vmatprep.mubr.f32.mxu0 %v4916_v23 }
  0xe7   :  { %993 = vmatprep.mubr.f32.mxu1 %v4916_v23  ;;  %1434 = vmatprep.subr.mxu0 %v2973_v39 }
  0xe8   :  { %1595 = vmatprep.subr.mxu1 %v2975_v40  ;;  %2825 = vmatmul.mubr.msk.f32.gmra.mxu0 %vm391_vm0, %v3218_v3 }
  0xe9   :  { %2841 = vmatmul.mubr.msk.f32.gmra.mxu1 %vm391_vm0, %v3218_v3  ;;  %838 = vmatprep.mubr.f32.mxu0 %v4916_v23 }
  0xea   :  { %999 = vmatprep.mubr.f32.mxu1 %v4916_v23 }
  0xec   :  { %2826 = vmatmul.mubr.msk.f32.gmra.mxu0 %vm391_vm0, %v3228_v49 }
  0xed   :  { %2842 = vmatmul.mubr.msk.f32.gmra.mxu1 %vm391_vm0, %v3228_v49  ;;  %844 = vmatprep.mubr.f32.mxu0 %v4916_v23 }
  0xee   :  { %1005 = vmatprep.mubr.f32.mxu1 %v4916_v23 }
  0xf0   :  { %2827 = vmatmul.mubr.msk.f32.gmra.mxu0 %vm391_vm0, %v3240_v50 }
  0xf1   :  { %2843 = vmatmul.mubr.msk.f32.gmra.mxu1 %vm391_vm0, %v3240_v50  ;;  %850 = vmatprep.mubr.f32.mxu0 %v4916_v23 }
  0xf2   :  { %1011 = vmatprep.mubr.f32.mxu1 %v4916_v23 }
  0xf4   :  { %2828 = vmatmul.mubr.msk.f32.gmra.mxu0 %vm391_vm0, %v3251_v51 }
  0xf5   :  { %2844 = vmatmul.mubr.msk.f32.gmra.mxu1 %vm391_vm0, %v3251_v51  ;;  %856 = vmatprep.mubr.f32.mxu0 %v4916_v23 }
  0xf6   :  { %1017 = vmatprep.mubr.f32.mxu1 %v4916_v23 }
  0xf8   :  { %2829 = vmatmul.mubr.msk.f32.gmra.mxu0 %vm391_vm0, %v3262_v52 }
  0xf9   :  { %2845 = vmatmul.mubr.msk.f32.gmra.mxu1 %vm391_vm0, %v3262_v52  ;;  %862 = vmatprep.mubr.f32.mxu0 %v4916_v23 }
  0xfa   :  { %1023 = vmatprep.mubr.f32.mxu1 %v4916_v23 }
  0xfc   :  { %2830 = vmatmul.mubr.msk.f32.gmra.mxu0 %vm391_vm0, %v3273_v53 }
  0xfd   :  { %2846 = vmatmul.mubr.msk.f32.gmra.mxu1 %vm391_vm0, %v3273_v53  ;;  %868 = vmatprep.mubr.f32.mxu0 %v4916_v23 }
  0xfe   :  { %1029 = vmatprep.mubr.f32.mxu1 %v4916_v23 }
 0x100   :  { %2831 = vmatmul.mubr.msk.f32.gmra.mxu0 %vm391_vm0, %v3284_v54 }
 0x101   :  { %2847 = vmatmul.mubr.msk.f32.gmra.mxu1 %vm391_vm0, %v3284_v54  ;;  %874 = vmatprep.mubr.f32.mxu0 %v4916_v23 }
 0x102   :  { %1035 = vmatprep.mubr.f32.mxu1 %v4916_v23 }
 0x104   :  { %2832 = vmatmul.mubr.msk.f32.gmra.mxu0 %vm391_vm0, %v3295_v56 }
 0x105   :  { %2848 = vmatmul.mubr.msk.f32.gmra.mxu1 %vm391_vm0, %v3295_v56  ;;  %880 = vmatprep.mubr.f32.mxu0 %v4916_v23 }
 0x106   :  { %1041 = vmatprep.mubr.f32.mxu1 %v4916_v23 }
 0x108   :  { %2833 = vmatmul.mubr.msk.f32.gmra.mxu0 %vm391_vm0, %v3308_v58 }
 0x109   :  { %2849 = vmatmul.mubr.msk.f32.gmra.mxu1 %vm391_vm0, %v3308_v58  ;;  %886 = vmatprep.mubr.f32.mxu0 %v4916_v23 }
 0x10a   :  { %1047 = vmatprep.mubr.f32.mxu1 %v4916_v23 }
 0x10c   :  { %2834 = vmatmul.mubr.msk.f32.gmra.mxu0 %vm391_vm0, %v3321_v55 }
 0x10d   :  { %2850 = vmatmul.mubr.msk.f32.gmra.mxu1 %vm391_vm0, %v3321_v55  ;;  %892 = vmatprep.mubr.f32.mxu0 %v4916_v23 }
 0x10e   :  { %1053 = vmatprep.mubr.f32.mxu1 %v4916_v23 }
 0x110   :  { %2835 = vmatmul.mubr.msk.f32.gmra.mxu0 %vm391_vm0, %v3338_v4 }
 0x111   :  { %2851 = vmatmul.mubr.msk.f32.gmra.mxu1 %vm391_vm0, %v3338_v4  ;;  %898 = vmatprep.mubr.f32.mxu0 %v4916_v23 }
 0x112   :  { %1059 = vmatprep.mubr.f32.mxu1 %v4916_v23 }
 0x114   :  { %2836 = vmatmul.mubr.msk.f32.gmra.mxu0 %vm391_vm0, %v3355_v21 }
 0x115   :  { %2852 = vmatmul.mubr.msk.f32.gmra.mxu1 %vm391_vm0, %v3355_v21  ;;  %904 = vmatprep.mubr.f32.mxu0 %v4916_v23 }
 0x116   :  { %1065 = vmatprep.mubr.f32.mxu1 %v4916_v23 }
 0x118   :  { %2837 = vmatmul.mubr.msk.f32.gmra.mxu0 %vm391_vm0, %v3366_v22 }
 0x119   :  { %2853 = vmatmul.mubr.msk.f32.gmra.mxu1 %vm391_vm0, %v3366_v22  ;;  %910 = vmatprep.mubr.f32.mxu0 %v4916_v23 }
 0x11a   :  { %1071 = vmatprep.mubr.f32.mxu1 %v4916_v23 }
 0x11c   :  { %2838 = vmatmul.mubr.msk.f32.gmra.mxu0 %vm391_vm0, %v3377_v26 }
 0x11d   :  { %2854 = vmatmul.mubr.msk.f32.gmra.mxu1 %vm391_vm0, %v3377_v26  ;;  %916 = vmatprep.mubr.f32.mxu0 %v4916_v23 }
 0x11e   :  { %1077 = vmatprep.mubr.f32.mxu1 %v4916_v23 }
 0x120   :  { %2839 = vmatmul.mubr.msk.f32.gmra.mxu0 %vm391_vm0, %v3388_v27 }
 0x121   :  { %2855 = vmatmul.mubr.msk.f32.gmra.mxu1 %vm391_vm0, %v3388_v27  ;;  %1148 = vmatprep.mubr.f32.mxu0 %v4916_v23 }
 0x122   :  { %1309 = vmatprep.mubr.f32.mxu1 %v4916_v23 }
 0x124   :  { %2856 = vmatmul.mubr.msk.f32.vlgmr.msra.gmra.mxu0 %vm391_vm0, %v3208_v31 }
 0x125   :  { %2872 = vmatmul.mubr.msk.f32.vlgmr.msra.gmra.mxu1 %vm391_vm0, %v3208_v31  ;;  %1435 = vmatpush1.msra.mxu0 %v2979_v5 }
 0x126   :  { %1596 = vmatpush1.msra.mxu1 %v2981_v29  ;;  %1436 = vmatprep.subr.mxu0 %v2983_v9  ;;  %v3783_v29 = vpop.permute.xlu0 %378  ;;  %v3788_v9 = vpop.permute.xlu1 %373 }
 0x127   :  { %1597 = vmatprep.subr.mxu1 %v2985_v61  ;;  %1437 = vmatpush1.msra.mxu0 %v2977_v2 }
 0x128   :  { %1598 = vmatpush1.msra.mxu1 %v2987_v10  ;;  %1154 = vmatprep.mubr.f32.mxu0 %v4916_v23 }
 0x129   :  { %1315 = vmatprep.mubr.f32.mxu1 %v4916_v23  ;;  %2857 = vmatmul.mubr.msk.f32.gmra.mxu0 %vm391_vm0, %v3218_v3 }
 0x12a   :  { %2873 = vmatmul.mubr.msk.f32.gmra.mxu1 %vm391_vm0, %v3218_v3  ;;  %1160 = vmatprep.mubr.f32.mxu0 %v4916_v23 }
 0x12b   :  { %1321 = vmatprep.mubr.f32.mxu1 %v4916_v23 }
 0x12d   :  { %2858 = vmatmul.mubr.msk.f32.gmra.mxu0 %vm391_vm0, %v3228_v49 }
 0x12e   :  { %2874 = vmatmul.mubr.msk.f32.gmra.mxu1 %vm391_vm0, %v3228_v49  ;;  %1166 = vmatprep.mubr.f32.mxu0 %v4916_v23 }
 0x12f   :  { %1327 = vmatprep.mubr.f32.mxu1 %v4916_v23 }
 0x131   :  { %2859 = vmatmul.mubr.msk.f32.gmra.mxu0 %vm391_vm0, %v3240_v50 }
 0x132   :  { %2875 = vmatmul.mubr.msk.f32.gmra.mxu1 %vm391_vm0, %v3240_v50  ;;  %1172 = vmatprep.mubr.f32.mxu0 %v4916_v23 }
 0x133   :  { %1333 = vmatprep.mubr.f32.mxu1 %v4916_v23 }
 0x135   :  { %2860 = vmatmul.mubr.msk.f32.gmra.mxu0 %vm391_vm0, %v3251_v51 }
 0x136   :  { %2876 = vmatmul.mubr.msk.f32.gmra.mxu1 %vm391_vm0, %v3251_v51  ;;  %1178 = vmatprep.mubr.f32.mxu0 %v4916_v23 }
 0x137   :  { %1339 = vmatprep.mubr.f32.mxu1 %v4916_v23 }
 0x139   :  { %2861 = vmatmul.mubr.msk.f32.gmra.mxu0 %vm391_vm0, %v3262_v52 }
 0x13a   :  { %2877 = vmatmul.mubr.msk.f32.gmra.mxu1 %vm391_vm0, %v3262_v52  ;;  %1184 = vmatprep.mubr.f32.mxu0 %v4916_v23 }
 0x13b   :  { %1345 = vmatprep.mubr.f32.mxu1 %v4916_v23 }
 0x13d   :  { %2862 = vmatmul.mubr.msk.f32.gmra.mxu0 %vm391_vm0, %v3273_v53 }
 0x13e   :  { %2878 = vmatmul.mubr.msk.f32.gmra.mxu1 %vm391_vm0, %v3273_v53  ;;  %1190 = vmatprep.mubr.f32.mxu0 %v4916_v23 }
 0x13f   :  { %1351 = vmatprep.mubr.f32.mxu1 %v4916_v23 }
 0x141   :  { %2863 = vmatmul.mubr.msk.f32.gmra.mxu0 %vm391_vm0, %v3284_v54 }
 0x142   :  { %2879 = vmatmul.mubr.msk.f32.gmra.mxu1 %vm391_vm0, %v3284_v54  ;;  %1196 = vmatprep.mubr.f32.mxu0 %v4916_v23 }
 0x143   :  { %1357 = vmatprep.mubr.f32.mxu1 %v4916_v23 }
 0x145   :  { %2864 = vmatmul.mubr.msk.f32.gmra.mxu0 %vm391_vm0, %v3295_v56 }
 0x146   :  { %2880 = vmatmul.mubr.msk.f32.gmra.mxu1 %vm391_vm0, %v3295_v56  ;;  %1202 = vmatprep.mubr.f32.mxu0 %v4916_v23 }
 0x147   :  { %1363 = vmatprep.mubr.f32.mxu1 %v4916_v23 }
 0x149   :  { %2865 = vmatmul.mubr.msk.f32.gmra.mxu0 %vm391_vm0, %v3308_v58 }
 0x14a   :  { %2881 = vmatmul.mubr.msk.f32.gmra.mxu1 %vm391_vm0, %v3308_v58  ;;  %1208 = vmatprep.mubr.f32.mxu0 %v4916_v23 }
 0x14b   :  { %1369 = vmatprep.mubr.f32.mxu1 %v4916_v23 }
 0x14d   :  { %2866 = vmatmul.mubr.msk.f32.gmra.mxu0 %vm391_vm0, %v3321_v55 }
 0x14e   :  { %2882 = vmatmul.mubr.msk.f32.gmra.mxu1 %vm391_vm0, %v3321_v55  ;;  %1214 = vmatprep.mubr.f32.mxu0 %v4916_v23 }
 0x14f   :  { %1375 = vmatprep.mubr.f32.mxu1 %v4916_v23 }
 0x151   :  { %2867 = vmatmul.mubr.msk.f32.gmra.mxu0 %vm391_vm0, %v3338_v4 }
 0x152   :  { %2883 = vmatmul.mubr.msk.f32.gmra.mxu1 %vm391_vm0, %v3338_v4  ;;  %1220 = vmatprep.mubr.f32.mxu0 %v4916_v23 }
 0x153   :  { %1381 = vmatprep.mubr.f32.mxu1 %v4916_v23 }
 0x155   :  { %2868 = vmatmul.mubr.msk.f32.gmra.mxu0 %vm391_vm0, %v3355_v21 }
 0x156   :  { %2884 = vmatmul.mubr.msk.f32.gmra.mxu1 %vm391_vm0, %v3355_v21  ;;  %1226 = vmatprep.mubr.f32.mxu0 %v4916_v23 }
 0x157   :  { %1387 = vmatprep.mubr.f32.mxu1 %v4916_v23 }
 0x159   :  { %2869 = vmatmul.mubr.msk.f32.gmra.mxu0 %vm391_vm0, %v3366_v22 }
 0x15a   :  { %2885 = vmatmul.mubr.msk.f32.gmra.mxu1 %vm391_vm0, %v3366_v22  ;;  %1232 = vmatprep.mubr.f32.mxu0 %v4916_v23 }
 0x15b   :  { %1393 = vmatprep.mubr.f32.mxu1 %v4916_v23 }
 0x15d   :  { %2870 = vmatmul.mubr.msk.f32.gmra.mxu0 %vm391_vm0, %v3377_v26 }
 0x15e   :  { %2886 = vmatmul.mubr.msk.f32.gmra.mxu1 %vm391_vm0, %v3377_v26  ;;  %1238 = vmatprep.mubr.f32.mxu0 %v4916_v23 }
 0x15f   :  { %v3600_v11 = vpop.f32.mrf.mxu0  ;;  %1399 = vmatprep.mubr.f32.mxu1 %v4916_v23 }
 0x160   :  { %4963 = vst [vmem:[#allocation2_spill] sm:$0xff] %v3600_v11 }
 0x161   :  { %2871 = vmatmul.mubr.msk.f32.gmra.mxu0 %vm391_vm0, %v3388_v27  ;;  %v3610_v13 = vpop.f32.mrf.mxu0 }
 0x162   :  { %2887 = vmatmul.mubr.msk.f32.gmra.mxu1 %vm391_vm0, %v3388_v27  ;;  %1470 = vmatprep.mubr.f32.mxu0 %v4916_v23  ;;  %4965 = vst [vmem:[#allocation4_spill] sm:$0xff] %v3610_v13  ;;  %v3799_v13 = vpop.permute.xlu1 %363 }
 0x163   :  { %v3608_v6 = vpop.f32.mrf.mxu1  ;;  %1631 = vmatprep.mubr.f32.mxu1 %v4916_v23 }
 0x164   :  { %4964 = vst [vmem:[#allocation3_spill] sm:$0xff] %v3608_v6 }
 0x165   :  { %v3613_v0 = vpop.f32.mrf.mxu1  ;;  %2888 = vmatmul.mubr.msk.f32.vlgmr.msra.gmra.mxu0 %vm391_vm0, %v3208_v31 }
 0x166   :  { %4966 = vst [vmem:[#allocation5_spill] sm:$0xff] %v3613_v0  ;;  %2904 = vmatmul.mubr.msk.f32.vlgmr.msra.gmra.mxu1 %vm391_vm0, %v3208_v31  ;;  %1476 = vmatprep.mubr.f32.mxu0 %v4916_v23  ;;  %v3620_v15 = vpop.f32.mrf.mxu0  ;;  %v3797_v0 = vpop.permute.xlu0 %368 }
 0x167   :  { %4967 = vst [vmem:[#allocation6_spill] sm:$0xff] %v3620_v15  ;;  %1637 = vmatprep.mubr.f32.mxu1 %v4916_v23  ;;  %v3623_v36 = vpop.f32.mrf.mxu1 }
 0x168   :  { %4968 = vst [vmem:[#allocation7_spill] sm:$0xff] %v3623_v36  ;;  %v3625_v18 = vpop.f32.mrf.mxu0 }
 0x169   :  { %4969 = vst [vmem:[#allocation8_spill] sm:$0xff] %v3625_v18  ;;  %2889 = vmatmul.mubr.msk.f32.gmra.mxu0 %vm391_vm0, %v3218_v3  ;;  %v3629_v20 = vpop.f32.mrf.mxu1 }
 0x16a   :  { %4970 = vst [vmem:[#allocation9_spill] sm:$0xff] %v3629_v20  ;;  %2905 = vmatmul.mubr.msk.f32.gmra.mxu1 %vm391_vm0, %v3218_v3  ;;  %1482 = vmatprep.mubr.f32.mxu0 %v4916_v23  ;;  %v3634_v31 = vpop.f32.mrf.mxu0 }
 0x16b   :  { %4971 = vst [vmem:[#allocation10_spill] sm:$0xff] %v3634_v31  ;;  %1643 = vmatprep.mubr.f32.mxu1 %v4916_v23  ;;  %v3637_v8 = vpop.f32.mrf.mxu1 }
 0x16c   :  { %4972 = vst [vmem:[#allocation11_spill] sm:$0xff] %v3637_v8  ;;  %v3639_v14 = vpop.f32.mrf.mxu0 }
 0x16d   :  { %4973 = vst [vmem:[#allocation12_spill] sm:$0xff] %v3639_v14  ;;  %2890 = vmatmul.mubr.msk.f32.gmra.mxu0 %vm391_vm0, %v3228_v49  ;;  %v3643_v24 = vpop.f32.mrf.mxu1 }
 0x16e   :  { %4974 = vst [vmem:[#allocation13_spill] sm:$0xff] %v3643_v24  ;;  %2906 = vmatmul.mubr.msk.f32.gmra.mxu1 %vm391_vm0, %v3228_v49  ;;  %1488 = vmatprep.mubr.f32.mxu0 %v4916_v23  ;;  %v3648_v3 = vpop.f32.mrf.mxu0 }
 0x16f   :  { %4975 = vst [vmem:[#allocation14_spill] sm:$0xff] %v3648_v3  ;;  %1649 = vmatprep.mubr.f32.mxu1 %v4916_v23  ;;  %v3651_v25 = vpop.f32.mrf.mxu1  ;;  %v3823_v3 = vpop.permute.xlu1 %353 }
 0x170   :  { %4976 = vst [vmem:[#allocation15_spill] sm:$0xff] %v3651_v25  ;;  %v3653_v17 = vpop.f32.mrf.mxu0 }
 0x171   :  { %4977 = vst [vmem:[#allocation16_spill] sm:$0xff] %v3653_v17  ;;  %2891 = vmatmul.mubr.msk.f32.gmra.mxu0 %vm391_vm0, %v3240_v50  ;;  %v3657_v19 = vpop.f32.mrf.mxu1 }
 0x172   :  { %4978 = vst [vmem:[#allocation17_spill] sm:$0xff] %v3657_v19  ;;  %2907 = vmatmul.mubr.msk.f32.gmra.mxu1 %vm391_vm0, %v3240_v50  ;;  %1494 = vmatprep.mubr.f32.mxu0 %v4916_v23  ;;  %v3662_v49 = vpop.f32.mrf.mxu0 }
 0x173   :  { %4979 = vst [vmem:[#allocation18_spill] sm:$0xff] %v3662_v49  ;;  %1655 = vmatprep.mubr.f32.mxu1 %v4916_v23  ;;  %v3665_v28 = vpop.f32.mrf.mxu1 }
 0x174   :  { %4980 = vst [vmem:[#allocation19_spill] sm:$0xff] %v3665_v28  ;;  %v3667_v30 = vpop.f32.mrf.mxu0 }
 0x175   :  { %2892 = vmatmul.mubr.msk.f32.gmra.mxu0 %vm391_vm0, %v3251_v51  ;;  %v3671_v32 = vpop.f32.mrf.mxu1 }
 0x176   :  { %4981 = vst [vmem:[#allocation20_spill] sm:$0xff] %v3671_v32  ;;  %2908 = vmatmul.mubr.msk.f32.gmra.mxu1 %vm391_vm0, %v3251_v51  ;;  %1500 = vmatprep.mubr.f32.mxu0 %v4916_v23  ;;  %v3676_v50 = vpop.f32.mrf.mxu0 }
 0x177   :  { %1661 = vmatprep.mubr.f32.mxu1 %v4916_v23  ;;  %v3679_v33 = vpop.f32.mrf.mxu1 }
 0x178   :  { %4982 = vst [vmem:[#allocation21_spill] sm:$0xff] %v3679_v33  ;;  %v3681_v35 = vpop.f32.mrf.mxu0 }
 0x179   :  { %2893 = vmatmul.mubr.msk.f32.gmra.mxu0 %vm391_vm0, %v3262_v52  ;;  %v3685_v39 = vpop.f32.mrf.mxu1 }
 0x17a   :  { %2909 = vmatmul.mubr.msk.f32.gmra.mxu1 %vm391_vm0, %v3262_v52  ;;  %1506 = vmatprep.mubr.f32.mxu0 %v4916_v23  ;;  %v3690_v51 = vpop.f32.mrf.mxu0 }
 0x17b   :  { %1667 = vmatprep.mubr.f32.mxu1 %v4916_v23  ;;  %v3693_v40 = vpop.f32.mrf.mxu1 }
 0x17c   :  { %v3695_v44 = vpop.f32.mrf.mxu0 }
 0x17d   :  { %2894 = vmatmul.mubr.msk.f32.gmra.mxu0 %vm391_vm0, %v3273_v53  ;;  %v3699_v45 = vpop.f32.mrf.mxu1 }
 0x17e   :  { %2910 = vmatmul.mubr.msk.f32.gmra.mxu1 %vm391_vm0, %v3273_v53  ;;  %1512 = vmatprep.mubr.f32.mxu0 %v4916_v23  ;;  %v3704_v52 = vpop.f32.mrf.mxu0 }
 0x17f   :  { %1673 = vmatprep.mubr.f32.mxu1 %v4916_v23  ;;  %v3707_v46 = vpop.f32.mrf.mxu1 }
 0x180   :  { %v3709_v16 = vpop.f32.mrf.mxu0 }
 0x181   :  { %2895 = vmatmul.mubr.msk.f32.gmra.mxu0 %vm391_vm0, %v3284_v54  ;;  %v3713_v34 = vpop.f32.mrf.mxu1 }
 0x182   :  { %2911 = vmatmul.mubr.msk.f32.gmra.mxu1 %vm391_vm0, %v3284_v54  ;;  %1518 = vmatprep.mubr.f32.mxu0 %v4916_v23  ;;  %v3718_v53 = vpop.f32.mrf.mxu0 }
 0x183   :  { %1679 = vmatprep.mubr.f32.mxu1 %v4916_v23  ;;  %v3721_v47 = vpop.f32.mrf.mxu1 }
 0x184   :  { %v3723_v42 = vpop.f32.mrf.mxu0 }
 0x185   :  { %2896 = vmatmul.mubr.msk.f32.gmra.mxu0 %vm391_vm0, %v3295_v56  ;;  %v3727_v37 = vpop.f32.mrf.mxu1 }
 0x186   :  { %2912 = vmatmul.mubr.msk.f32.gmra.mxu1 %vm391_vm0, %v3295_v56  ;;  %1524 = vmatprep.mubr.f32.mxu0 %v4916_v23  ;;  %v3732_v54 = vpop.f32.mrf.mxu0 }
 0x187   :  { %1685 = vmatprep.mubr.f32.mxu1 %v4916_v23  ;;  %v3735_v48 = vpop.f32.mrf.mxu1 }
 0x188   :  { %v3737_v57 = vpop.f32.mrf.mxu0 }
 0x189   :  { %2897 = vmatmul.mubr.msk.f32.gmra.mxu0 %vm391_vm0, %v3308_v58  ;;  %v3741_v38 = vpop.f32.mrf.mxu1 }
 0x18a   :  { %2913 = vmatmul.mubr.msk.f32.gmra.mxu1 %vm391_vm0, %v3308_v58  ;;  %1530 = vmatprep.mubr.f32.mxu0 %v4916_v23  ;;  %v3746_v56 = vpop.f32.mrf.mxu0 }
 0x18b   :  { %1691 = vmatprep.mubr.f32.mxu1 %v4916_v23  ;;  %v3751_v59 = vpop.f32.mrf.mxu1 }
 0x18c   :  { %v3753_v60 = vpop.f32.mrf.mxu0 }
 0x18d   :  { %2898 = vmatmul.mubr.msk.f32.gmra.mxu0 %vm391_vm0, %v3321_v55  ;;  %v3757_v63 = vpop.f32.mrf.mxu1 }
 0x18e   :  { %2914 = vmatmul.mubr.msk.f32.gmra.mxu1 %vm391_vm0, %v3321_v55  ;;  %1536 = vmatprep.mubr.f32.mxu0 %v4916_v23  ;;  %v3762_v58 = vpop.f32.mrf.mxu0 }
 0x18f   :  { %1697 = vmatprep.mubr.f32.mxu1 %v4916_v23  ;;  %v3765_v7 = vpop.f32.mrf.mxu1 }
 0x190   :  { %v3767_v43 = vpop.f32.mrf.mxu0 }
 0x191   :  { %2899 = vmatmul.mubr.msk.f32.gmra.mxu0 %vm391_vm0, %v3338_v4  ;;  %v3773_v62 = vpop.f32.mrf.mxu1 }
 0x192   :  { %2915 = vmatmul.mubr.msk.f32.gmra.mxu1 %vm391_vm0, %v3338_v4  ;;  %1542 = vmatprep.mubr.f32.mxu0 %v4916_v23  ;;  %v578_v55 = vpop.f32.mrf.mxu0 }
 0x193   :  { %1703 = vmatprep.mubr.f32.mxu1 %v4916_v23  ;;  %v3779_v1 = vpop.f32.mrf.mxu1 }
 0x194   :  { %v580_v2 = vpop.f32.mrf.mxu0 }
 0x195   :  { %2900 = vmatmul.mubr.msk.f32.gmra.mxu0 %vm391_vm0, %v3355_v21  ;;  %v741_v5 = vpop.f32.mrf.mxu1 }
 0x196   :  { %2916 = vmatmul.mubr.msk.f32.gmra.mxu1 %vm391_vm0, %v3355_v21  ;;  %1548 = vmatprep.mubr.f32.mxu0 %v4916_v23  ;;  %v584_v4 = vpop.f32.mrf.mxu0 }
 0x197   :  { %1709 = vmatprep.mubr.f32.mxu1 %v4916_v23  ;;  %v745_v61 = vpop.f32.mrf.mxu1 }
 0x198   :  { %v586_v10 = vpop.f32.mrf.mxu0  ;;  %v746_v49 = vadd.f32 %v745_v61, %v3783_v29 }
 0x199   :  { %2901 = vmatmul.mubr.msk.f32.gmra.mxu0 %vm391_vm0, %v3366_v22  ;;  %v747_v6 = vpop.f32.mrf.mxu1 }
 0x19a   :  { %2917 = vmatmul.mubr.msk.f32.gmra.mxu1 %vm391_vm0, %v3366_v22  ;;  %1554 = vmatprep.mubr.f32.mxu0 %v4916_v23  ;;  %v590_v11 = vpop.f32.mrf.mxu0  ;;  %v1938_v61 = vmax.f32 %v746_v49, 0.0  ;;  %v728_v49 = vadd.f32 %v3751_v59, %v3799_v13 }
 0x19b   :  { %1715 = vmatprep.mubr.f32.mxu1 %v4916_v23  ;;  %v751_v21 = vpop.f32.mrf.mxu1  ;;  %v591_v19 = vadd.f32 %v590_v11, %v3769_v41  ;;  %v585_v11 = vadd.f32 %v584_v4, %v3783_v29 }
 0x19c   :  { %v592_v36 = vpop.f32.mrf.mxu0  ;;  %v752_v28 = vadd.f32 %v751_v21, %v3769_v41 }
 0x19d   :  { %2902 = vmatmul.mubr.msk.f32.gmra.mxu0 %vm391_vm0, %v3377_v26  ;;  %v753_v20 = vpop.f32.mrf.mxu1  ;;  %v593_v24 = vadd.f32 %v592_v36, %v3769_v41  ;;  %v1952_v4 = vmax.f32 %v591_v19, 0.0  ;;  %v1936_v19 = vmax.f32 %v585_v11, 0.0 }
 0x19e   :  { %2918 = vmatmul.mubr.msk.f32.gmra.mxu1 %vm391_vm0, %v3377_v26  ;;  %1560 = vmatprep.mubr.f32.mxu0 %v4916_v23  ;;  %v596_v22 = vpop.f32.mrf.mxu0  ;;  %v3813_v26 = vpop.permute.xlu0 %358 }
 0x19f   :  { %1721 = vmatprep.mubr.f32.mxu1 %v4916_v23  ;;  %v757_v15 = vpop.f32.mrf.mxu1  ;;  %v597_v8 = vadd.f32 %v596_v22, %v3748_v12  ;;  %v754_v23 = vadd.f32 %v753_v20, %v3769_v41  ;;  %v722_v59 = vadd.f32 %v3735_v48, %v3813_v26 }
 0x1a0   :  { %v598_v18 = vpop.f32.mrf.mxu0  ;;  %v758_v31 = vadd.f32 %v757_v15, %v3748_v12  ;;  %v4986_v15 = vmov 0.0  }
 0x1a1   :  { %2903 = vmatmul.mubr.msk.f32.gmra.mxu0 %vm391_vm0, %v3388_v27  ;;  %v599_v25 = vadd.f32 %v598_v18, %v3748_v12  ;;  %v759_v14 = vpop.f32.mrf.mxu1  ;;  %v587_v18 = vadd.f32 %v586_v10, %v3783_v29  ;;  %v1968_v20 = vmax.f32 %v597_v8, 0.0  ;;  %v1953_v10 = vmax.f32 %v593_v24, 0.0 }
 0x1a2   :  { %2919 = vmatmul.mubr.msk.f32.gmra.mxu1 %vm391_vm0, %v3388_v27  ;;  %v760_v22 = vadd.f32 %v759_v14, %v3748_v12  ;;  %v3820_v36 = vpop.f32.mrf.mxu0  ;;  %2076 = vmatprep.mubr.f32.mxu0 %v4986_v15  ;;  %v748_v27 = vadd.f32 %v747_v6, %v3783_v29  ;;  %v581_v12 = vadd.f32 %v580_v2, %v3788_v9  ;;  %v1970_v33 = vmax.f32 %v758_v31, 0.0  ;;  %v3844_v31 = vpop.permute.xlu0 %348 }
 0x1a3   :  { %4985 = vst [vmem:[#allocation24_spill] sm:$0xff] %v3820_v36  ;;  %v1969_v17 = vmax.f32 %v599_v25, 0.0  ;;  %v3827_v32 = vpop.f32.mrf.mxu1  ;;  %2165 = vmatprep.mubr.f32.mxu1 %v4986_v15  ;;  %v579_v25 = vadd.f32 %v578_v55, %v3788_v9  ;;  %v1955_v41 = vmax.f32 %v754_v23, 0.0  ;;  %v575_v6 = vadd.f32 %v3767_v43, %v3797_v0  ;;  %v3852_v43 = vpop.permute.xlu1 %343 }
 0x1a4   :  { %4987 = vst [vmem:[#allocation25_spill] sm:$0xff] %v3827_v32  ;;  %v1971_v14 = vmax.f32 %v760_v22, 0.0  ;;  %v3832_v36 = vpop.f32.mrf.mxu0  ;;  %v742_v32 = vadd.f32 %v741_v5, %v3788_v9  ;;  %v740_v8 = vadd.f32 %v3779_v1, %v3788_v9  ;;  %v1937_v2 = vmax.f32 %v587_v18, 0.0 }
 0x1a5   :  { %4988 = vst [vmem:[#allocation26_spill] sm:$0xff] %v3832_v36  ;;  %v3836_v21 = vpop.f32.mrf.mxu1  ;;  %2012 = vmatprep.subr.mxu0 %v1969_v17  ;;  %v1954_v24 = vmax.f32 %v752_v28, 0.0  ;;  %v573_v17 = vadd.f32 %v3762_v58, %v3797_v0  ;;  %v736_v23 = vadd.f32 %v3773_v62, %v3797_v0  ;;  %v1939_v55 = vmax.f32 %v748_v27, 0.0 }
 0x1a6   :  { %4989 = vst [vmem:[#allocation27_spill] sm:$0xff] %v3836_v21  ;;  %2101 = vmatprep.subr.mxu1 %v1971_v14  ;;  %2013 = vmatpush1.msra.mxu0 %v1968_v20  ;;  %v569_v28 = vadd.f32 %v3753_v60, %v3799_v13  ;;  %v1921_v1 = vmax.f32 %v581_v12, 0.0  ;;  %v567_v62 = vadd.f32 %v3746_v56, %v3799_v13  ;;  %v1920_v22 = vmax.f32 %v579_v25, 0.0 }
 0x1a7   :  { %2102 = vmatpush1.msra.mxu1 %v1970_v33  ;;  %2014 = vmatprep.subr.mxu0 %v1953_v10  ;;  %v734_v33 = vadd.f32 %v3765_v7, %v3797_v0  ;;  %v1923_v18 = vmax.f32 %v742_v32, 0.0  ;;  %v563_v12 = vadd.f32 %v3737_v57, %v3813_v26  ;;  %v1905_v60 = vmax.f32 %v575_v6, 0.0  ;;  %v3892_v48 = vpop.permute.xlu1 %333 }
 0x1a8   :  { %v3850_v5 = vpop.f32.mrf.mxu0  ;;  %2103 = vmatprep.subr.mxu1 %v1955_v41  ;;  %2015 = vmatpush1.msra.mxu0 %v1952_v4  ;;  %v730_v41 = vadd.f32 %v3757_v63, %v3799_v13  ;;  %v1922_v7 = vmax.f32 %v740_v8, 0.0  ;;  %v561_v56 = vadd.f32 %v3732_v54, %v3813_v26  ;;  %v724_v32 = vadd.f32 %v3741_v38, %v3813_v26  ;;  %v3884_v54 = vpop.permute.xlu0 %338 }
 0x1a9   :  { %4990 = vst [vmem:[#allocation28_spill] sm:$0xff] %v3850_v5  ;;  %v3858_v58 = vpop.f32.mrf.mxu1  ;;  %2104 = vmatpush1.msra.mxu1 %v1954_v24  ;;  %2016 = vmatprep.subr.mxu0 %v1937_v2  ;;  %v1904_v63 = vmax.f32 %v573_v17, 0.0  ;;  %v1907_v20 = vmax.f32 %v736_v23, 0.0  ;;  %v557_v57 = vadd.f32 %v3723_v42, %v3823_v3  ;;  %v1889_v10 = vmax.f32 %v569_v28, 0.0  ;;  %4997 = vst [vmem:[#allocation35_spill] sm:$0xff] %v3892_v48 }
 0x1aa   :  { %4991 = vst [vmem:[#allocation29_spill] sm:$0xff] %v3858_v58  ;;  %v3864_v11 = vpop.f32.mrf.mxu0  ;;  %2105 = vmatprep.subr.mxu1 %v1939_v55  ;;  %2017 = vmatpush1.msra.mxu0 %v1936_v19  ;;  %v1906_v25 = vmax.f32 %v734_v33, 0.0  ;;  %v555_v38 = vadd.f32 %v3718_v53, %v3823_v3  ;;  %v718_v6 = vadd.f32 %v3727_v37, %v3823_v3  ;;  %v1888_v8 = vmax.f32 %v567_v62, 0.0 }
 0x1ab   :  { %4992 = vst [vmem:[#allocation30_spill] sm:$0xff] %v3864_v11  ;;  %v3870_v27 = vpop.f32.mrf.mxu1  ;;  %2106 = vmatpush1.msra.mxu1 %v1938_v61  ;;  %2018 = vmatprep.subr.mxu0 %v1921_v1  ;;  %v1891_v2 = vmax.f32 %v730_v41, 0.0  ;;  %v551_v24 = vadd.f32 %v3709_v16, %v3844_v31  ;;  %v716_v17 = vadd.f32 %v3721_v47, %v3823_v3  ;;  %v1873_v23 = vmax.f32 %v563_v12, 0.0 }
 0x1ac   :  { %4993 = vst [vmem:[#allocation31_spill] sm:$0xff] %v3870_v27  ;;  %v3876_v14 = vpop.f32.mrf.mxu0  ;;  %2107 = vmatprep.subr.mxu1 %v1923_v18  ;;  %2019 = vmatpush1.msra.mxu0 %v1920_v22  ;;  %v1890_v19 = vmax.f32 %v728_v49, 0.0  ;;  %v549_v37 = vadd.f32 %v3704_v52, %v3844_v31  ;;  %v712_v55 = vadd.f32 %v3713_v34, %v3844_v31  ;;  %v1872_v28 = vmax.f32 %v561_v56, 0.0 }
 0x1ad   :  { %4994 = vst [vmem:[#allocation32_spill] sm:$0xff] %v3876_v14  ;;  %v3882_v4 = vpop.f32.mrf.mxu1  ;;  %2108 = vmatpush1.msra.mxu1 %v1922_v7  ;;  %2020 = vmatprep.subr.mxu0 %v1905_v60  ;;  %v1875_v33 = vmax.f32 %v724_v32, 0.0  ;;  %v545_v16 = vadd.f32 %v3695_v44, %v3852_v43  ;;  %v710_v47 = vadd.f32 %v3707_v46, %v3844_v31  ;;  %v1857_v61 = vmax.f32 %v557_v57, 0.0  ;;  %v5006_v57 = vld [vmem:[#allocation21_spill] sm:$0xff] }
 0x1ae   :  { %4995 = vst [vmem:[#allocation33_spill] sm:$0xff] %v3882_v4  ;;  %v3890_v42 = vpop.f32.mrf.mxu0  ;;  %2109 = vmatprep.subr.mxu1 %v1907_v20  ;;  %2021 = vmatpush1.msra.mxu0 %v1904_v63  ;;  %v1874_v62 = vmax.f32 %v722_v59, 0.0  ;;  %v543_v52 = vadd.f32 %v3690_v51, %v3852_v43  ;;  %v706_v34 = vadd.f32 %v3699_v45, %v3852_v43  ;;  %v1856_v22 = vmax.f32 %v555_v38, 0.0  ;;  %v3924_v51 = vpop.permute.xlu0 %328 }
 0x1af   :  { %4996 = vst [vmem:[#allocation34_spill] sm:$0xff] %v3890_v42  ;;  %v3898_v53 = vpop.f32.mrf.mxu1  ;;  %2110 = vmatpush1.msra.mxu1 %v1906_v25  ;;  %2022 = vmatprep.subr.mxu0 %v1889_v10  ;;  %v1859_v18 = vmax.f32 %v718_v6, 0.0  ;;  %v539_v44 = vadd.f32 %v3681_v35, %v3884_v54  ;;  %v704_v46 = vadd.f32 %v3693_v40, %v3852_v43  ;;  %v1841_v49 = vmax.f32 %v551_v24, 0.0  ;;  %v3932_v40 = vpop.permute.xlu1 %323  ;;  %v5009_v6 = vld [vmem:[#allocation20_spill] sm:$0xff] }
 0x1b0   :  { %4998 = vst [vmem:[#allocation36_spill] sm:$0xff] %v3898_v53  ;;  %v3904_v1 = vpop.f32.mrf.mxu0  ;;  %2111 = vmatprep.subr.mxu1 %v1891_v2  ;;  %2023 = vmatpush1.msra.mxu0 %v1888_v8  ;;  %v1858_v60 = vmax.f32 %v716_v17, 0.0  ;;  %5003 = vst [vmem:[#allocation41_spill] sm:$0xff] %v3924_v51  ;;  %v537_v45 = vadd.f32 %v3676_v50, %v3884_v54  ;;  %v700_v56 = vadd.f32 %v3685_v39, %v3884_v54  ;;  %v5008_v39 = vld [vmem:[#allocation18_spill] sm:$0xff] }
 0x1b1   :  { %4999 = vst [vmem:[#allocation37_spill] sm:$0xff] %v3904_v1  ;;  %v3910_v41 = vpop.f32.mrf.mxu1  ;;  %2112 = vmatpush1.msra.mxu1 %v1890_v19  ;;  %2024 = vmatprep.subr.mxu0 %v1873_v23  ;;  %v1840_v32 = vmax.f32 %v549_v37, 0.0  ;;  %v1843_v63 = vmax.f32 %v712_v55, 0.0  ;;  %5005 = vst [vmem:[#allocation43_spill] sm:$0xff] %v3932_v40  ;;  %v533_v20 = vadd.f32 %v3667_v30, %v3892_v48  ;;  %v1825_v10 = vmax.f32 %v545_v16, 0.0  ;;  %v5011_v30 = vld [vmem:[#allocation16_spill] sm:$0xff] }
 0x1b2   :  { %5000 = vst [vmem:[#allocation38_spill] sm:$0xff] %v3910_v41  ;;  %v3916_v12 = vpop.f32.mrf.mxu0  ;;  %2113 = vmatprep.subr.mxu1 %v1875_v33  ;;  %2025 = vmatpush1.msra.mxu0 %v1872_v28  ;;  %v698_v59 = vadd.f32 %v5006_v57, %v3884_v54  ;;  %v1842_v25 = vmax.f32 %v710_v47, 0.0  ;;  %v531_v38 = vadd.f32 %v5008_v39, %v3892_v48  ;;  %v1824_v2 = vmax.f32 %v543_v52, 0.0  ;;  %v5012_v19 = vld [vmem:[#allocation19_spill] sm:$0xff]  ;;  %v5014_v16 = vld [vmem:[#allocation14_spill] sm:$0xff]  ;;  %v3964_v57 = vpop.permute.xlu0 %318 }
 0x1b3   :  { %5001 = vst [vmem:[#allocation39_spill] sm:$0xff] %v3916_v12  ;;  %v3922_v7 = vpop.f32.mrf.mxu1  ;;  %2114 = vmatpush1.msra.mxu1 %v1874_v62  ;;  %2026 = vmatprep.subr.mxu0 %v1857_v61  ;;  %v694_v8 = vadd.f32 %v5009_v6, %v3892_v48  ;;  %v1827_v24 = vmax.f32 %v706_v34, 0.0  ;;  %v527_v23 = vadd.f32 %v5011_v30, %v3924_v51  ;;  %v1809_v55 = vmax.f32 %v539_v44, 0.0  ;;  %v5015_v61 = vld [vmem:[#allocation17_spill] sm:$0xff]  ;;  %v5025_v30 = vld [vmem:[#allocation11_spill] sm:$0xff] }
 0x1b4   :  { %5002 = vst [vmem:[#allocation40_spill] sm:$0xff] %v3922_v7  ;;  %v3930_v35 = vpop.f32.mrf.mxu0  ;;  %2115 = vmatprep.subr.mxu1 %v1859_v18  ;;  %2027 = vmatpush1.msra.mxu0 %v1856_v22  ;;  %v692_v37 = vadd.f32 %v5012_v19, %v3892_v48  ;;  %v1826_v28 = vmax.f32 %v704_v46, 0.0  ;;  %v525_v47 = vadd.f32 %v5014_v16, %v3924_v51  ;;  %v1808_v52 = vmax.f32 %v537_v45, 0.0  ;;  %v5017_v18 = vld [vmem:[#allocation12_spill] sm:$0xff]  ;;  %v5018_v46 = vld [vmem:[#allocation15_spill] sm:$0xff]  ;;  %v5021_v45 = vld [vmem:[#allocation10_spill] sm:$0xff] }
 0x1b5   :  { %5004 = vst [vmem:[#allocation42_spill] sm:$0xff] %v3930_v35  ;;  %v3938_v50 = vpop.f32.mrf.mxu1  ;;  %2116 = vmatpush1.msra.mxu1 %v1858_v60  ;;  %2028 = vmatprep.subr.mxu0 %v1841_v49  ;;  %v688_v62 = vadd.f32 %v5015_v61, %v3924_v51  ;;  %v1811_v34 = vmax.f32 %v700_v56, 0.0  ;;  %v521_v44 = vadd.f32 %v5017_v18, %v3932_v40  ;;  %v1793_v60 = vmax.f32 %v533_v20, 0.0  ;;  %v3972_v20 = vpop.permute.xlu1 %313  ;;  %v5028_v61 = vld [vmem:[#allocation9_spill] sm:$0xff]  ;;  %v5039_v7 = vld [vmem:[#allocation23_spill] sm:$0xff] }
 0x1b6   :  { %5007 = vst [vmem:[#allocation21_spill] sm:$0xff] %v3938_v50  ;;  %v3944_v17 = vpop.f32.mrf.mxu0  ;;  %2117 = vmatprep.subr.mxu1 %v1843_v63  ;;  %2029 = vmatpush1.msra.mxu0 %v1840_v32  ;;  %v686_v49 = vadd.f32 %v5018_v46, %v3924_v51  ;;  %v1810_v32 = vmax.f32 %v698_v59, 0.0  ;;  %5020 = vst [vmem:[#allocation14_spill] sm:$0xff] %v3964_v57  ;;  %v519_v56 = vadd.f32 %v5021_v45, %v3932_v40  ;;  %v5024_v59 = vld [vmem:[#allocation8_spill] sm:$0xff] }
 0x1b7   :  { %5010 = vst [vmem:[#allocation18_spill] sm:$0xff] %v3944_v17  ;;  %v3950_v33 = vpop.f32.mrf.mxu1  ;;  %2118 = vmatpush1.msra.mxu1 %v1842_v25  ;;  %2030 = vmatprep.subr.mxu0 %v1825_v10  ;;  %v5022_v10 = vld [vmem:[#allocation13_spill] sm:$0xff]  ;;  %v1792_v39 = vmax.f32 %v531_v38, 0.0  ;;  %v1795_v6 = vmax.f32 %v694_v8, 0.0  ;;  %5023 = vst [vmem:[#allocation17_spill] sm:$0xff] %v3972_v20  ;;  %v680_v19 = vadd.f32 %v5025_v30, %v3932_v40  ;;  %v5027_v38 = vld [vmem:[#allocation6_spill] sm:$0xff] }
 0x1b8   :  { %5013 = vst [vmem:[#allocation20_spill] sm:$0xff] %v3950_v33  ;;  %v3956_v22 = vpop.f32.mrf.mxu0  ;;  %2119 = vmatprep.subr.mxu1 %v1827_v24  ;;  %2031 = vmatpush1.msra.mxu0 %v1824_v2  ;;  %v682_v25 = vadd.f32 %v5022_v10, %v3932_v40  ;;  %v515_v24 = vadd.f32 %v5024_v59, %v3964_v57  ;;  %v1779_v18 = vmax.f32 %v688_v62, 0.0  ;;  %v5029_v45 = vld [vmem:[#allocation4_spill] sm:$0xff]  ;;  %v5031_v30 = vld [vmem:[#allocation5_spill] sm:$0xff]  ;;  %v1760_v62 = vmax.f32 %v519_v56, 0.0 }
 0x1b9   :  { %5016 = vst [vmem:[#allocation16_spill] sm:$0xff] %v3956_v22  ;;  %v3962_v63 = vpop.f32.mrf.mxu1  ;;  %2120 = vmatpush1.msra.mxu1 %v1826_v28  ;;  %2032 = vmatprep.subr.mxu0 %v1809_v55  ;;  %v1777_v55 = vmax.f32 %v527_v23, 0.0  ;;  %v1794_v28 = vmax.f32 %v692_v37, 0.0  ;;  %v513_v8 = vadd.f32 %v5027_v38, %v3964_v57  ;;  %v509_v23 = vadd.f32 %v5029_v45, %v3972_v20  ;;  %v5030_v37 = vld [vmem:[#allocation7_spill] sm:$0xff] }
 0x1ba   :  { %5019 = vst [vmem:[#allocation19_spill] sm:$0xff] %v3962_v63  ;;  %v3970_v2 = vpop.f32.mrf.mxu0  ;;  %2121 = vmatprep.subr.mxu1 %v1811_v34  ;;  %2033 = vmatpush1.msra.mxu0 %v1808_v52  ;;  %v676_v52 = vadd.f32 %v5028_v61, %v3964_v57  ;;  %v1776_v34 = vmax.f32 %v525_v47, 0.0  ;;  %v674_v10 = vadd.f32 %v5030_v37, %v3964_v57  ;;  %v1763_v38 = vmax.f32 %v682_v25, 0.0 }
 0x1bb   :  { %v3978_v16 = vpop.f32.mrf.mxu1  ;;  %2122 = vmatpush1.msra.mxu1 %v1810_v32  ;;  %2034 = vmatprep.subr.mxu0 %v1793_v60  ;;  %v1761_v32 = vmax.f32 %v521_v44, 0.0  ;;  %v1778_v60 = vmax.f32 %v686_v49, 0.0  ;;  %v670_v47 = vadd.f32 %v5031_v30, %v3972_v20  ;;  %v1745_v45 = vmax.f32 %v515_v24, 0.0  ;;  %v5033_v49 = vld [vmem:[#allocation3_spill] sm:$0xff] }
 0x1bc   :  { %5026 = vst [vmem:[#allocation12_spill] sm:$0xff] %v3978_v16  ;;  %v3984_v46 = vpop.f32.mrf.mxu0  ;;  %2123 = vmatprep.subr.mxu1 %v1795_v6  ;;  %2035 = vmatpush1.msra.mxu0 %v1792_v39  ;;  %v5032_v39 = vld [vmem:[#allocation2_spill] sm:$0xff]  ;;  %v1762_v37 = vmax.f32 %v680_v19, 0.0  ;;  %v1747_v30 = vmax.f32 %v676_v52, 0.0  ;;  %v1729_v25 = vmax.f32 %v509_v23, 0.0 }
 0x1bd   :  { %v3990_v59 = vpop.f32.mrf.mxu1  ;;  %2124 = vmatpush1.msra.mxu1 %v1794_v28  ;;  %2036 = vmatprep.subr.mxu0 %v1777_v55  ;;  %v507_v6 = vadd.f32 %v5032_v39, %v3972_v20  ;;  %v668_v55 = vadd.f32 %v5033_v49, %v3972_v20  ;;  %v1744_v28 = vmax.f32 %v513_v8, 0.0  ;;  %v1731_v24 = vmax.f32 %v670_v47, 0.0  ;;  %v4011_v8 = vld [vmem:[%s4914_s4] sm:$0xff] }
 0x1be   :  { %v3994_v61 = vpop.f32.mrf.mxu0  ;;  %2125 = vmatprep.subr.mxu1 %v1779_v18  ;;  %2037 = vmatpush1.msra.mxu0 %v1776_v34  ;;  %v1746_v34 = vmax.f32 %v674_v10, 0.0  ;;  %5034 = vst [vmem:[#allocation15_spill] sm:$0xff] %v4011_v8 }
 0x1bf   :  { %v3998_v44 = vpop.f32.mrf.mxu1  ;;  %2126 = vmatpush1.msra.mxu1 %v1778_v60  ;;  %2038 = vmatprep.subr.mxu0 %v1761_v32  ;;  %v1728_v32 = vmax.f32 %v507_v6, 0.0  ;;  %v1730_v23 = vmax.f32 %v668_v55, 0.0 }
 0x1c0   :  { %v4002_v56 = vpop.f32.mrf.mxu0  ;;  %2127 = vmatprep.subr.mxu1 %v1763_v38  ;;  %2039 = vmatpush1.msra.mxu0 %v1760_v62  ;;  %v4027_v62 = vld [vmem:[%s4914_s4 + $0x8] sm:$0xff] }
 0x1c1   :  { %v4004_v18 = vpop.f32.mrf.mxu1  ;;  %2128 = vmatpush1.msra.mxu1 %v1762_v37  ;;  %2040 = vmatprep.subr.mxu0 %v1745_v45  ;;  %5035 = vst [vmem:[#allocation10_spill] sm:$0xff] %v4027_v62  ;;  %v4044_v37 = vld [vmem:[%s4914_s4 + $0x10] sm:$0xff] }
 0x1c2   :  { %v4006_v19 = vpop.f32.mrf.mxu0  ;;  %2129 = vmatprep.subr.mxu1 %v1747_v30  ;;  %2041 = vmatpush1.msra.mxu0 %v1744_v28  ;;  %5036 = vst [vmem:[#allocation13_spill] sm:$0xff] %v4044_v37 }
 0x1c3   :  { %v4013_v52 = vpop.f32.mrf.mxu1  ;;  %2130 = vmatpush1.msra.mxu1 %v1746_v34  ;;  %2042 = vmatprep.subr.mxu0 %v1729_v25  ;;  %v4061_v25 = vld [vmem:[%s4914_s4 + $0x18] sm:$0xff] }
 0x1c4   :  { %v4015_v10 = vpop.f32.mrf.mxu0  ;;  %2131 = vmatprep.subr.mxu1 %v1731_v24  ;;  %2043 = vmatpush1.msra.mxu0 %v1728_v32  ;;  %5037 = vst [vmem:[#allocation8_spill] sm:$0xff] %v4061_v25 }
 0x1c5   :  { %v4017_v60 = vpop.f32.mrf.mxu1  ;;  %2132 = vmatpush1.msra.mxu1 %v1730_v23  ;;  %2077 = vmatmul.mubr.f32.vlgmr.msra.gmra.mxu0 %v4011_v8 }
 0x1c6   :  { %v4020_v47 = vpop.f32.mrf.mxu0  ;;  %2166 = vmatmul.mubr.f32.vlgmr.msra.gmra.mxu1 %v4011_v8  ;;  %2082 = vmatprep.mubr.f32.mxu0 %v4986_v15 }
 0x1c7   :  { %v4029_v38 = vpop.f32.mrf.mxu1  ;;  %2171 = vmatprep.mubr.f32.mxu1 %v4986_v15 }
 0x1c8   :  { %v4032_v39 = vpop.f32.mrf.mxu0 }
 0x1c9   :  { %v4034_v6 = vpop.f32.mrf.mxu1  ;;  %2083 = vmatmul.mubr.f32.gmra.mxu0 %v4027_v62 }
 0x1ca   :  { %v4037_v45 = vpop.f32.mrf.mxu0  ;;  %2172 = vmatmul.mubr.f32.gmra.mxu1 %v4027_v62  ;;  %2088 = vmatprep.mubr.f32.mxu0 %v4986_v15 }
 0x1cb   :  { %v4046_v49 = vpop.f32.mrf.mxu1  ;;  %2177 = vmatprep.mubr.f32.mxu1 %v4986_v15 }
 0x1cc   :  { %v4049_v55 = vpop.f32.mrf.mxu0 }
 0x1cd   :  { %v4051_v28 = vpop.f32.mrf.mxu1  ;;  %2089 = vmatmul.mubr.f32.gmra.mxu0 %v4044_v37 }
 0x1ce   :  { %v4054_v30 = vpop.f32.mrf.mxu0  ;;  %2178 = vmatmul.mubr.f32.gmra.mxu1 %v4044_v37  ;;  %2094 = vmatprep.mubr.f32.mxu0 %v4986_v15 }
 0x1cf   :  { %v4063_v34 = vpop.f32.mrf.mxu1  ;;  %2183 = vmatprep.mubr.f32.mxu1 %v4986_v15 }
 0x1d0   :  { %v894_v24 = vpop.f32.mrf.mxu0 }
 0x1d1   :  { %v4066_v32 = vpop.f32.mrf.mxu1  ;;  %2095 = vmatmul.mubr.f32.gmra.mxu0 %v4061_v25 }
 0x1d2   :  { %v896_v23 = vpop.f32.mrf.mxu0  ;;  %2184 = vmatmul.mubr.f32.gmra.mxu1 %v4061_v25  ;;  %2254 = vmatprep.mubr.f32.mxu0 %v4986_v15  ;;  %v5038_v25 = vld [vmem:[#allocation22_spill] sm:$0xff] }
 0x1d3   :  { %v1057_v37 = vpop.f32.mrf.mxu1  ;;  %2343 = vmatprep.mubr.f32.mxu1 %v4986_v15 }
 0x1d4   :  { %v900_v62 = vpop.f32.mrf.mxu0 }
 0x1d5   :  { %v1061_v8 = vpop.f32.mrf.mxu1 }
 0x1d6   :  { %v902_v21 = vpop.f32.mrf.mxu0 }
 0x1d7   :  { %v1063_v58 = vpop.f32.mrf.mxu1 }
 0x1d8   :  { %v906_v36 = vpop.f32.mrf.mxu0 }
 0x1d9   :  { %v1067_v20 = vpop.f32.mrf.mxu1 }
 0x1da   :  { %v908_v27 = vpop.f32.mrf.mxu0 }
 0x1db   :  { %v1069_v5 = vpop.f32.mrf.mxu1  ;;  %v909_v17 = vadd.f32 %v908_v27, %v3783_v29 }
 0x1dc   :  { %v912_v4 = vpop.f32.mrf.mxu0 }
 0x1dd   :  { %v1073_v11 = vpop.f32.mrf.mxu1  ;;  %v913_v51 = vadd.f32 %v912_v4, %v5039_v7 }
 0x1de   :  { %v914_v57 = vpop.f32.mrf.mxu0 }
 0x1df   :  { %v1075_v53 = vpop.f32.mrf.mxu1  ;;  %v915_v1 = vadd.f32 %v914_v57, %v5039_v7 }
 0x1e0   :  { %v918_v14 = vpop.f32.mrf.mxu0  ;;  %v1076_v33 = vadd.f32 %v1075_v53, %v5039_v7  ;;  %v903_v53 = vadd.f32 %v902_v21, %v3788_v9  ;;  %v1941_v21 = vmax.f32 %v909_v17, 0.0  ;;  %v1056_v17 = vadd.f32 %v4066_v32, %v3797_v0 }
 0x1e1   :  { %v1079_v41 = vpop.f32.mrf.mxu1  ;;  %v919_v42 = vadd.f32 %v918_v14, %v5038_v25  ;;  %v1074_v14 = vadd.f32 %v1073_v11, %v5039_v7  ;;  %v901_v11 = vadd.f32 %v900_v62, %v3788_v9  ;;  %v1050_v32 = vadd.f32 %v4051_v28, %v3799_v13 }
 0x1e2   :  { %v920_v40 = vpop.f32.mrf.mxu0  ;;  %v1080_v15 = vadd.f32 %v1079_v41, %v5038_v25  ;;  %v907_v41 = vadd.f32 %v906_v36, %v3783_v29  ;;  %v1956_v36 = vmax.f32 %v913_v51, 0.0  ;;  %v1044_v28 = vadd.f32 %v4034_v6, %v3813_v26 }
 0x1e3   :  { %v921_v50 = vadd.f32 %v920_v40, %v5038_v25  ;;  %v1081_v12 = vpop.f32.mrf.mxu1  ;;  %v1070_v40 = vadd.f32 %v1069_v5, %v3783_v29  ;;  %v1972_v57 = vmax.f32 %v919_v42, 0.0  ;;  %v897_v5 = vadd.f32 %v896_v23, %v3797_v0 }
 0x1e4   :  { %v1082_v35 = vadd.f32 %v1081_v12, %v5038_v25  ;;  %v4079_v63 = vpop.f32.mrf.mxu0  ;;  %v1068_v12 = vadd.f32 %v1067_v20, %v3783_v29  ;;  %v1974_v25 = vmax.f32 %v1080_v15, 0.0  ;;  %v1062_v42 = vadd.f32 %v1061_v8, %v3788_v9 }
 0x1e5   :  { %5040 = vst [vmem:[#allocation11_spill] sm:$0xff] %v4079_v63  ;;  %v1973_v48 = vmax.f32 %v921_v50, 0.0  ;;  %v4083_v16 = vpop.f32.mrf.mxu1  ;;  %v1957_v63 = vmax.f32 %v915_v1, 0.0  ;;  %v1064_v50 = vadd.f32 %v1063_v58, %v3788_v9  ;;  %v895_v15 = vadd.f32 %v894_v24, %v3797_v0 }
 0x1e6   :  { %5041 = vst [vmem:[#allocation6_spill] sm:$0xff] %v4083_v16  ;;  %v1975_v22 = vmax.f32 %v1082_v35, 0.0  ;;  %v4087_v4 = vpop.f32.mrf.mxu0  ;;  %v1959_v16 = vmax.f32 %v1076_v33, 0.0  ;;  %v1958_v35 = vmax.f32 %v1074_v14, 0.0  ;;  %v1940_v1 = vmax.f32 %v907_v41, 0.0 }
 0x1e7   :  { %5042 = vst [vmem:[#allocation9_spill] sm:$0xff] %v4087_v4  ;;  %v4091_v27 = vpop.f32.mrf.mxu1  ;;  %2190 = vmatprep.subr.mxu0 %v1973_v48  ;;  %v1058_v48 = vadd.f32 %v1057_v37, %v3797_v0  ;;  %v1943_v58 = vmax.f32 %v1070_v40, 0.0  ;;  %v891_v33 = vadd.f32 %v4054_v30, %v3799_v13  ;;  %v1942_v8 = vmax.f32 %v1068_v12, 0.0 }
 0x1e8   :  { %5043 = vst [vmem:[#allocation4_spill] sm:$0xff] %v4091_v27  ;;  %2279 = vmatprep.subr.mxu1 %v1975_v22  ;;  %2191 = vmatpush1.msra.mxu0 %v1972_v57  ;;  %v1925_v22 = vmax.f32 %v903_v53, 0.0  ;;  %v1052_v37 = vadd.f32 %v4063_v34, %v3799_v13  ;;  %v885_v30 = vadd.f32 %v4037_v45, %v3813_v26  ;;  %v1909_v23 = vmax.f32 %v897_v5, 0.0 }
 0x1e9   :  { %v4097_v20 = vpop.f32.mrf.mxu0  ;;  %2280 = vmatpush1.msra.mxu1 %v1974_v25  ;;  %2192 = vmatprep.subr.mxu0 %v1957_v63  ;;  %v889_v63 = vadd.f32 %v4049_v55, %v3799_v13  ;;  %v1927_v25 = vmax.f32 %v1064_v50, 0.0  ;;  %v1926_v14 = vmax.f32 %v1062_v42, 0.0  ;;  %v883_v55 = vadd.f32 %v4032_v39, %v3813_v26 }
 0x1ea   :  { %5044 = vst [vmem:[#allocation7_spill] sm:$0xff] %v4097_v20  ;;  %v4101_v51 = vpop.f32.mrf.mxu1  ;;  %2281 = vmatprep.subr.mxu1 %v1959_v16  ;;  %2193 = vmatpush1.msra.mxu0 %v1956_v36  ;;  %v1924_v16 = vmax.f32 %v901_v11, 0.0  ;;  %v1046_v34 = vadd.f32 %v4046_v49, %v3813_v26  ;;  %v1908_v40 = vmax.f32 %v895_v15, 0.0  ;;  %v1911_v57 = vmax.f32 %v1058_v48, 0.0 }
 0x1eb   :  { %5045 = vst [vmem:[#allocation5_spill] sm:$0xff] %v4101_v51  ;;  %v4107_v62 = vpop.f32.mrf.mxu0  ;;  %2282 = vmatpush1.msra.mxu1 %v1958_v35  ;;  %2194 = vmatprep.subr.mxu0 %v1941_v21  ;;  %v879_v45 = vadd.f32 %v4020_v47, %v3823_v3  ;;  %v1893_v12 = vmax.f32 %v891_v33, 0.0  ;;  %v1910_v11 = vmax.f32 %v1056_v17, 0.0  ;;  %v877_v39 = vadd.f32 %v4015_v10, %v3823_v3 }
 0x1ec   :  { %5046 = vst [vmem:[#allocation2_spill] sm:$0xff] %v4107_v62  ;;  %v4113_v24 = vpop.f32.mrf.mxu1  ;;  %2283 = vmatprep.subr.mxu1 %v1943_v58  ;;  %2195 = vmatpush1.msra.mxu0 %v1940_v1  ;;  %v1040_v49 = vadd.f32 %v4029_v38, %v3823_v3  ;;  %v1892_v36 = vmax.f32 %v889_v63, 0.0  ;;  %v1895_v5 = vmax.f32 %v1052_v37, 0.0  ;;  %v873_v47 = vadd.f32 %v4006_v19, %v3844_v31 }
 0x1ed   :  { %5047 = vst [vmem:[#allocation3_spill] sm:$0xff] %v4113_v24  ;;  %v4119_v41 = vpop.f32.mrf.mxu0  ;;  %2284 = vmatpush1.msra.mxu1 %v1942_v8  ;;  %2196 = vmatprep.subr.mxu0 %v1925_v22  ;;  %v1038_v6 = vadd.f32 %v4017_v60, %v3823_v3  ;;  %v1877_v21 = vmax.f32 %v885_v30, 0.0  ;;  %v1894_v35 = vmax.f32 %v1050_v32, 0.0  ;;  %v871_v10 = vadd.f32 %v4002_v56, %v3844_v31  ;;  %v5058_v32 = vld [vmem:[#allocation12_spill] sm:$0xff] }
 0x1ee   :  { %5048 = vst [vmem:[#allocation23_spill] sm:$0xff] %v4119_v41  ;;  %v4125_v53 = vpop.f32.mrf.mxu1  ;;  %2285 = vmatprep.subr.mxu1 %v1927_v25  ;;  %2197 = vmatpush1.msra.mxu0 %v1924_v16  ;;  %v1034_v38 = vadd.f32 %v4013_v52, %v3844_v31  ;;  %v1876_v48 = vmax.f32 %v883_v55, 0.0  ;;  %v1879_v1 = vmax.f32 %v1046_v34, 0.0  ;;  %v867_v19 = vadd.f32 %v3994_v61, %v3852_v43 }
 0x1ef   :  { %5049 = vst [vmem:[#allocation44_spill] sm:$0xff] %v4125_v53  ;;  %v4131_v50 = vpop.f32.mrf.mxu0  ;;  %2286 = vmatpush1.msra.mxu1 %v1926_v14  ;;  %2198 = vmatprep.subr.mxu0 %v1909_v23  ;;  %v1032_v60 = vadd.f32 %v4004_v18, %v3844_v31  ;;  %v1861_v33 = vmax.f32 %v879_v45, 0.0  ;;  %v1878_v17 = vmax.f32 %v1044_v28, 0.0  ;;  %v865_v56 = vadd.f32 %v3984_v46, %v3852_v43  ;;  %v5057_v46 = vld [vmem:[#allocation16_spill] sm:$0xff] }
 0x1f0   :  { %5050 = vst [vmem:[#allocation45_spill] sm:$0xff] %v4131_v50  ;;  %v4137_v42 = vpop.f32.mrf.mxu1  ;;  %2287 = vmatprep.subr.mxu1 %v1911_v57  ;;  %2199 = vmatpush1.msra.mxu0 %v1908_v40  ;;  %v1028_v52 = vadd.f32 %v3998_v44, %v3852_v43  ;;  %v1860_v8 = vmax.f32 %v877_v39, 0.0  ;;  %v1863_v63 = vmax.f32 %v1040_v49, 0.0  ;;  %v861_v61 = vadd.f32 %v3970_v2, %v3884_v54  ;;  %v5060_v2 = vld [vmem:[#allocation35_spill] sm:$0xff]  ;;  %v5064_v39 = vld [vmem:[#allocation42_spill] sm:$0xff] }
 0x1f1   :  { %5051 = vst [vmem:[#allocation46_spill] sm:$0xff] %v4137_v42  ;;  %v4143_v15 = vpop.f32.mrf.mxu0  ;;  %2288 = vmatpush1.msra.mxu1 %v1910_v11  ;;  %2200 = vmatprep.subr.mxu0 %v1893_v12  ;;  %v1026_v18 = vadd.f32 %v3990_v59, %v3852_v43  ;;  %v1845_v16 = vmax.f32 %v873_v47, 0.0  ;;  %v1862_v25 = vmax.f32 %v1038_v6, 0.0  ;;  %v859_v44 = vadd.f32 %v5057_v46, %v3884_v54  ;;  %v5061_v59 = vld [vmem:[#allocation18_spill] sm:$0xff]  ;;  %v5062_v57 = vld [vmem:[#allocation19_spill] sm:$0xff] }
 0x1f2   :  { %5052 = vst [vmem:[#allocation47_spill] sm:$0xff] %v4143_v15  ;;  %v4149_v58 = vpop.f32.mrf.mxu1  ;;  %2289 = vmatprep.subr.mxu1 %v1895_v5  ;;  %2201 = vmatpush1.msra.mxu0 %v1892_v36  ;;  %v1022_v23 = vadd.f32 %v5058_v32, %v3884_v54  ;;  %v1844_v14 = vmax.f32 %v871_v10, 0.0  ;;  %v1847_v55 = vmax.f32 %v1034_v38, 0.0  ;;  %v855_v40 = vadd.f32 %v5061_v59, %v5060_v2  ;;  %v5065_v36 = vld [vmem:[#allocation20_spill] sm:$0xff]  ;;  %v5068_v10 = vld [vmem:[#allocation39_spill] sm:$0xff]  ;;  %v5075_v32 = vld [vmem:[#allocation34_spill] sm:$0xff] }
 0x1f3   :  { %5053 = vst [vmem:[#allocation48_spill] sm:$0xff] %v4149_v58  ;;  %v4155_v22 = vpop.f32.mrf.mxu0  ;;  %2290 = vmatpush1.msra.mxu1 %v1894_v35  ;;  %2202 = vmatprep.subr.mxu0 %v1877_v21  ;;  %v1020_v45 = vadd.f32 %v5062_v57, %v3884_v54  ;;  %v1829_v28 = vmax.f32 %v867_v19, 0.0  ;;  %v1846_v12 = vmax.f32 %v1032_v60, 0.0  ;;  %v853_v49 = vadd.f32 %v5064_v39, %v5060_v2  ;;  %v5067_v35 = vld [vmem:[#allocation41_spill] sm:$0xff]  ;;  %v5074_v46 = vld [vmem:[#allocation43_spill] sm:$0xff] }
 0x1f4   :  { %5054 = vst [vmem:[#allocation49_spill] sm:$0xff] %v4155_v22  ;;  %v4161_v37 = vpop.f32.mrf.mxu1  ;;  %2291 = vmatprep.subr.mxu1 %v1879_v1  ;;  %2203 = vmatpush1.msra.mxu0 %v1876_v48  ;;  %v1016_v5 = vadd.f32 %v5065_v36, %v5060_v2  ;;  %v1828_v47 = vmax.f32 %v865_v56, 0.0  ;;  %v1831_v6 = vmax.f32 %v1028_v52, 0.0  ;;  %v849_v38 = vadd.f32 %v5068_v10, %v5067_v35  ;;  %v5069_v48 = vld [vmem:[#allocation21_spill] sm:$0xff]  ;;  %v5072_v52 = vld [vmem:[#allocation40_spill] sm:$0xff]  ;;  %v5081_v10 = vld [vmem:[#allocation30_spill] sm:$0xff] }
 0x1f5   :  { %5055 = vst [vmem:[#allocation50_spill] sm:$0xff] %v4161_v37  ;;  %v4167_v30 = vpop.f32.mrf.mxu0  ;;  %2292 = vmatpush1.msra.mxu1 %v1878_v17  ;;  %2204 = vmatprep.subr.mxu0 %v1861_v33  ;;  %v1014_v1 = vadd.f32 %v5069_v48, %v5060_v2  ;;  %v1813_v19 = vmax.f32 %v861_v61, 0.0  ;;  %v1830_v60 = vmax.f32 %v1026_v18, 0.0  ;;  %v5071_v17 = vld [vmem:[#allocation37_spill] sm:$0xff]  ;;  %v843_v61 = vadd.f32 %v5075_v32, %v5074_v46  ;;  %v5076_v18 = vld [vmem:[#allocation38_spill] sm:$0xff] }
 0x1f6   :  { %5056 = vst [vmem:[#allocation51_spill] sm:$0xff] %v4167_v30  ;;  %v4173_v34 = vpop.f32.mrf.mxu1  ;;  %2293 = vmatprep.subr.mxu1 %v1863_v63  ;;  %2205 = vmatpush1.msra.mxu0 %v1860_v8  ;;  %v847_v56 = vadd.f32 %v5071_v17, %v5067_v35  ;;  %v1010_v8 = vadd.f32 %v5072_v52, %v5067_v35  ;;  %v1812_v63 = vmax.f32 %v859_v44, 0.0  ;;  %v1814_v59 = vmax.f32 %v1020_v45, 0.0  ;;  %v5082_v45 = vld [vmem:[#allocation33_spill] sm:$0xff]  ;;  %v5083_v52 = vld [vmem:[#allocation28_spill] sm:$0xff] }
 0x1f7   :  { %5059 = vst [vmem:[#allocation16_spill] sm:$0xff] %v4173_v34  ;;  %v4179_v11 = vpop.f32.mrf.mxu0  ;;  %2294 = vmatpush1.msra.mxu1 %v1862_v25  ;;  %2206 = vmatprep.subr.mxu0 %v1845_v16  ;;  %v1815_v16 = vmax.f32 %v1022_v23, 0.0  ;;  %v5078_v23 = vld [vmem:[#allocation36_spill] sm:$0xff]  ;;  %v1796_v39 = vmax.f32 %v853_v49, 0.0  ;;  %v1799_v36 = vmax.f32 %v1016_v5, 0.0  ;;  %v1002_v48 = vadd.f32 %v5082_v45, %v5074_v46  ;;  %v5084_v5 = vld [vmem:[#allocation31_spill] sm:$0xff] }
 0x1f8   :  { %5063 = vst [vmem:[#allocation12_spill] sm:$0xff] %v4179_v11  ;;  %v4185_v21 = vpop.f32.mrf.mxu1  ;;  %2295 = vmatprep.subr.mxu1 %v1847_v55  ;;  %2207 = vmatpush1.msra.mxu0 %v1844_v14  ;;  %v1008_v14 = vadd.f32 %v5076_v18, %v5067_v35  ;;  %v1797_v55 = vmax.f32 %v855_v40, 0.0 }
 0x1f9   :  { %5066 = vst [vmem:[#allocation18_spill] sm:$0xff] %v4185_v21  ;;  %v4191_v33 = vpop.f32.mrf.mxu0  ;;  %2296 = vmatpush1.msra.mxu1 %v1846_v12  ;;  %2208 = vmatprep.subr.mxu0 %v1829_v28  ;;  %v5077_v28 = vld [vmem:[#allocation32_spill] sm:$0xff]  ;;  %v1004_v12 = vadd.f32 %v5078_v23, %v5074_v46  ;;  %v5086_v23 = vld [vmem:[#allocation26_spill] sm:$0xff] }
 0x1fa   :  { %5070 = vst [vmem:[#allocation19_spill] sm:$0xff] %v4191_v33  ;;  %v4197_v25 = vpop.f32.mrf.mxu1  ;;  %2297 = vmatprep.subr.mxu1 %v1831_v6  ;;  %2209 = vmatpush1.msra.mxu0 %v1828_v47  ;;  %v841_v44 = vadd.f32 %v5077_v28, %v5074_v46  ;;  %v5080_v6 = vld [vmem:[#allocation14_spill] sm:$0xff]  ;;  %v5085_v28 = vld [vmem:[#allocation17_spill] sm:$0xff] }
 0x1fb   :  { %5073 = vst [vmem:[#allocation42_spill] sm:$0xff] %v4197_v25  ;;  %v4203_v57 = vpop.f32.mrf.mxu0  ;;  %2298 = vmatpush1.msra.mxu1 %v1830_v60  ;;  %2210 = vmatprep.subr.mxu0 %v1813_v19  ;;  %v837_v40 = vadd.f32 %v5081_v10, %v5080_v6  ;;  %v1781_v60 = vmax.f32 %v849_v38, 0.0  ;;  %v1798_v19 = vmax.f32 %v1014_v1, 0.0  ;;  %v835_v49 = vadd.f32 %v5083_v52, %v5080_v6  ;;  %v5087_v1 = vld [vmem:[#allocation29_spill] sm:$0xff]  ;;  %v5088_v52 = vld [vmem:[#allocation24_spill] sm:$0xff]  ;;  %v5096_v46 = vld [vmem:[#allocation22_spill] sm:$0xff] }
 0x1fc   :  { %v4209_v47 = vpop.f32.mrf.mxu1  ;;  %2299 = vmatprep.subr.mxu1 %v1815_v16  ;;  %2211 = vmatpush1.msra.mxu0 %v1812_v63  ;;  %v998_v32 = vadd.f32 %v5084_v5, %v5080_v6  ;;  %v1780_v16 = vmax.f32 %v847_v56, 0.0  ;;  %v1783_v63 = vmax.f32 %v1010_v8, 0.0  ;;  %v831_v38 = vadd.f32 %v5086_v23, %v5085_v28  ;;  %v5089_v8 = vld [vmem:[#allocation27_spill] sm:$0xff]  ;;  %v5090_v23 = vld [vmem:[#allocation25_spill] sm:$0xff] }
 0x1fd   :  { %5079 = vst [vmem:[#allocation20_spill] sm:$0xff] %v4209_v47  ;;  %v4215_v17 = vpop.f32.mrf.mxu0  ;;  %2300 = vmatpush1.msra.mxu1 %v1814_v59  ;;  %2212 = vmatprep.subr.mxu0 %v1797_v55  ;;  %v996_v10 = vadd.f32 %v5087_v1, %v5080_v6  ;;  %v1765_v59 = vmax.f32 %v843_v61, 0.0  ;;  %v1782_v55 = vmax.f32 %v1008_v14, 0.0  ;;  %v829_v56 = vadd.f32 %v5088_v52, %v5085_v28 }
 0x1fe   :  { %v4221_v18 = vpop.f32.mrf.mxu1  ;;  %2301 = vmatprep.subr.mxu1 %v1799_v36  ;;  %2213 = vmatpush1.msra.mxu0 %v1796_v39  ;;  %v992_v5 = vadd.f32 %v5089_v8, %v5085_v28  ;;  %v1764_v36 = vmax.f32 %v841_v44, 0.0  ;;  %v1767_v39 = vmax.f32 %v1004_v12, 0.0  ;;  %v990_v61 = vadd.f32 %v5090_v23, %v5085_v28 }
 0x1ff   :  { %v4227_v45 = vpop.f32.mrf.mxu0  ;;  %2302 = vmatpush1.msra.mxu1 %v1798_v19  ;;  %2214 = vmatprep.subr.mxu0 %v1781_v60  ;;  %v1749_v14 = vmax.f32 %v837_v40, 0.0  ;;  %v1766_v1 = vmax.f32 %v1002_v48, 0.0  ;;  %v1748_v60 = vmax.f32 %v835_v49, 0.0  ;;  %v1751_v19 = vmax.f32 %v998_v32, 0.0 }
 0x200   :  { %v4233_v27 = vpop.f32.mrf.mxu1  ;;  %2303 = vmatprep.subr.mxu1 %v1783_v63  ;;  %2215 = vmatpush1.msra.mxu0 %v1780_v16  ;;  %v1733_v44 = vmax.f32 %v831_v38, 0.0  ;;  %v1750_v12 = vmax.f32 %v996_v10, 0.0  ;;  %v1732_v16 = vmax.f32 %v829_v56, 0.0  ;;  %v1735_v63 = vmax.f32 %v992_v5, 0.0  ;;  %v5091_v38 = vld [vmem:[#allocation15_spill] sm:$0xff] }
 0x201   :  { %v4237_v51 = vpop.f32.mrf.mxu0  ;;  %2304 = vmatpush1.msra.mxu1 %v1782_v55  ;;  %2216 = vmatprep.subr.mxu0 %v1765_v59  ;;  %v1734_v48 = vmax.f32 %v990_v61, 0.0  ;;  %v5092_v55 = vmov 0.0  }
 0x202   :  { %v4239_v52 = vpop.f32.mrf.mxu1  ;;  %2305 = vmatprep.subr.mxu1 %v1767_v39  ;;  %2217 = vmatpush1.msra.mxu0 %v1764_v36  ;;  %v5093_v39 = vld [vmem:[#allocation10_spill] sm:$0xff] }
 0x203   :  { %v4241_v8 = vpop.f32.mrf.mxu0  ;;  %2306 = vmatpush1.msra.mxu1 %v1766_v1  ;;  %2218 = vmatprep.subr.mxu0 %v1749_v14 }
 0x204   :  { %v4243_v40 = vpop.f32.mrf.mxu1  ;;  %2307 = vmatprep.subr.mxu1 %v1751_v19  ;;  %2219 = vmatpush1.msra.mxu0 %v1748_v60  ;;  %v5094_v60 = vld [vmem:[#allocation13_spill] sm:$0xff] }
 0x205   :  { %v4245_v59 = vpop.f32.mrf.mxu0  ;;  %2308 = vmatpush1.msra.mxu1 %v1750_v12  ;;  %2220 = vmatprep.subr.mxu0 %v1733_v44 }
 0x206   :  { %v4247_v49 = vpop.f32.mrf.mxu1  ;;  %2309 = vmatprep.subr.mxu1 %v1735_v63  ;;  %2221 = vmatpush1.msra.mxu0 %v1732_v16  ;;  %v5095_v63 = vld [vmem:[#allocation8_spill] sm:$0xff] }
 0x207   :  { %v4249_v32 = vpop.f32.mrf.mxu0  ;;  %2310 = vmatpush1.msra.mxu1 %v1734_v48  ;;  %2255 = vmatmul.mubr.f32.vlgmr.msra.gmra.mxu0 %v5091_v38 }
 0x208   :  { %v4252_v10 = vpop.f32.mrf.mxu1  ;;  %2344 = vmatmul.mubr.f32.vlgmr.msra.gmra.mxu1 %v5091_v38  ;;  %2260 = vmatprep.mubr.f32.mxu0 %v5092_v55 }
 0x209   :  { %v4256_v56 = vpop.f32.mrf.mxu0  ;;  %2349 = vmatprep.mubr.f32.mxu1 %v5092_v55 }
 0x20a   :  { %v4259_v5 = vpop.f32.mrf.mxu1 }
 0x20b   :  { %v4261_v36 = vpop.f32.mrf.mxu0  ;;  %2261 = vmatmul.mubr.f32.gmra.mxu0 %v5093_v39 }
 0x20c   :  { %v4264_v23 = vpop.f32.mrf.mxu1  ;;  %2350 = vmatmul.mubr.f32.gmra.mxu1 %v5093_v39  ;;  %2266 = vmatprep.mubr.f32.mxu0 %v5092_v55 }
 0x20d   :  { %v4268_v61 = vpop.f32.mrf.mxu0  ;;  %2355 = vmatprep.mubr.f32.mxu1 %v5092_v55 }
 0x20e   :  { %v4271_v14 = vpop.f32.mrf.mxu1 }
 0x20f   :  { %v4273_v1 = vpop.f32.mrf.mxu0  ;;  %2267 = vmatmul.mubr.f32.gmra.mxu0 %v5094_v60 }
 0x210   :  { %v4276_v19 = vpop.f32.mrf.mxu1  ;;  %2356 = vmatmul.mubr.f32.gmra.mxu1 %v5094_v60  ;;  %2272 = vmatprep.mubr.f32.mxu0 %v5092_v55 }
 0x211   :  { %v1216_v44 = vpop.f32.mrf.mxu0  ;;  %2361 = vmatprep.mubr.f32.mxu1 %v5092_v55 }
 0x212   :  { %v4281_v12 = vpop.f32.mrf.mxu1 }
 0x213   :  { %v1218_v16 = vpop.f32.mrf.mxu0  ;;  %2273 = vmatmul.mubr.f32.gmra.mxu0 %v5095_v63 }
 0x214   :  { %v1379_v48 = vpop.f32.mrf.mxu1  ;;  %2362 = vmatmul.mubr.f32.gmra.mxu1 %v5095_v63  ;;  %2432 = vmatprep.mubr.f32.mxu0 %v5092_v55 }
 0x215   :  { %v1222_v38 = vpop.f32.mrf.mxu0  ;;  %2521 = vmatprep.mubr.f32.mxu1 %v5092_v55 }
 0x216   :  { %v1383_v39 = vpop.f32.mrf.mxu1 }
 0x217   :  { %v1224_v60 = vpop.f32.mrf.mxu0 }
 0x218   :  { %v1385_v4 = vpop.f32.mrf.mxu1 }
 0x219   :  { %v1228_v28 = vpop.f32.mrf.mxu0 }
 0x21a   :  { %v1389_v24 = vpop.f32.mrf.mxu1 }
 0x21b   :  { %v1230_v20 = vpop.f32.mrf.mxu0 }
 0x21c   :  { %v1391_v53 = vpop.f32.mrf.mxu1  ;;  %v1231_v11 = vadd.f32 %v1230_v20, %v3783_v29 }
 0x21d   :  { %v1234_v62 = vpop.f32.mrf.mxu0 }
 0x21e   :  { %v1395_v6 = vpop.f32.mrf.mxu1  ;;  %v1235_v35 = vadd.f32 %v1234_v62, %v5039_v7 }
 0x21f   :  { %v1236_v42 = vpop.f32.mrf.mxu0 }
 0x220   :  { %v1397_v41 = vpop.f32.mrf.mxu1  ;;  %v1237_v15 = vadd.f32 %v1236_v42, %v5039_v7  ;;  %v1392_v42 = vadd.f32 %v1391_v53, %v3783_v29 }
 0x221   :  { %v1240_v58 = vpop.f32.mrf.mxu0  ;;  %v1398_v21 = vadd.f32 %v1397_v41, %v5039_v7  ;;  %v1225_v41 = vadd.f32 %v1224_v60, %v3788_v9  ;;  %v1384_v60 = vadd.f32 %v1383_v39, %v3788_v9 }
 0x222   :  { %v1401_v50 = vpop.f32.mrf.mxu1  ;;  %v1241_v63 = vadd.f32 %v1240_v58, %v5096_v46  ;;  %v1396_v58 = vadd.f32 %v1395_v6, %v5039_v7  ;;  %v1386_v6 = vadd.f32 %v1385_v4, %v3788_v9  ;;  %v1380_v4 = vadd.f32 %v1379_v48, %v3797_v0 }
 0x223   :  { %v1242_v37 = vpop.f32.mrf.mxu0  ;;  %v1402_v55 = vadd.f32 %v1401_v50, %v5096_v46  ;;  %v1229_v50 = vadd.f32 %v1228_v28, %v3783_v29  ;;  %v1960_v28 = vmax.f32 %v1235_v35, 0.0 }
 0x224   :  { %v1243_v34 = vadd.f32 %v1242_v37, %v5096_v46  ;;  %v1403_v22 = vpop.f32.mrf.mxu1  ;;  %v1976_v37 = vmax.f32 %v1241_v63, 0.0  ;;  %v1931_v48 = vmax.f32 %v1386_v6, 0.0 }
 0x225   :  { %v1404_v30 = vadd.f32 %v1403_v22, %v5096_v46  ;;  %v4294_v25 = vpop.f32.mrf.mxu0  ;;  %v1390_v22 = vadd.f32 %v1389_v24, %v3783_v29  ;;  %v1978_v46 = vmax.f32 %v1402_v55, 0.0  ;;  %v1945_v24 = vmax.f32 %v1231_v11, 0.0 }
 0x226   :  { %5097 = vst [vmem:[#allocation39_spill] sm:$0xff] %v4294_v25  ;;  %v1977_v2 = vmax.f32 %v1243_v34, 0.0  ;;  %v4298_v47 = vpop.f32.mrf.mxu1  ;;  %v1961_v25 = vmax.f32 %v1237_v15, 0.0  ;;  %v1223_v34 = vadd.f32 %v1222_v38, %v3788_v9  ;;  %v1962_v15 = vmax.f32 %v1396_v58, 0.0 }
 0x227   :  { %5098 = vst [vmem:[#allocation21_spill] sm:$0xff] %v4298_v47  ;;  %v1979_v33 = vmax.f32 %v1404_v30, 0.0  ;;  %v4302_v62 = vpop.f32.mrf.mxu0  ;;  %v1963_v47 = vmax.f32 %v1398_v21, 0.0  ;;  %v1219_v30 = vadd.f32 %v1218_v16, %v3797_v0  ;;  %v1944_v35 = vmax.f32 %v1229_v50, 0.0 }
 0x228   :  { %5099 = vst [vmem:[#allocation37_spill] sm:$0xff] %v4302_v62  ;;  %v4306_v20 = vpop.f32.mrf.mxu1  ;;  %2368 = vmatprep.subr.mxu0 %v1977_v2  ;;  %v1217_v2 = vadd.f32 %v1216_v44, %v3797_v0  ;;  %v1947_v21 = vmax.f32 %v1392_v42, 0.0  ;;  %v1213_v16 = vadd.f32 %v4273_v1, %v3799_v13  ;;  %v1378_v11 = vadd.f32 %v4281_v12, %v3797_v0 }
 0x229   :  { %5100 = vst [vmem:[#allocation40_spill] sm:$0xff] %v4306_v20  ;;  %2457 = vmatprep.subr.mxu1 %v1979_v33  ;;  %v4310_v53 = vpop.f32.mrf.mxu0  ;;  %2369 = vmatpush1.msra.mxu0 %v1976_v37  ;;  %v1929_v38 = vmax.f32 %v1225_v41, 0.0  ;;  %v1946_v39 = vmax.f32 %v1390_v22, 0.0  ;;  %v1928_v44 = vmax.f32 %v1223_v34, 0.0  ;;  %v1207_v1 = vadd.f32 %v4261_v36, %v3813_v26 }
 0x22a   :  { %5101 = vst [vmem:[#allocation34_spill] sm:$0xff] %v4310_v53  ;;  %v4314_v55 = vpop.f32.mrf.mxu1  ;;  %2458 = vmatpush1.msra.mxu1 %v1978_v46  ;;  %2370 = vmatprep.subr.mxu0 %v1961_v25  ;;  %v1211_v25 = vadd.f32 %v4268_v61, %v3799_v13  ;;  %v1372_v12 = vadd.f32 %v4271_v14, %v3799_v13  ;;  %v1913_v58 = vmax.f32 %v1219_v30, 0.0  ;;  %v1930_v50 = vmax.f32 %v1384_v60, 0.0 }
 0x22b   :  { %5102 = vst [vmem:[#allocation38_spill] sm:$0xff] %v4314_v55  ;;  %2459 = vmatprep.subr.mxu1 %v1963_v47  ;;  %v4318_v33 = vpop.f32.mrf.mxu0  ;;  %2371 = vmatpush1.msra.mxu0 %v1960_v28  ;;  %v1374_v47 = vadd.f32 %v4276_v19, %v3799_v13  ;;  %v1205_v61 = vadd.f32 %v4256_v56, %v3813_v26  ;;  %v1912_v37 = vmax.f32 %v1217_v2, 0.0  ;;  %v1915_v41 = vmax.f32 %v1380_v4, 0.0 }
 0x22c   :  { %5103 = vst [vmem:[#allocation32_spill] sm:$0xff] %v4318_v33  ;;  %v4324_v46 = vpop.f32.mrf.mxu1  ;;  %2460 = vmatpush1.msra.mxu1 %v1962_v15  ;;  %2372 = vmatprep.subr.mxu0 %v1945_v24  ;;  %v1368_v19 = vadd.f32 %v4264_v23, %v3813_v26  ;;  %v1201_v36 = vadd.f32 %v4249_v32, %v3823_v3  ;;  %v1897_v34 = vmax.f32 %v1213_v16, 0.0  ;;  %v1914_v6 = vmax.f32 %v1378_v11, 0.0 }
 0x22d   :  { %5104 = vst [vmem:[#allocation36_spill] sm:$0xff] %v4324_v46  ;;  %2461 = vmatprep.subr.mxu1 %v1947_v21  ;;  %v4330_v63 = vpop.f32.mrf.mxu0  ;;  %2373 = vmatpush1.msra.mxu0 %v1944_v35  ;;  %v1366_v14 = vadd.f32 %v4259_v5, %v3813_v26  ;;  %v1199_v56 = vadd.f32 %v4245_v59, %v3823_v3  ;;  %v1896_v30 = vmax.f32 %v1211_v25, 0.0  ;;  %v1899_v60 = vmax.f32 %v1374_v47, 0.0 }
 0x22e   :  { %5105 = vst [vmem:[#allocation30_spill] sm:$0xff] %v4330_v63  ;;  %v4336_v42 = vpop.f32.mrf.mxu1  ;;  %2462 = vmatpush1.msra.mxu1 %v1946_v39  ;;  %2374 = vmatprep.subr.mxu0 %v1929_v38  ;;  %v1362_v23 = vadd.f32 %v4252_v10, %v3823_v3  ;;  %v1195_v32 = vadd.f32 %v4241_v8, %v3844_v31  ;;  %v1881_v15 = vmax.f32 %v1207_v1, 0.0  ;;  %v1898_v2 = vmax.f32 %v1372_v12, 0.0 }
 0x22f   :  { %5106 = vst [vmem:[#allocation33_spill] sm:$0xff] %v4336_v42  ;;  %2463 = vmatprep.subr.mxu1 %v1931_v48  ;;  %v4342_v22 = vpop.f32.mrf.mxu0  ;;  %2375 = vmatpush1.msra.mxu0 %v1928_v44  ;;  %v1360_v5 = vadd.f32 %v4247_v49, %v3823_v3  ;;  %v1193_v59 = vadd.f32 %v4237_v51, %v3844_v31  ;;  %v1880_v35 = vmax.f32 %v1205_v61, 0.0  ;;  %v1883_v21 = vmax.f32 %v1368_v19, 0.0 }
 0x230   :  { %5107 = vst [vmem:[#allocation28_spill] sm:$0xff] %v4342_v22  ;;  %v4348_v28 = vpop.f32.mrf.mxu1  ;;  %2464 = vmatpush1.msra.mxu1 %v1930_v50  ;;  %2376 = vmatprep.subr.mxu0 %v1913_v58  ;;  %v1356_v10 = vadd.f32 %v4243_v40, %v3844_v31  ;;  %v1189_v8 = vadd.f32 %v4227_v45, %v3852_v43  ;;  %v1865_v11 = vmax.f32 %v1201_v36, 0.0  ;;  %v1882_v38 = vmax.f32 %v1366_v14, 0.0  ;;  %v5116_v58 = vld [vmem:[#allocation20_spill] sm:$0xff]  ;;  %v5120_v36 = vld [vmem:[#allocation42_spill] sm:$0xff] }
 0x231   :  { %5108 = vst [vmem:[#allocation31_spill] sm:$0xff] %v4348_v28  ;;  %2465 = vmatprep.subr.mxu1 %v1915_v41  ;;  %v4354_v24 = vpop.f32.mrf.mxu0  ;;  %2377 = vmatpush1.msra.mxu0 %v1912_v37  ;;  %v1354_v49 = vadd.f32 %v4239_v52, %v3844_v31  ;;  %v1187_v51 = vadd.f32 %v4215_v17, %v3852_v43  ;;  %v1864_v25 = vmax.f32 %v1199_v56, 0.0  ;;  %v1867_v47 = vmax.f32 %v1362_v23, 0.0  ;;  %v5122_v23 = vld [vmem:[#allocation51_spill] sm:$0xff] }
 0x232   :  { %5109 = vst [vmem:[#allocation26_spill] sm:$0xff] %v4354_v24  ;;  %v4360_v4 = vpop.f32.mrf.mxu1  ;;  %2466 = vmatpush1.msra.mxu1 %v1914_v6  ;;  %2378 = vmatprep.subr.mxu0 %v1897_v34  ;;  %v1350_v40 = vadd.f32 %v4233_v27, %v3852_v43  ;;  %v1183_v45 = vadd.f32 %v4203_v57, %v3884_v54  ;;  %v1849_v48 = vmax.f32 %v1195_v32, 0.0  ;;  %v1866_v1 = vmax.f32 %v1360_v5, 0.0  ;;  %v5115_v27 = vld [vmem:[#allocation19_spill] sm:$0xff] }
 0x233   :  { %5110 = vst [vmem:[#allocation29_spill] sm:$0xff] %v4360_v4  ;;  %2467 = vmatprep.subr.mxu1 %v1899_v60  ;;  %v4366_v16 = vpop.f32.mrf.mxu0  ;;  %2379 = vmatpush1.msra.mxu0 %v1896_v30  ;;  %v1348_v52 = vadd.f32 %v4221_v18, %v3852_v43  ;;  %v1181_v17 = vadd.f32 %v5115_v27, %v3884_v54  ;;  %v1848_v61 = vmax.f32 %v1193_v59, 0.0  ;;  %v1851_v19 = vmax.f32 %v1356_v10, 0.0  ;;  %v5118_v57 = vld [vmem:[#allocation35_spill] sm:$0xff]  ;;  %v5119_v18 = vld [vmem:[#allocation12_spill] sm:$0xff]  ;;  %v5123_v60 = vld [vmem:[#allocation18_spill] sm:$0xff] }
 0x234   :  { %5111 = vst [vmem:[#allocation24_spill] sm:$0xff] %v4366_v16  ;;  %v4372_v39 = vpop.f32.mrf.mxu1  ;;  %2468 = vmatpush1.msra.mxu1 %v1898_v2  ;;  %2380 = vmatprep.subr.mxu0 %v1881_v15  ;;  %v1344_v50 = vadd.f32 %v5116_v58, %v3884_v54  ;;  %v1177_v41 = vadd.f32 %v5119_v18, %v5118_v57  ;;  %v1833_v34 = vmax.f32 %v1189_v8, 0.0  ;;  %v1850_v6 = vmax.f32 %v1354_v49, 0.0  ;;  %v5125_v59 = vld [vmem:[#allocation41_spill] sm:$0xff]  ;;  %v5131_v58 = vld [vmem:[#allocation43_spill] sm:$0xff] }
 0x235   :  { %5112 = vst [vmem:[#allocation27_spill] sm:$0xff] %v4372_v39  ;;  %2469 = vmatprep.subr.mxu1 %v1883_v21  ;;  %v4378_v44 = vpop.f32.mrf.mxu0  ;;  %2381 = vmatpush1.msra.mxu0 %v1880_v35  ;;  %v1342_v14 = vadd.f32 %v5120_v36, %v3884_v54  ;;  %v1175_v30 = vadd.f32 %v5122_v23, %v5118_v57  ;;  %v1832_v5 = vmax.f32 %v1187_v51, 0.0  ;;  %v1835_v15 = vmax.f32 %v1350_v40, 0.0  ;;  %v5126_v10 = vld [vmem:[#allocation49_spill] sm:$0xff]  ;;  %v5127_v21 = vld [vmem:[#allocation16_spill] sm:$0xff]  ;;  %v5130_v40 = vld [vmem:[#allocation50_spill] sm:$0xff] }
 0x236   :  { %5113 = vst [vmem:[#allocation25_spill] sm:$0xff] %v4378_v44  ;;  %v4384_v12 = vpop.f32.mrf.mxu1  ;;  %2470 = vmatpush1.msra.mxu1 %v1882_v38  ;;  %2382 = vmatprep.subr.mxu0 %v1865_v11  ;;  %v1338_v32 = vadd.f32 %v5123_v60, %v5118_v57  ;;  %v1171_v35 = vadd.f32 %v5126_v10, %v5125_v59  ;;  %v1817_v49 = vmax.f32 %v1183_v45, 0.0  ;;  %v1834_v11 = vmax.f32 %v1348_v52, 0.0  ;;  %v5133_v52 = vld [vmem:[#allocation48_spill] sm:$0xff]  ;;  %v5137_v10 = vld [vmem:[#allocation14_spill] sm:$0xff] }
 0x237   :  { %5114 = vst [vmem:[#allocation15_spill] sm:$0xff] %v4384_v12  ;;  %2471 = vmatprep.subr.mxu1 %v1867_v47  ;;  %v4390_v37 = vpop.f32.mrf.mxu0  ;;  %2383 = vmatpush1.msra.mxu0 %v1864_v25  ;;  %v1336_v8 = vadd.f32 %v5127_v21, %v5118_v57  ;;  %v5129_v25 = vld [vmem:[#allocation47_spill] sm:$0xff]  ;;  %v1332_v47 = vadd.f32 %v5130_v40, %v5125_v59  ;;  %v1801_v18 = vmax.f32 %v1177_v41, 0.0  ;;  %v1818_v36 = vmax.f32 %v1342_v14, 0.0  ;;  %v5138_v21 = vld [vmem:[#allocation2_spill] sm:$0xff]  ;;  %v5139_v14 = vld [vmem:[#allocation44_spill] sm:$0xff] }
 0x238   :  { %5117 = vst [vmem:[#allocation10_spill] sm:$0xff] %v4390_v37  ;;  %v4396_v56 = vpop.f32.mrf.mxu1  ;;  %2472 = vmatpush1.msra.mxu1 %v1866_v1  ;;  %2384 = vmatprep.subr.mxu0 %v1849_v48  ;;  %v1169_v51 = vadd.f32 %v5129_v25, %v5125_v59  ;;  %v1816_v48 = vmax.f32 %v1181_v17, 0.0  ;;  %v1819_v1 = vmax.f32 %v1344_v50, 0.0  ;;  %v5136_v50 = vld [vmem:[#allocation46_spill] sm:$0xff]  ;;  %v1800_v60 = vmax.f32 %v1175_v30, 0.0 }
 0x239   :  { %5121 = vst [vmem:[#allocation13_spill] sm:$0xff] %v4396_v56  ;;  %2473 = vmatprep.subr.mxu1 %v1851_v19  ;;  %v4402_v2 = vpop.f32.mrf.mxu0  ;;  %2385 = vmatpush1.msra.mxu0 %v1848_v61  ;;  %v5132_v61 = vld [vmem:[#allocation45_spill] sm:$0xff]  ;;  %v1330_v19 = vadd.f32 %v5133_v52, %v5125_v59  ;;  %v1326_v23 = vadd.f32 %v5136_v50, %v5131_v58 }
 0x23a   :  { %5124 = vst [vmem:[#allocation8_spill] sm:$0xff] %v4402_v2  ;;  %v4408_v38 = vpop.f32.mrf.mxu1  ;;  %2474 = vmatpush1.msra.mxu1 %v1850_v6  ;;  %2386 = vmatprep.subr.mxu0 %v1833_v34  ;;  %v1165_v45 = vadd.f32 %v5132_v61, %v5131_v58  ;;  %v5135_v6 = vld [vmem:[#allocation23_spill] sm:$0xff]  ;;  %v1159_v41 = vadd.f32 %v5138_v21, %v5137_v10  ;;  %v1784_v52 = vmax.f32 %v1169_v51, 0.0  ;;  %v5143_v50 = vld [vmem:[#allocation17_spill] sm:$0xff] }
 0x23b   :  { %5128 = vst [vmem:[#allocation19_spill] sm:$0xff] %v4408_v38  ;;  %2475 = vmatprep.subr.mxu1 %v1835_v15  ;;  %v4414_v27 = vpop.f32.mrf.mxu0  ;;  %2387 = vmatpush1.msra.mxu0 %v1832_v5  ;;  %v1163_v17 = vadd.f32 %v5135_v6, %v5131_v58  ;;  %v1803_v5 = vmax.f32 %v1338_v32, 0.0  ;;  %v1324_v25 = vadd.f32 %v5139_v14, %v5131_v58  ;;  %v5141_v61 = vld [vmem:[#allocation7_spill] sm:$0xff]  ;;  %v5144_v21 = vld [vmem:[#allocation9_spill] sm:$0xff]  ;;  %v5154_v58 = vld [vmem:[#allocation22_spill] sm:$0xff] }
 0x23c   :  { %v4420_v34 = vpop.f32.mrf.mxu1  ;;  %2476 = vmatpush1.msra.mxu1 %v1834_v11  ;;  %2388 = vmatprep.subr.mxu0 %v1817_v49  ;;  %v1785_v11 = vmax.f32 %v1171_v35, 0.0  ;;  %v1802_v49 = vmax.f32 %v1336_v8, 0.0  ;;  %v1157_v30 = vadd.f32 %v5141_v61, %v5137_v10  ;;  %v5142_v32 = vld [vmem:[#allocation3_spill] sm:$0xff]  ;;  %v1153_v35 = vadd.f32 %v5144_v21, %v5143_v50  ;;  %v5145_v8 = vld [vmem:[#allocation5_spill] sm:$0xff]  ;;  %v5148_v21 = vld [vmem:[#allocation6_spill] sm:$0xff] }
 0x23d   :  { %5134 = vst [vmem:[#allocation20_spill] sm:$0xff] %v4420_v34  ;;  %2477 = vmatprep.subr.mxu1 %v1819_v1  ;;  %v4426_v15 = vpop.f32.mrf.mxu0  ;;  %2389 = vmatpush1.msra.mxu0 %v1816_v48  ;;  %v1320_v1 = vadd.f32 %v5142_v32, %v5137_v10  ;;  %v1787_v48 = vmax.f32 %v1332_v47, 0.0  ;;  %v1318_v14 = vadd.f32 %v5145_v8, %v5137_v10  ;;  %v5146_v61 = vld [vmem:[#allocation11_spill] sm:$0xff]  ;;  %v5147_v47 = vld [vmem:[#allocation4_spill] sm:$0xff]  ;;  %v1768_v32 = vmax.f32 %v1163_v17, 0.0 }
 0x23e   :  { %v4432_v40 = vpop.f32.mrf.mxu1  ;;  %2478 = vmatpush1.msra.mxu1 %v1818_v36  ;;  %2390 = vmatprep.subr.mxu0 %v1801_v18  ;;  %v1769_v36 = vmax.f32 %v1165_v45, 0.0  ;;  %v1786_v18 = vmax.f32 %v1330_v19, 0.0  ;;  %v1151_v51 = vadd.f32 %v5146_v61, %v5143_v50  ;;  %v1312_v45 = vadd.f32 %v5148_v21, %v5143_v50 }
 0x23f   :  { %5140 = vst [vmem:[#allocation12_spill] sm:$0xff] %v4432_v40  ;;  %2479 = vmatprep.subr.mxu1 %v1803_v5  ;;  %v4438_v6 = vpop.f32.mrf.mxu0  ;;  %2391 = vmatpush1.msra.mxu0 %v1800_v60  ;;  %v1314_v5 = vadd.f32 %v5147_v47, %v5143_v50  ;;  %v1771_v60 = vmax.f32 %v1326_v23, 0.0  ;;  %v1753_v19 = vmax.f32 %v1159_v41, 0.0  ;;  %v1770_v8 = vmax.f32 %v1324_v25, 0.0 }
 0x240   :  { %v4444_v20 = vpop.f32.mrf.mxu1  ;;  %2480 = vmatpush1.msra.mxu1 %v1802_v49  ;;  %2392 = vmatprep.subr.mxu0 %v1785_v11  ;;  %v1752_v11 = vmax.f32 %v1157_v30, 0.0  ;;  %v1755_v49 = vmax.f32 %v1320_v1, 0.0  ;;  %v1737_v17 = vmax.f32 %v1153_v35, 0.0  ;;  %v1754_v23 = vmax.f32 %v1318_v14, 0.0  ;;  %v4471_v35 = vld [vmem:[%s4914_s4] sm:$0xff] }
 0x241   :  { %2481 = vmatprep.subr.mxu1 %v1787_v48  ;;  %v4450_v55 = vpop.f32.mrf.mxu0  ;;  %2393 = vmatpush1.msra.mxu0 %v1784_v52  ;;  %v1736_v52 = vmax.f32 %v1151_v51, 0.0  ;;  %v1739_v47 = vmax.f32 %v1314_v5, 0.0  ;;  %v1738_v25 = vmax.f32 %v1312_v45, 0.0  ;;  %5149 = vst [vmem:[#allocation42_spill] sm:$0xff] %v4471_v35 }
 0x242   :  { %v4454_v62 = vpop.f32.mrf.mxu1  ;;  %2482 = vmatpush1.msra.mxu1 %v1786_v18  ;;  %2394 = vmatprep.subr.mxu0 %v1769_v36  ;;  %v5150_v18 = vmov 0.0  }
 0x243   :  { %2483 = vmatprep.subr.mxu1 %v1771_v60  ;;  %v4456_v61 = vpop.f32.mrf.mxu0  ;;  %2395 = vmatpush1.msra.mxu0 %v1768_v32  ;;  %v4488_v60 = vld [vmem:[%s4914_s4 + $0x8] sm:$0xff] }
 0x244   :  { %v4458_v48 = vpop.f32.mrf.mxu1  ;;  %2484 = vmatpush1.msra.mxu1 %v1770_v8  ;;  %2396 = vmatprep.subr.mxu0 %v1753_v19  ;;  %5151 = vst [vmem:[#allocation51_spill] sm:$0xff] %v4488_v60 }
 0x245   :  { %2485 = vmatprep.subr.mxu1 %v1755_v49  ;;  %v4460_v41 = vpop.f32.mrf.mxu0  ;;  %2397 = vmatpush1.msra.mxu0 %v1752_v11  ;;  %v4505_v11 = vld [vmem:[%s4914_s4 + $0x10] sm:$0xff] }
 0x246   :  { %v4462_v36 = vpop.f32.mrf.mxu1  ;;  %2486 = vmatpush1.msra.mxu1 %v1754_v23  ;;  %2398 = vmatprep.subr.mxu0 %v1737_v17  ;;  %5152 = vst [vmem:[#allocation18_spill] sm:$0xff] %v4505_v11 }
 0x247   :  { %2487 = vmatprep.subr.mxu1 %v1739_v47  ;;  %v4464_v30 = vpop.f32.mrf.mxu0  ;;  %2399 = vmatpush1.msra.mxu0 %v1736_v52  ;;  %v4516_v47 = vld [vmem:[%s4914_s4 + $0x18] sm:$0xff] }
 0x248   :  { %v4466_v1 = vpop.f32.mrf.mxu1  ;;  %2488 = vmatpush1.msra.mxu1 %v1738_v25  ;;  %2433 = vmatmul.mubr.f32.vlgmr.msra.gmra.mxu0 %v4471_v35  ;;  %5153 = vst [vmem:[#allocation49_spill] sm:$0xff] %v4516_v47 }
 0x249   :  { %2522 = vmatmul.mubr.f32.vlgmr.msra.gmra.mxu1 %v4471_v35  ;;  %v4475_v14 = vpop.f32.mrf.mxu0  ;;  %2438 = vmatprep.mubr.f32.mxu0 %v5150_v18 }
 0x24a   :  { %v4478_v51 = vpop.f32.mrf.mxu1  ;;  %2527 = vmatprep.mubr.f32.mxu1 %v5150_v18 }
 0x24b   :  { %v4481_v5 = vpop.f32.mrf.mxu0 }
 0x24c   :  { %v4483_v32 = vpop.f32.mrf.mxu1  ;;  %2439 = vmatmul.mubr.f32.gmra.mxu0 %v4488_v60 }
 0x24d   :  { %2528 = vmatmul.mubr.f32.gmra.mxu1 %v4488_v60  ;;  %v4492_v21 = vpop.f32.mrf.mxu0  ;;  %2444 = vmatprep.mubr.f32.mxu0 %v5150_v18 }
 0x24e   :  { %v4495_v45 = vpop.f32.mrf.mxu1  ;;  %2533 = vmatprep.mubr.f32.mxu1 %v5150_v18 }
 0x24f   :  { %v4498_v19 = vpop.f32.mrf.mxu0 }
 0x250   :  { %v4500_v8 = vpop.f32.mrf.mxu1  ;;  %2445 = vmatmul.mubr.f32.gmra.mxu0 %v4505_v11 }
 0x251   :  { %2534 = vmatmul.mubr.f32.gmra.mxu1 %v4505_v11  ;;  %v1538_v49 = vpop.f32.mrf.mxu0  ;;  %2450 = vmatprep.mubr.f32.mxu0 %v5150_v18 }
 0x252   :  { %v4510_v17 = vpop.f32.mrf.mxu1  ;;  %2539 = vmatprep.mubr.f32.mxu1 %v5150_v18 }
 0x253   :  { %v1540_v23 = vpop.f32.mrf.mxu0 }
 0x254   :  { %v1701_v52 = vpop.f32.mrf.mxu1  ;;  %2451 = vmatmul.mubr.f32.gmra.mxu0 %v4516_v47 }
 0x255   :  { %2540 = vmatmul.mubr.f32.gmra.mxu1 %v4516_v47  ;;  %v1544_v25 = vpop.f32.mrf.mxu0  ;;  %2610 = vmatprep.mubr.f32.mxu0 %v5150_v18 }
 0x256   :  { %v1705_v11 = vpop.f32.mrf.mxu1  ;;  %2699 = vmatprep.mubr.f32.mxu1 %v5150_v18 }
 0x257   :  { %v1546_v60 = vpop.f32.mrf.mxu0 }
 0x258   :  { %v1707_v35 = vpop.f32.mrf.mxu1 }
 0x259   :  { %v1550_v50 = vpop.f32.mrf.mxu0 }
 0x25a   :  { %v1711_v46 = vpop.f32.mrf.mxu1 }
 0x25b   :  { %v1552_v53 = vpop.f32.mrf.mxu0  ;;  %v1712_v2 = vadd.f32 %v1711_v46, %v3783_v29  ;;  %v1702_v46 = vadd.f32 %v1701_v52, %v3797_v0 }
 0x25c   :  { %v1713_v42 = vpop.f32.mrf.mxu1  ;;  %v1553_v38 = vadd.f32 %v1552_v53, %v3783_v29  ;;  %v1708_v53 = vadd.f32 %v1707_v35, %v3788_v9 }
 0x25d   :  { %v1556_v33 = vpop.f32.mrf.mxu0 }
 0x25e   :  { %v1717_v10 = vpop.f32.mrf.mxu1  ;;  %v1557_v59 = vadd.f32 %v1556_v33, %v5039_v7 }
 0x25f   :  { %v1558_v28 = vpop.f32.mrf.mxu0  ;;  %v1718_v37 = vadd.f32 %v1717_v10, %v5039_v7 }
 0x260   :  { %v1719_v63 = vpop.f32.mrf.mxu1  ;;  %v1559_v24 = vadd.f32 %v1558_v28, %v5039_v7  ;;  %v1714_v28 = vadd.f32 %v1713_v42, %v3783_v29  ;;  %v1706_v42 = vadd.f32 %v1705_v11, %v3788_v9 }
 0x261   :  { %v1562_v4 = vpop.f32.mrf.mxu0  ;;  %v1720_v56 = vadd.f32 %v1719_v63, %v5039_v7  ;;  %v1545_v63 = vadd.f32 %v1544_v25, %v3788_v9  ;;  %v1966_v10 = vmax.f32 %v1718_v37, 0.0  ;;  %v1533_v37 = vadd.f32 %v4492_v21, %v3799_v13 }
 0x262   :  { %v1723_v22 = vpop.f32.mrf.mxu1  ;;  %v1563_v47 = vadd.f32 %v1562_v4, %v5154_v58  ;;  %v1551_v4 = vadd.f32 %v1550_v50, %v3783_v29  ;;  %v1965_v33 = vmax.f32 %v1559_v24, 0.0  ;;  %v1539_v29 = vadd.f32 %v1538_v49, %v3797_v0 }
 0x263   :  { %v1564_v39 = vpop.f32.mrf.mxu0  ;;  %v1724_v12 = vadd.f32 %v1723_v22, %v5154_v58  ;;  %v1967_v7 = vmax.f32 %v1720_v56, 0.0  ;;  %v1700_v56 = vadd.f32 %v4510_v17, %v3797_v0  ;;  %v1529_v50 = vadd.f32 %v4481_v5, %v3813_v26 }
 0x264   :  { %v1565_v18 = vadd.f32 %v1564_v39, %v5154_v58  ;;  %v1725_v16 = vpop.f32.mrf.mxu1  ;;  %v1980_v34 = vmax.f32 %v1563_v47, 0.0  ;;  %v1547_v39 = vadd.f32 %v1546_v60, %v3788_v9  ;;  %v1948_v24 = vmax.f32 %v1551_v4, 0.0 }
 0x265   :  { %v1726_v44 = vadd.f32 %v1725_v16, %v5154_v58  ;;  %v1982_v40 = vmax.f32 %v1724_v12, 0.0  ;;  %v1964_v16 = vmax.f32 %v1557_v59, 0.0  ;;  %v1541_v58 = vadd.f32 %v1540_v23, %v3797_v0 }
 0x266   :  { %v1981_v57 = vmax.f32 %v1565_v18, 0.0  ;;  %v1951_v12 = vmax.f32 %v1714_v28, 0.0  ;;  %v1933_v59 = vmax.f32 %v1547_v39, 0.0  ;;  %v1950_v9 = vmax.f32 %v1712_v2, 0.0  ;;  %v5155_v28 = vld [vmem:[#allocation12_spill] sm:$0xff] }
 0x267   :  { %v1983_v22 = vmax.f32 %v1726_v44, 0.0  ;;  %v1949_v44 = vmax.f32 %v1553_v38, 0.0  ;;  %v1696_v38 = vadd.f32 %v4500_v8, %v3799_v13  ;;  %v1694_v0 = vadd.f32 %v4495_v45, %v3799_v13  ;;  %v5156_v39 = vld [vmem:[#allocation8_spill] sm:$0xff] }
 0x268   :  { %2546 = vmatprep.subr.mxu0 %v1981_v57  ;;  %v1535_v57 = vadd.f32 %v4498_v19, %v3799_v13  ;;  %v1917_v35 = vmax.f32 %v1541_v58, 0.0  ;;  %v1934_v2 = vmax.f32 %v1706_v42, 0.0  ;;  %v1527_v18 = vadd.f32 %v4475_v14, %v3813_v26  ;;  %v5160_v58 = vld [vmem:[#allocation19_spill] sm:$0xff] }
 0x269   :  { %2635 = vmatprep.subr.mxu1 %v1983_v22  ;;  %2547 = vmatpush1.msra.mxu0 %v1980_v34  ;;  %v1932_v34 = vmax.f32 %v1545_v63, 0.0  ;;  %v1690_v60 = vadd.f32 %v4483_v32, %v3813_v26  ;;  %v1916_v21 = vmax.f32 %v1539_v29, 0.0  ;;  %v1919_v19 = vmax.f32 %v1702_v46, 0.0  ;;  %v5162_v46 = vld [vmem:[#allocation13_spill] sm:$0xff] }
 0x26a   :  { %2636 = vmatpush1.msra.mxu1 %v1982_v40  ;;  %2548 = vmatprep.subr.mxu0 %v1965_v33  ;;  %v1935_v40 = vmax.f32 %v1708_v53, 0.0  ;;  %v1523_v5 = vadd.f32 %v4464_v30, %v3823_v3  ;;  %v1688_v13 = vadd.f32 %v4478_v51, %v3813_v26  ;;  %v1901_v45 = vmax.f32 %v1535_v57, 0.0  ;;  %v5157_v33 = vld [vmem:[#allocation20_spill] sm:$0xff] }
 0x26b   :  { %2637 = vmatprep.subr.mxu1 %v1967_v7  ;;  %2549 = vmatpush1.msra.mxu0 %v1964_v16  ;;  %v1918_v8 = vmax.f32 %v1700_v56, 0.0  ;;  %v1521_v14 = vadd.f32 %v4460_v41, %v3823_v3  ;;  %v1684_v32 = vadd.f32 %v4466_v1, %v3823_v3  ;;  %v1900_v11 = vmax.f32 %v1533_v37, 0.0  ;;  %v5158_v16 = vld [vmem:[#allocation35_spill] sm:$0xff]  ;;  %v5159_v7 = vld [vmem:[#allocation10_spill] sm:$0xff]  ;;  %v5163_v56 = vld [vmem:[#allocation41_spill] sm:$0xff] }
 0x26c   :  { %2638 = vmatpush1.msra.mxu1 %v1966_v10  ;;  %2550 = vmatprep.subr.mxu0 %v1949_v44  ;;  %v1903_v49 = vmax.f32 %v1696_v38, 0.0  ;;  %v1517_v30 = vadd.f32 %v4456_v61, %v3844_v31  ;;  %v1682_v26 = vadd.f32 %v4462_v36, %v3823_v3  ;;  %v1885_v51 = vmax.f32 %v1529_v50, 0.0  ;;  %v5161_v10 = vld [vmem:[#allocation25_spill] sm:$0xff]  ;;  %v5165_v37 = vld [vmem:[#allocation15_spill] sm:$0xff] }
 0x26d   :  { %2639 = vmatprep.subr.mxu1 %v1951_v12  ;;  %2551 = vmatpush1.msra.mxu0 %v1948_v24  ;;  %v1902_v17 = vmax.f32 %v1694_v0, 0.0  ;;  %v1515_v41 = vadd.f32 %v4450_v55, %v3844_v31  ;;  %v1678_v1 = vadd.f32 %v4458_v48, %v3844_v31  ;;  %v1884_v23 = vmax.f32 %v1527_v18, 0.0  ;;  %v5167_v0 = vld [vmem:[#allocation27_spill] sm:$0xff] }
 0x26e   :  { %2640 = vmatpush1.msra.mxu1 %v1950_v9  ;;  %2552 = vmatprep.subr.mxu0 %v1933_v59  ;;  %v1887_v52 = vmax.f32 %v1690_v60, 0.0  ;;  %v1511_v61 = vadd.f32 %v4438_v6, %v3852_v43  ;;  %v1676_v3 = vadd.f32 %v4454_v62, %v3844_v31  ;;  %v1869_v36 = vmax.f32 %v1523_v5, 0.0  ;;  %v5164_v59 = vld [vmem:[#allocation24_spill] sm:$0xff]  ;;  %v5168_v60 = vld [vmem:[#allocation43_spill] sm:$0xff]  ;;  %v5170_v5 = vld [vmem:[#allocation29_spill] sm:$0xff] }
 0x26f   :  { %2641 = vmatprep.subr.mxu1 %v1935_v40  ;;  %2553 = vmatpush1.msra.mxu0 %v1932_v34  ;;  %v1886_v47 = vmax.f32 %v1688_v13, 0.0  ;;  %v1509_v55 = vadd.f32 %v4426_v15, %v3852_v43  ;;  %v1672_v48 = vadd.f32 %v4444_v20, %v3852_v43  ;;  %v1868_v25 = vmax.f32 %v1521_v14, 0.0  ;;  %v5166_v40 = vld [vmem:[#allocation26_spill] sm:$0xff] }
 0x270   :  { %2642 = vmatpush1.msra.mxu1 %v1934_v2  ;;  %2554 = vmatprep.subr.mxu0 %v1917_v35  ;;  %v1871_v4 = vmax.f32 %v1684_v32, 0.0  ;;  %v1505_v6 = vadd.f32 %v4414_v27, %v3884_v54  ;;  %v1670_v31 = vadd.f32 %v5155_v28, %v3852_v43  ;;  %v1853_v62 = vmax.f32 %v1517_v30, 0.0  ;;  %v5171_v14 = vld [vmem:[#allocation30_spill] sm:$0xff] }
 0x271   :  { %2643 = vmatprep.subr.mxu1 %v1919_v19  ;;  %2555 = vmatpush1.msra.mxu0 %v1916_v21  ;;  %v1870_v22 = vmax.f32 %v1682_v26, 0.0  ;;  %v1503_v15 = vadd.f32 %v5156_v39, %v3884_v54  ;;  %v1666_v20 = vadd.f32 %v5157_v33, %v3884_v54  ;;  %v1852_v63 = vmax.f32 %v1515_v41, 0.0  ;;  %v5169_v21 = vld [vmem:[#allocation28_spill] sm:$0xff] }
 0x272   :  { %2644 = vmatpush1.msra.mxu1 %v1918_v8  ;;  %2556 = vmatprep.subr.mxu0 %v1901_v45  ;;  %v1855_v53 = vmax.f32 %v1678_v1, 0.0  ;;  %v1499_v27 = vadd.f32 %v5159_v7, %v5158_v16  ;;  %v1664_v43 = vadd.f32 %v5160_v58, %v3884_v54  ;;  %v1837_v42 = vmax.f32 %v1511_v61, 0.0  ;;  %v5175_v1 = vld [vmem:[#allocation33_spill] sm:$0xff] }
 0x273   :  { %2645 = vmatprep.subr.mxu1 %v1903_v49  ;;  %2557 = vmatpush1.msra.mxu0 %v1900_v11  ;;  %v1854_v44 = vmax.f32 %v1676_v3, 0.0  ;;  %v1497_v29 = vadd.f32 %v5161_v10, %v5158_v16  ;;  %v1660_v24 = vadd.f32 %v5162_v46, %v5158_v16  ;;  %v1836_v12 = vmax.f32 %v1509_v55, 0.0  ;;  %v5172_v11 = vld [vmem:[#allocation31_spill] sm:$0xff]  ;;  %v5176_v3 = vld [vmem:[#allocation34_spill] sm:$0xff]  ;;  %v5183_v7 = vld [vmem:[#allocation21_spill] sm:$0xff]  ;;  %v4631_v46 = vpop.permute.xlu0 %1994 }
 0x274   :  { %2646 = vmatpush1.msra.mxu1 %v1902_v17  ;;  %2558 = vmatprep.subr.mxu0 %v1885_v51  ;;  %v1839_v57 = vmax.f32 %v1672_v48, 0.0  ;;  %v1493_v9 = vadd.f32 %v5164_v59, %v5163_v56  ;;  %v1658_v54 = vadd.f32 %v5165_v37, %v5158_v16  ;;  %v1821_v38 = vmax.f32 %v1505_v6, 0.0  ;;  %v5173_v51 = vld [vmem:[#allocation14_spill] sm:$0xff]  ;;  %v5174_v17 = vld [vmem:[#allocation32_spill] sm:$0xff]  ;;  %v5179_v6 = vld [vmem:[#allocation37_spill] sm:$0xff] }
 0x275   :  { %2647 = vmatprep.subr.mxu1 %v1887_v52  ;;  %2559 = vmatpush1.msra.mxu0 %v1884_v23  ;;  %v1838_v34 = vmax.f32 %v1670_v31, 0.0  ;;  %v1491_v50 = vadd.f32 %v5166_v40, %v5163_v56  ;;  %v1654_v35 = vadd.f32 %v5167_v0, %v5163_v56  ;;  %v1820_v2 = vmax.f32 %v1503_v15, 0.0  ;;  %v5180_v31 = vld [vmem:[#allocation38_spill] sm:$0xff]  ;;  %v5181_v15 = vld [vmem:[#allocation39_spill] sm:$0xff] }
 0x276   :  { %2648 = vmatpush1.msra.mxu1 %v1886_v47  ;;  %2560 = vmatprep.subr.mxu0 %v1869_v36  ;;  %v1823_v18 = vmax.f32 %v1666_v20, 0.0  ;;  %v1487_v19 = vadd.f32 %v5169_v21, %v5168_v60  ;;  %v1652_v13 = vadd.f32 %v5170_v5, %v5163_v56  ;;  %v1805_v45 = vmax.f32 %v1499_v27, 0.0  ;;  %v5177_v47 = vld [vmem:[#allocation36_spill] sm:$0xff]  ;;  %v5186_v5 = vld [vmem:[#allocation51_spill] sm:$0xff] }
 0x277   :  { %2649 = vmatprep.subr.mxu1 %v1871_v4  ;;  %2561 = vmatpush1.msra.mxu0 %v1868_v25  ;;  %v1822_v8 = vmax.f32 %v1664_v43, 0.0  ;;  %v1485_v32 = vadd.f32 %v5171_v14, %v5168_v60  ;;  %v1648_v49 = vadd.f32 %v5172_v11, %v5168_v60  ;;  %v1804_v30 = vmax.f32 %v1497_v29, 0.0  ;;  %v5178_v4 = vld [vmem:[#allocation17_spill] sm:$0xff]  ;;  %v5182_v20 = vld [vmem:[#allocation40_spill] sm:$0xff] }
 0x278   :  { %2650 = vmatpush1.msra.mxu1 %v1870_v22  ;;  %2562 = vmatprep.subr.mxu0 %v1853_v62  ;;  %v1807_v26 = vmax.f32 %v1660_v24, 0.0  ;;  %v1481_v41 = vadd.f32 %v5174_v17, %v5173_v51  ;;  %v1646_v23 = vadd.f32 %v5175_v1, %v5168_v60  ;;  %v1789_v52 = vmax.f32 %v1493_v9, 0.0 }
 0x279   :  { %2651 = vmatprep.subr.mxu1 %v1855_v53  ;;  %2563 = vmatpush1.msra.mxu0 %v1852_v63  ;;  %v1806_v61 = vmax.f32 %v1658_v54, 0.0  ;;  %v1479_v36 = vadd.f32 %v5176_v3, %v5173_v51  ;;  %v1642_v55 = vadd.f32 %v5177_v47, %v5173_v51  ;;  %v1788_v48 = vmax.f32 %v1491_v50, 0.0  ;;  %v4640_v50 = vpop.permute.xlu1 %1999 }
 0x27a   :  { %2652 = vmatpush1.msra.mxu1 %v1854_v44  ;;  %2564 = vmatprep.subr.mxu0 %v1837_v42  ;;  %v1791_v25 = vmax.f32 %v1654_v35, 0.0  ;;  %v1475_v28 = vadd.f32 %v5179_v6, %v5178_v4  ;;  %v1640_v62 = vadd.f32 %v5180_v31, %v5173_v51  ;;  %v1773_v22 = vmax.f32 %v1487_v19, 0.0  ;;  %v5187_v51 = vld [vmem:[#allocation18_spill] sm:$0xff] }
 0x27b   :  { %2653 = vmatprep.subr.mxu1 %v1839_v57  ;;  %2565 = vmatpush1.msra.mxu0 %v1836_v12  ;;  %v1790_v39 = vmax.f32 %v1652_v13, 0.0  ;;  %v1473_v33 = vadd.f32 %v5181_v15, %v5178_v4  ;;  %v1636_v63 = vadd.f32 %v5182_v20, %v5178_v4  ;;  %v1772_v53 = vmax.f32 %v1485_v32, 0.0 }
 0x27c   :  { %2654 = vmatpush1.msra.mxu1 %v1838_v34  ;;  %2566 = vmatprep.subr.mxu0 %v1821_v38  ;;  %v1775_v16 = vmax.f32 %v1648_v49, 0.0  ;;  %v1634_v27 = vadd.f32 %v5183_v7, %v5178_v4  ;;  %v1757_v58 = vmax.f32 %v1481_v41, 0.0  ;;  %v1774_v43 = vmax.f32 %v1646_v23, 0.0  ;;  %v5184_v38 = vld [vmem:[#allocation42_spill] sm:$0xff] }
 0x27d   :  { %2655 = vmatprep.subr.mxu1 %v1823_v18  ;;  %2567 = vmatpush1.msra.mxu0 %v1820_v2  ;;  %v1756_v42 = vmax.f32 %v1479_v36, 0.0  ;;  %v1759_v44 = vmax.f32 %v1642_v55, 0.0  ;;  %v1741_v10 = vmax.f32 %v1475_v28, 0.0  ;;  %v1758_v29 = vmax.f32 %v1640_v62, 0.0  ;;  %v4684_v1 = vpop.permute.xlu1 %2009  ;;  %v5188_v55 = vld [vmem:[#allocation49_spill] sm:$0xff] }
 0x27e   :  { %2656 = vmatpush1.msra.mxu1 %v1822_v8  ;;  %2568 = vmatprep.subr.mxu0 %v1805_v45  ;;  %v1740_v24 = vmax.f32 %v1473_v33, 0.0  ;;  %v1743_v12 = vmax.f32 %v1636_v63, 0.0  ;;  %v1742_v56 = vmax.f32 %v1634_v27, 0.0  ;;  %v5185_v35 = vmov 0.0   ;;  %v4662_v8 = vpop.permute.xlu0 %2004 }
 0x27f   :  { %2657 = vmatprep.subr.mxu1 %v1807_v26  ;;  %2569 = vmatpush1.msra.mxu0 %v1804_v30 }
 0x280   :  { %2658 = vmatpush1.msra.mxu1 %v1806_v61  ;;  %2570 = vmatprep.subr.mxu0 %v1789_v52 }
 0x281   :  { %2659 = vmatprep.subr.mxu1 %v1791_v25  ;;  %2571 = vmatpush1.msra.mxu0 %v1788_v48 }
 0x282   :  { %2660 = vmatpush1.msra.mxu1 %v1790_v39  ;;  %2572 = vmatprep.subr.mxu0 %v1773_v22 }
 0x283   :  { %2661 = vmatprep.subr.mxu1 %v1775_v16  ;;  %2573 = vmatpush1.msra.mxu0 %v1772_v53 }
 0x284   :  { %2662 = vmatpush1.msra.mxu1 %v1774_v43  ;;  %2574 = vmatprep.subr.mxu0 %v1757_v58 }
 0x285   :  { %2663 = vmatprep.subr.mxu1 %v1759_v44  ;;  %2575 = vmatpush1.msra.mxu0 %v1756_v42  ;;  %v2078_v57 = vpop.f32.mrf.mxu0 }
 0x286   :  { %2664 = vmatpush1.msra.mxu1 %v1758_v29  ;;  %2576 = vmatprep.subr.mxu0 %v1741_v10  ;;  %v2079_v59 = vadd.f32 %v2078_v57, %v4631_v46  ;;  %v2167_v9 = vpop.f32.mrf.mxu1 }
 0x287   :  { %2665 = vmatprep.subr.mxu1 %v1743_v12  ;;  %2577 = vmatpush1.msra.mxu0 %v1740_v24  ;;  %v2168_v37 = vadd.f32 %v2167_v9, %v4631_v46  ;;  %v2080_v54 = vpop.f32.mrf.mxu0 }
 0x288   :  { %2666 = vmatpush1.msra.mxu1 %v1742_v56  ;;  %2724 = vst [vmem:[%s4915_s6] sm:$0xff] %v2079_v59  ;;  %2611 = vmatmul.mubr.f32.vlgmr.msra.gmra.mxu0 %v5184_v38  ;;  %v2081_v34 = vadd.f32 %v2080_v54, %v4631_v46  ;;  %v2169_v40 = vpop.f32.mrf.mxu1 }
 0x289   :  { %2726 = vst [vmem:[%s4915_s6 + $0x10] sm:$0xff] %v2168_v37  ;;  %2700 = vmatmul.mubr.f32.vlgmr.msra.gmra.mxu1 %v5184_v38  ;;  %v2170_v0 = vadd.f32 %v2169_v40, %v4631_v46  ;;  %2616 = vmatprep.mubr.f32.mxu0 %v5185_v35  ;;  %v2084_v2 = vpop.f32.mrf.mxu0 }
 0x28a   :  { %2725 = vst [vmem:[%s4915_s6 + $0x8] sm:$0xff] %v2081_v34  ;;  %2705 = vmatprep.mubr.f32.mxu1 %v5185_v35  ;;  %v2085_v18 = vadd.f32 %v2084_v2, %v4640_v50  ;;  %v2173_v60 = vpop.f32.mrf.mxu1 }
 0x28b   :  { %2727 = vst [vmem:[%s4915_s6 + $0x18] sm:$0xff] %v2170_v0  ;;  %v2174_v21 = vadd.f32 %v2173_v60, %v4640_v50  ;;  %v2086_v19 = vpop.f32.mrf.mxu0 }
 0x28c   :  { %2740 = vst [vmem:[%s4915_s6 + $0x80] sm:$0xff] %v2085_v18  ;;  %2617 = vmatmul.mubr.f32.gmra.mxu0 %v5186_v5  ;;  %v2087_v13 = vadd.f32 %v2086_v19, %v4640_v50  ;;  %v2175_v45 = vpop.f32.mrf.mxu1 }
 0x28d   :  { %2742 = vst [vmem:[%s4915_s6 + $0x90] sm:$0xff] %v2174_v21  ;;  %2706 = vmatmul.mubr.f32.gmra.mxu1 %v5186_v5  ;;  %v2176_v14 = vadd.f32 %v2175_v45, %v4640_v50  ;;  %2622 = vmatprep.mubr.f32.mxu0 %v5185_v35  ;;  %v2090_v32 = vpop.f32.mrf.mxu0 }
 0x28e   :  { %2741 = vst [vmem:[%s4915_s6 + $0x88] sm:$0xff] %v2087_v13  ;;  %2711 = vmatprep.mubr.f32.mxu1 %v5185_v35  ;;  %v2091_v11 = vadd.f32 %v2090_v32, %v4662_v8  ;;  %v2179_v49 = vpop.f32.mrf.mxu1 }
 0x28f   :  { %2743 = vst [vmem:[%s4915_s6 + $0x98] sm:$0xff] %v2176_v14  ;;  %v2180_v30 = vadd.f32 %v2179_v49, %v4662_v8  ;;  %v2092_v26 = vpop.f32.mrf.mxu0 }
 0x290   :  { %2756 = vst [vmem:[%s4915_s6 + $0x100] sm:$0xff] %v2091_v11  ;;  %2623 = vmatmul.mubr.f32.gmra.mxu0 %v5187_v51  ;;  %v2093_v17 = vadd.f32 %v2092_v26, %v4662_v8  ;;  %v2181_v41 = vpop.f32.mrf.mxu1 }
 0x291   :  { %2758 = vst [vmem:[%s4915_s6 + $0x110] sm:$0xff] %v2180_v30  ;;  %2712 = vmatmul.mubr.f32.gmra.mxu1 %v5187_v51  ;;  %v2182_v23 = vadd.f32 %v2181_v41, %v4662_v8  ;;  %2628 = vmatprep.mubr.f32.mxu0 %v5185_v35  ;;  %v2096_v52 = vpop.f32.mrf.mxu0 }
 0x292   :  { %2757 = vst [vmem:[%s4915_s6 + $0x108] sm:$0xff] %v2093_v17  ;;  %2717 = vmatprep.mubr.f32.mxu1 %v5185_v35  ;;  %v2097_v61 = vadd.f32 %v2096_v52, %v4684_v1  ;;  %v2185_v3 = vpop.f32.mrf.mxu1 }
 0x293   :  { %2759 = vst [vmem:[%s4915_s6 + $0x118] sm:$0xff] %v2182_v23  ;;  %v2186_v36 = vadd.f32 %v2185_v3, %v4684_v1  ;;  %v2098_v47 = vpop.f32.mrf.mxu0 }
 0x294   :  { %2772 = vst [vmem:[%s4915_s6 + $0x180] sm:$0xff] %v2097_v61  ;;  %2629 = vmatmul.mubr.f32.gmra.mxu0 %v5188_v55  ;;  %v2099_v48 = vadd.f32 %v2098_v47, %v4684_v1  ;;  %v2187_v25 = vpop.f32.mrf.mxu1 }
 0x295   :  { %2774 = vst [vmem:[%s4915_s6 + $0x190] sm:$0xff] %v2186_v36  ;;  %2718 = vmatmul.mubr.f32.gmra.mxu1 %v5188_v55  ;;  %v2188_v4 = vadd.f32 %v2187_v25, %v4684_v1 }
 0x296   :  { %2773 = vst [vmem:[%s4915_s6 + $0x188] sm:$0xff] %v2099_v48 }
 0x297   :  { %2775 = vst [vmem:[%s4915_s6 + $0x198] sm:$0xff] %v2188_v4 }
 0x2c7   :  { %v2256_v6 = vpop.f32.mrf.mxu0 }
 0x2c8   :  { %v2257_v28 = vadd.f32 %v2256_v6, %v4631_v46  ;;  %v2345_v31 = vpop.f32.mrf.mxu1 }
 0x2c9   :  { %v2346_v62 = vadd.f32 %v2345_v31, %v4631_v46  ;;  %v2258_v22 = vpop.f32.mrf.mxu0 }
 0x2ca   :  { %2728 = vst [vmem:[%s4915_s6 + $0x20] sm:$0xff] %v2257_v28  ;;  %v2259_v39 = vadd.f32 %v2258_v22, %v4631_v46  ;;  %v2347_v15 = vpop.f32.mrf.mxu1 }
 0x2cb   :  { %2730 = vst [vmem:[%s4915_s6 + $0x30] sm:$0xff] %v2346_v62  ;;  %v2348_v33 = vadd.f32 %v2347_v15, %v4631_v46  ;;  %v2262_v20 = vpop.f32.mrf.mxu0 }
 0x2cc   :  { %2729 = vst [vmem:[%s4915_s6 + $0x28] sm:$0xff] %v2259_v39  ;;  %v2263_v63 = vadd.f32 %v2262_v20, %v4640_v50  ;;  %v2351_v53 = vpop.f32.mrf.mxu1 }
 0x2cd   :  { %2731 = vst [vmem:[%s4915_s6 + $0x38] sm:$0xff] %v2348_v33  ;;  %v2352_v16 = vadd.f32 %v2351_v53, %v4640_v50  ;;  %v2264_v7 = vpop.f32.mrf.mxu0 }
 0x2ce   :  { %2744 = vst [vmem:[%s4915_s6 + $0xa0] sm:$0xff] %v2263_v63  ;;  %v2265_v27 = vadd.f32 %v2264_v7, %v4640_v50  ;;  %v2353_v58 = vpop.f32.mrf.mxu1 }
 0x2cf   :  { %2746 = vst [vmem:[%s4915_s6 + $0xb0] sm:$0xff] %v2352_v16  ;;  %v2354_v43 = vadd.f32 %v2353_v58, %v4640_v50  ;;  %v2268_v42 = vpop.f32.mrf.mxu0 }
 0x2d0   :  { %2745 = vst [vmem:[%s4915_s6 + $0xa8] sm:$0xff] %v2265_v27  ;;  %v2269_v44 = vadd.f32 %v2268_v42, %v4662_v8  ;;  %v2357_v10 = vpop.f32.mrf.mxu1 }
 0x2d1   :  { %2747 = vst [vmem:[%s4915_s6 + $0xb8] sm:$0xff] %v2354_v43  ;;  %v2358_v29 = vadd.f32 %v2357_v10, %v4662_v8  ;;  %v2270_v24 = vpop.f32.mrf.mxu0 }
 0x2d2   :  { %2760 = vst [vmem:[%s4915_s6 + $0x120] sm:$0xff] %v2269_v44  ;;  %v2271_v12 = vadd.f32 %v2270_v24, %v4662_v8  ;;  %v2359_v57 = vpop.f32.mrf.mxu1 }
 0x2d3   :  { %2762 = vst [vmem:[%s4915_s6 + $0x130] sm:$0xff] %v2358_v29  ;;  %v2360_v56 = vadd.f32 %v2359_v57, %v4662_v8  ;;  %v2274_v59 = vpop.f32.mrf.mxu0 }
 0x2d4   :  { %2761 = vst [vmem:[%s4915_s6 + $0x128] sm:$0xff] %v2271_v12  ;;  %v2275_v9 = vadd.f32 %v2274_v59, %v4684_v1  ;;  %v2363_v37 = vpop.f32.mrf.mxu1 }
 0x2d5   :  { %2763 = vst [vmem:[%s4915_s6 + $0x138] sm:$0xff] %v2360_v56  ;;  %v2364_v54 = vadd.f32 %v2363_v37, %v4684_v1  ;;  %v2276_v38 = vpop.f32.mrf.mxu0 }
 0x2d6   :  { %2776 = vst [vmem:[%s4915_s6 + $0x1a0] sm:$0xff] %v2275_v9  ;;  %v2277_v34 = vadd.f32 %v2276_v38, %v4684_v1  ;;  %v2365_v40 = vpop.f32.mrf.mxu1 }
 0x2d7   :  { %2778 = vst [vmem:[%s4915_s6 + $0x1b0] sm:$0xff] %v2364_v54  ;;  %v2366_v0 = vadd.f32 %v2365_v40, %v4684_v1 }
 0x2d8   :  { %2777 = vst [vmem:[%s4915_s6 + $0x1a8] sm:$0xff] %v2277_v34 }
 0x2d9   :  { %2779 = vst [vmem:[%s4915_s6 + $0x1b8] sm:$0xff] %v2366_v0 }
 0x308   :  { %v2434_v35 = vpop.f32.mrf.mxu0 }
 0x309   :  { %v2435_v2 = vadd.f32 %v2434_v35, %v4631_v46  ;;  %v2523_v18 = vpop.f32.mrf.mxu1 }
 0x30a   :  { %v2524_v60 = vadd.f32 %v2523_v18, %v4631_v46  ;;  %v2436_v21 = vpop.f32.mrf.mxu0 }
 0x30b   :  { %2732 = vst [vmem:[%s4915_s6 + $0x40] sm:$0xff] %v2435_v2  ;;  %v2437_v19 = vadd.f32 %v2436_v21, %v4631_v46  ;;  %v2525_v5 = vpop.f32.mrf.mxu1 }
 0x30c   :  { %2734 = vst [vmem:[%s4915_s6 + $0x50] sm:$0xff] %v2524_v60  ;;  %v2526_v13 = vadd.f32 %v2525_v5, %v4631_v46  ;;  %v2440_v45 = vpop.f32.mrf.mxu0 }
 0x30d   :  { %2733 = vst [vmem:[%s4915_s6 + $0x48] sm:$0xff] %v2437_v19  ;;  %v2441_v14 = vadd.f32 %v2440_v45, %v4640_v50  ;;  %v2529_v32 = vpop.f32.mrf.mxu1 }
 0x30e   :  { %2735 = vst [vmem:[%s4915_s6 + $0x58] sm:$0xff] %v2526_v13  ;;  %v2530_v11 = vadd.f32 %v2529_v32, %v4640_v50  ;;  %v2442_v49 = vpop.f32.mrf.mxu0 }
 0x30f   :  { %2748 = vst [vmem:[%s4915_s6 + $0xc0] sm:$0xff] %v2441_v14  ;;  %v2443_v30 = vadd.f32 %v2442_v49, %v4640_v50  ;;  %v2531_v26 = vpop.f32.mrf.mxu1 }
 0x310   :  { %2750 = vst [vmem:[%s4915_s6 + $0xd0] sm:$0xff] %v2530_v11  ;;  %v2532_v51 = vadd.f32 %v2531_v26, %v4640_v50  ;;  %v2446_v17 = vpop.f32.mrf.mxu0 }
 0x311   :  { %2749 = vst [vmem:[%s4915_s6 + $0xc8] sm:$0xff] %v2443_v30  ;;  %v2447_v41 = vadd.f32 %v2446_v17, %v4662_v8  ;;  %v2535_v23 = vpop.f32.mrf.mxu1 }
 0x312   :  { %2751 = vst [vmem:[%s4915_s6 + $0xd8] sm:$0xff] %v2532_v51  ;;  %v2536_v52 = vadd.f32 %v2535_v23, %v4662_v8  ;;  %v2448_v61 = vpop.f32.mrf.mxu0 }
 0x313   :  { %2764 = vst [vmem:[%s4915_s6 + $0x140] sm:$0xff] %v2447_v41  ;;  %v2449_v3 = vadd.f32 %v2448_v61, %v4662_v8  ;;  %v2537_v36 = vpop.f32.mrf.mxu1 }
 0x314   :  { %2766 = vst [vmem:[%s4915_s6 + $0x150] sm:$0xff] %v2536_v52  ;;  %v2538_v47 = vadd.f32 %v2537_v36, %v4662_v8  ;;  %v2452_v55 = vpop.f32.mrf.mxu0 }
 0x315   :  { %2765 = vst [vmem:[%s4915_s6 + $0x148] sm:$0xff] %v2449_v3  ;;  %v2453_v48 = vadd.f32 %v2452_v55, %v4684_v1  ;;  %v2541_v25 = vpop.f32.mrf.mxu1 }
 0x316   :  { %2767 = vst [vmem:[%s4915_s6 + $0x158] sm:$0xff] %v2538_v47  ;;  %v2542_v4 = vadd.f32 %v2541_v25, %v4684_v1  ;;  %v2454_v6 = vpop.f32.mrf.mxu0 }
 0x317   :  { %2780 = vst [vmem:[%s4915_s6 + $0x1c0] sm:$0xff] %v2453_v48  ;;  %v2455_v28 = vadd.f32 %v2454_v6, %v4684_v1  ;;  %v2543_v31 = vpop.f32.mrf.mxu1 }
 0x318   :  { %2782 = vst [vmem:[%s4915_s6 + $0x1d0] sm:$0xff] %v2542_v4  ;;  %v2544_v62 = vadd.f32 %v2543_v31, %v4684_v1 }
 0x319   :  { %2781 = vst [vmem:[%s4915_s6 + $0x1c8] sm:$0xff] %v2455_v28 }
 0x31a   :  { %2783 = vst [vmem:[%s4915_s6 + $0x1d8] sm:$0xff] %v2544_v62 }
 0x348   :  { %v2612_v22 = vpop.f32.mrf.mxu0 }
 0x349   :  { %v2613_v39 = vadd.f32 %v2612_v22, %v4631_v46  ;;  %v2701_v15 = vpop.f32.mrf.mxu1 }
 0x34a   :  { %v2702_v33 = vadd.f32 %v2701_v15, %v4631_v46  ;;  %v2614_v20 = vpop.f32.mrf.mxu0 }
 0x34b   :  { %2736 = vst [vmem:[%s4915_s6 + $0x60] sm:$0xff] %v2613_v39  ;;  %v2615_v63 = vadd.f32 %v2614_v20, %v4631_v46  ;;  %v2703_v53 = vpop.f32.mrf.mxu1 }
 0x34c   :  { %2738 = vst [vmem:[%s4915_s6 + $0x70] sm:$0xff] %v2702_v33  ;;  %v2704_v16 = vadd.f32 %v2703_v53, %v4631_v46  ;;  %v2618_v7 = vpop.f32.mrf.mxu0 }
 0x34d   :  { %2737 = vst [vmem:[%s4915_s6 + $0x68] sm:$0xff] %v2615_v63  ;;  %v2619_v27 = vadd.f32 %v2618_v7, %v4640_v50  ;;  %v2707_v58 = vpop.f32.mrf.mxu1 }
 0x34e   :  { %2739 = vst [vmem:[%s4915_s6 + $0x78] sm:$0xff] %v2704_v16  ;;  %v2708_v43 = vadd.f32 %v2707_v58, %v4640_v50  ;;  %v2620_v42 = vpop.f32.mrf.mxu0 }
 0x34f   :  { %2752 = vst [vmem:[%s4915_s6 + $0xe0] sm:$0xff] %v2619_v27  ;;  %v2621_v46 = vadd.f32 %v2620_v42, %v4640_v50  ;;  %v2709_v44 = vpop.f32.mrf.mxu1 }
 0x350   :  { %2754 = vst [vmem:[%s4915_s6 + $0xf0] sm:$0xff] %v2708_v43  ;;  %v2710_v10 = vadd.f32 %v2709_v44, %v4640_v50  ;;  %v2624_v29 = vpop.f32.mrf.mxu0 }
 0x351   :  { %2753 = vst [vmem:[%s4915_s6 + $0xe8] sm:$0xff] %v2621_v46  ;;  %v2625_v24 = vadd.f32 %v2624_v29, %v4662_v8  ;;  %v2713_v12 = vpop.f32.mrf.mxu1 }
 0x352   :  { %2755 = vst [vmem:[%s4915_s6 + $0xf8] sm:$0xff] %v2710_v10  ;;  %v2714_v57 = vadd.f32 %v2713_v12, %v4662_v8  ;;  %v2626_v56 = vpop.f32.mrf.mxu0 }
 0x353   :  { %2768 = vst [vmem:[%s4915_s6 + $0x160] sm:$0xff] %v2625_v24  ;;  %v2627_v50 = vadd.f32 %v2626_v56, %v4662_v8  ;;  %v2715_v59 = vpop.f32.mrf.mxu1 }
 0x354   :  { %2770 = vst [vmem:[%s4915_s6 + $0x170] sm:$0xff] %v2714_v57  ;;  %v2716_v9 = vadd.f32 %v2715_v59, %v4662_v8  ;;  %v2630_v37 = vpop.f32.mrf.mxu0 }
 0x355   :  { %2769 = vst [vmem:[%s4915_s6 + $0x168] sm:$0xff] %v2627_v50  ;;  %v2631_v54 = vadd.f32 %v2630_v37, %v4684_v1  ;;  %v2719_v38 = vpop.f32.mrf.mxu1 }
 0x356   :  { %2771 = vst [vmem:[%s4915_s6 + $0x178] sm:$0xff] %v2716_v9  ;;  %v2720_v34 = vadd.f32 %v2719_v38, %v4684_v1  ;;  %v2632_v40 = vpop.f32.mrf.mxu0 }
 0x357   :  { %2784 = vst [vmem:[%s4915_s6 + $0x1e0] sm:$0xff] %v2631_v54  ;;  %v2633_v8 = vadd.f32 %v2632_v40, %v4684_v1  ;;  %v2721_v0 = vpop.f32.mrf.mxu1 }
 0x358   :  { %2786 = vst [vmem:[%s4915_s6 + $0x1f0] sm:$0xff] %v2720_v34  ;;  %v2722_v35 = vadd.f32 %v2721_v0, %v4684_v1 }
 0x359   :  { %2785 = vst [vmem:[%s4915_s6 + $0x1e8] sm:$0xff] %v2633_v8 }
 0x35a   :  { %2787 = vst [vmem:[%s4915_s6 + $0x1f8] sm:$0xff] %v2722_v35 }

</bundles_post_ra>
